<compile_context>
chip_gen: v5e
topology: v5e:2x2
jax: 0.10.0
libtpu: 0.0.40
codegen_flags: <defaults>
</compile_context>

<pallas_src>
import math

import jax
import jax.numpy as jnp
import numpy as np
from jax import lax
from jax.experimental import pallas as pl
from jax.experimental.pallas import tpu as pltpu


def _make_encoder_kernel(num_layers, T, Bp, H, unroll):
    """Builds a fused multi-layer BiLSTM kernel.

    Ref layout (positional):
      refs[0]                      x      (T*Bp, in0)    time-major, flattened
      refs[1+4l : 5+4l] per layer  wih    (in_l, 8H)     cols [fwd i,f,g,o | bwd i,f,g,o]
                                   whh_f  (H, 4H)
                                   whh_b  (H, 4H)
                                   bias   (1, 8H)        b_ih + b_hh, same col layout
      refs[1+4L]                   out    (T*Bp, 2H)     [:, :H] fwd, [:, H:] bwd
      scratches:                   xg     (T*Bp, 8H)     hoisted gate projections
                                   act    (T*Bp, 2H)     inter-layer activation
                                   hbf    (T*Bp, H)      fwd hidden history
                                   hbb    (T*Bp, H)      bwd hidden history
    """
    H4 = 4 * H

    def kernel(*refs):
        x_ref = refs[0]
        out_ref = refs[1 + 4 * num_layers]
        xg_ref, act_ref, hbf_ref, hbb_ref = refs[2 + 4 * num_layers:]

        def run_layer(x_in, wih_ref, whhf_ref, whhb_ref, bias_ref, dst_ref):
            # Hoisted input projection for ALL timesteps and BOTH directions:
            # one big MXU matmul + fused bias, off the serial recurrence.
            xg_ref[...] = (
                jnp.dot(x_in, wih_ref[...], preferred_element_type=jnp.float32)
                + bias_ref[...])

            # Loop-invariant recurrent weights, read once.
            whhf = whhf_ref[...]
            whhb = whhb_ref[...]

            def step(t, carry):
                hf, cf, hb, cb = carry
                tb = T - 1 - t
                rf = pl.multiple_of(t * Bp, Bp)
                rb = pl.multiple_of(tb * Bp, Bp)

                # One aligned row slice per direction (no per-step select) and
                # two dense (Bp,H)@(H,4H) recurrent matmuls (no zero blocks).
                gf = xg_ref[pl.ds(rf, Bp), pl.ds(0, H4)] + jnp.dot(
                    hf, whhf, preferred_element_type=jnp.float32)
                gb = xg_ref[pl.ds(rb, Bp), pl.ds(H4, H4)] + jnp.dot(
                    hb, whhb, preferred_element_type=jnp.float32)

                # Forward chain.
                i_f = jax.nn.sigmoid(gf[:, 0:H])
                f_f = jax.nn.sigmoid(gf[:, H:2 * H])
                g_f = jnp.tanh(gf[:, 2 * H:3 * H])
                o_f = jax.nn.sigmoid(gf[:, 3 * H:4 * H])
                cf = f_f * cf + i_f * g_f
                hf = o_f * jnp.tanh(cf)

                # Backward chain (independent of the forward one; the LLO
                # scheduler staggers its MXU/EUP work against the fwd chain).
                i_b = jax.nn.sigmoid(gb[:, 0:H])
                f_b = jax.nn.sigmoid(gb[:, H:2 * H])
                g_b = jnp.tanh(gb[:, 2 * H:3 * H])
                o_b = jax.nn.sigmoid(gb[:, 3 * H:4 * H])
                cb = f_b * cb + i_b * g_b
                hb = o_b * jnp.tanh(cb)

                # Lane-0-aligned full-tile stores into per-direction history
                # scratches (bwd stored at its output time tb); the 2H-wide
                # merge happens once, after the loop.
                hbf_ref[pl.ds(rf, Bp), :] = hf
                hbb_ref[pl.ds(rb, Bp), :] = hb
                return (hf, cf, hb, cb)

            z = jnp.zeros((Bp, H), jnp.float32)
            lax.fori_loop(0, T, step, (z, z, z, z), unroll=unroll)

            # Bulk, off-recurrence merge of the two direction buffers.
            dst_ref[:, 0:H] = hbf_ref[...]
            dst_ref[:, H:2 * H] = hbb_ref[...]

        # NOTE: padded batch rows (B..Bp) carry nonzero (garbage) activations
        # between layers; the LSTM never mixes batch rows, and the wrapper
        # slices them off, so this is harmless.
        x_in = x_ref[...]
        for layer in range(num_layers):
            wih_ref, whhf_ref, whhb_ref, bias_ref = refs[1 + 4 * layer:5 + 4 * layer]
            dst_ref = out_ref if layer == num_layers - 1 else act_ref
            run_layer(x_in, wih_ref, whhf_ref, whhb_ref, bias_ref, dst_ref)
            if layer < num_layers - 1:
                x_in = act_ref[...]

    return kernel


def pack_layer_params(layer, hidden_size):
    """Pack per-direction PyTorch-layout weights into the kernel layout."""
    H = hidden_size
    (wih_f, whh_f, bih_f, bhh_f), (wih_b, whh_b, bih_b, bhh_b) = layer
    wih = jnp.concatenate([wih_f.T, wih_b.T], axis=1)                  # (in, 8H)
    bias = jnp.concatenate([bih_f + bhh_f, bih_b + bhh_b])[None, :]    # (1, 8H)
    return wih, whh_f.T, whh_b.T, bias                                 # whh: (H, 4H)


def _encoder_impl(inputs, packed_layers, hidden_size):
    B, T, in0 = inputs.shape
    H = hidden_size
    num_layers = len(packed_layers)
    Bp = ((B + 7) // 8) * 8  # pad batch to full 8-sublane tiles

    x = jnp.transpose(inputs, (1, 0, 2))            # -> time-major (T, B, in)
    if Bp != B:
        x = jnp.pad(x, ((0, 0), (0, Bp - B), (0, 0)))
    x_flat = x.reshape(T * Bp, in0)

    params = []
    in_sizes = []
    for (wih, whhf, whhb, bias) in packed_layers:
        params += [wih, whhf, whhb, bias]
        in_sizes.append(wih.shape[0])

    # Advisory cost estimate for XLA's scheduler.
    flops = 0
    for ins in in_sizes:
        flops += 2 * T * Bp * ins * 8 * H            # hoisted input projection
        flops += 2 * (2 * T * Bp * H * 4 * H)        # two recurrent matmuls
        flops += 12 * T * Bp * 2 * H                 # elementwise cell updates
    transcendentals = num_layers * T * Bp * 2 * 5 * H
    param_bytes = sum(int(np.prod(p.shape)) * 4 for p in params)
    io_bytes = (T * Bp * in0 + T * Bp * 2 * H) * 4
    cost = pl.CostEstimate(flops=int(flops),
                           transcendentals=int(transcendentals),
                           bytes_accessed=int(io_bytes + param_bytes))

    scratch_bytes = T * Bp * (8 * H + 2 * H + 2 * H) * 4
    vmem_needed = scratch_bytes + io_bytes + param_bytes
    vmem_limit = int(min(max(2 * vmem_needed, 8 << 20), 64 << 20))

    unroll = T if T <= 16 else 8
    kernel = _make_encoder_kernel(num_layers, T, Bp, H, unroll)
    vmem = pl.BlockSpec(memory_space=pltpu.MemorySpace.VMEM)

    out_flat = pl.pallas_call(
        kernel,
        out_shape=jax.ShapeDtypeStruct((T * Bp, 2 * H), jnp.float32),
        in_specs=[vmem] * (1 + 4 * num_layers),
        out_specs=vmem,
        scratch_shapes=[
            pltpu.VMEM((T * Bp, 8 * H), jnp.float32),   # xg: gate projections
            pltpu.VMEM((T * Bp, 2 * H), jnp.float32),   # inter-layer activation
            pltpu.VMEM((T * Bp, H), jnp.float32),       # fwd hidden history
            pltpu.VMEM((T * Bp, H), jnp.float32),       # bwd hidden history
        ],
        compiler_params=pltpu.CompilerParams(vmem_limit_bytes=vmem_limit),
        cost_estimate=cost,
    )(x_flat, *params)

    out = out_flat.reshape(T, Bp, 2 * H)[:, :B, :]
    return jnp.transpose(out, (1, 0, 2))            # back to (B, T, 2H)
    # TODO(synk): inter-layer dropout omitted (module uses dropout=0.0;
    # identity at inference anyway).


encoder_bilstm_forward = jax.jit(_encoder_impl, static_argnums=(2,))


def init_bilstm_params(key, input_size, hidden_size, num_layers):
    """nn.LSTM-style init: uniform(-1/sqrt(H), 1/sqrt(H)), PyTorch shapes."""
    k = 1.0 / math.sqrt(hidden_size)
    layers = []
    for layer in range(num_layers):
        in_size = input_size if layer == 0 else 2 * hidden_size
        dirs = []
        for _direction in range(2):  # forward, backward
            key, k1, k2, k3, k4 = jax.random.split(key, 5)
            w_ih = jax.random.uniform(k1, (4 * hidden_size, in_size),
                                      jnp.float32, -k, k)
            w_hh = jax.random.uniform(k2, (4 * hidden_size, hidden_size),
                                      jnp.float32, -k, k)
            b_ih = jax.random.uniform(k3, (4 * hidden_size,), jnp.float32, -k, k)
            b_hh = jax.random.uniform(k4, (4 * hidden_size,), jnp.float32, -k, k)
            dirs.append((w_ih, w_hh, b_ih, b_hh))
        layers.append(tuple(dirs))
    return layers


def reference_bilstm(inputs, layers, H):
    """Pure-JAX reference mirroring torch.nn.LSTM math (fp32)."""
    x = jnp.transpose(inputs, (1, 0, 2))
    for (f_params, b_params) in layers:
        B = x.shape[1]

        def run_dir(xs, params):
            w_ih, w_hh, b_ih, b_hh = params
            wih, whh, b = w_ih.T, w_hh.T, (b_ih + b_hh)[None, :]

            def step(carry, x_t):
                h, c = carry
                gates = x_t @ wih + h @ whh + b
                i = jax.nn.sigmoid(gates[:, 0:H])
                f = jax.nn.sigmoid(gates[:, H:2 * H])
                g = jnp.tanh(gates[:, 2 * H:3 * H])
                o = jax.nn.sigmoid(gates[:, 3 * H:4 * H])
                c = f * c + i * g
                h = o * jnp.tanh(c)
                return (h, c), h

            init = (jnp.zeros((B, H), jnp.float32), jnp.zeros((B, H), jnp.float32))
            _, hs = lax.scan(step, init, xs)
            return hs

        out_f = run_dir(x, f_params)
        out_b = run_dir(x[::-1], b_params)[::-1]
        x = jnp.concatenate([out_f, out_b], axis=-1)
    return jnp.transpose(x, (1, 0, 2))


if __name__ == "__main__":
    # Encoder_BiLSTM(input_size=16, hidden_size=32, num_layers=2, dropout=0.0,
    #                bidirectional=True, batch_first=True)
    B, T = 2, 8
    input_size, hidden_size, num_layers = 16, 32, 2

    key = jax.random.PRNGKey(0)
    key, pkey, xkey = jax.random.split(key, 3)
    raw_params = init_bilstm_params(pkey, input_size, hidden_size, num_layers)
    packed_layers = [pack_layer_params(lp, hidden_size) for lp in raw_params]
    inputs = jax.random.normal(xkey, (B, T, input_size), jnp.float32)

    out = encoder_bilstm_forward(inputs, packed_layers, hidden_size)
    out = jax.block_until_ready(out)
    assert out.shape == (B, T, 2 * hidden_size)

    ref = jax.block_until_ready(reference_bilstm(inputs, raw_params, hidden_size))
    np.testing.assert_allclose(np.asarray(out), np.asarray(ref),
                               rtol=2e-3, atol=2e-3)

    print("KERNEL_OK")
</pallas_src>

<mosaic_0001>
module attributes {stable_mosaic.version = 11 : i64} {
  func.func @kernel(%arg0: memref<64x16xf32, #tpu.memory_space<vmem>>, %arg1: memref<16x256xf32, #tpu.memory_space<vmem>>, %arg2: memref<32x128xf32, #tpu.memory_space<vmem>>, %arg3: memref<32x128xf32, #tpu.memory_space<vmem>>, %arg4: memref<1x256xf32, #tpu.memory_space<vmem>>, %arg5: memref<64x256xf32, #tpu.memory_space<vmem>>, %arg6: memref<32x128xf32, #tpu.memory_space<vmem>>, %arg7: memref<32x128xf32, #tpu.memory_space<vmem>>, %arg8: memref<1x256xf32, #tpu.memory_space<vmem>>, %arg9: memref<64x64xf32, #tpu.memory_space<vmem>>, %arg10: memref<64x256xf32, #tpu.memory_space<vmem>>, %arg11: memref<64x64xf32, #tpu.memory_space<vmem>>, %arg12: memref<64x32xf32, #tpu.memory_space<vmem>>, %arg13: memref<64x32xf32, #tpu.memory_space<vmem>>) attributes {dimension_semantics = [], scalar_prefetch = 0 : i64, scratch_operands = 4 : i64, tpu.core_type = #tpu.core_type<tc>} {
    %c0 = arith.constant 0 : index
    %c0_0 = arith.constant 0 : index
    %0 = vector.load %arg0[%c0, %c0_0] : memref<64x16xf32, #tpu.memory_space<vmem>>, vector<64x16xf32>
    %c0_1 = arith.constant 0 : index
    %c0_2 = arith.constant 0 : index
    %1 = vector.load %arg1[%c0_1, %c0_2] : memref<16x256xf32, #tpu.memory_space<vmem>>, vector<16x256xf32>
    %cst = arith.constant dense<0.000000e+00> : vector<64x256xf32>
    %2 = tpu.matmul %0, %1, %cst {dimension_numbers = #tpu.dot_dimension_numbers<[1], [0], [0], [1], [0, 0, 1, 1], [], []>} : vector<64x16xf32>, vector<16x256xf32>, vector<64x256xf32> -> vector<64x256xf32>
    %c0_3 = arith.constant 0 : index
    %c0_4 = arith.constant 0 : index
    %3 = vector.load %arg4[%c0_3, %c0_4] : memref<1x256xf32, #tpu.memory_space<vmem>>, vector<1x256xf32>
    %4 = vector.broadcast %3 : vector<1x256xf32> to vector<64x256xf32>
    %5 = arith.addf %2, %4 : vector<64x256xf32>
    %c0_5 = arith.constant 0 : index
    %c0_6 = arith.constant 0 : index
    %6 = vector.load %arg10[%c0_5, %c0_6] : memref<64x256xf32, #tpu.memory_space<vmem>>, vector<64x256xf32>
    tpu.vector_store %arg10[%c0_5, %c0_6], %5 {strides = array<i32>} : memref<64x256xf32, #tpu.memory_space<vmem>>, vector<64x256xf32>,
    %c0_7 = arith.constant 0 : index
    %c0_8 = arith.constant 0 : index
    %7 = vector.load %arg2[%c0_7, %c0_8] : memref<32x128xf32, #tpu.memory_space<vmem>>, vector<32x128xf32>
    %c0_9 = arith.constant 0 : index
    %c0_10 = arith.constant 0 : index
    %8 = vector.load %arg3[%c0_9, %c0_10] : memref<32x128xf32, #tpu.memory_space<vmem>>, vector<32x128xf32>
    %cst_11 = arith.constant 0.000000e+00 : f32
    %9 = vector.broadcast %cst_11 : f32 to vector<8x32xf32>
    %c0_i32 = arith.constant 0 : i32
    %c7_i32 = arith.constant 7 : i32
    %10 = arith.subi %c7_i32, %c0_i32 : i32
    %c8_i32 = arith.constant 8 : i32
    %11 = arith.muli %c0_i32, %c8_i32 : i32
    %12 = tpu.assume_multiple %11, 8 : i32
    %c8_i32_12 = arith.constant 8 : i32
    %13 = arith.muli %10, %c8_i32_12 : i32
    %14 = tpu.assume_multiple %13, 8 : i32
    %15 = arith.index_cast %12 : i32 to index
    %c0_13 = arith.constant 0 : index
    %16 = vector.load %arg10[%15, %c0_13] : memref<64x256xf32, #tpu.memory_space<vmem>>, vector<8x128xf32>
    %cst_14 = arith.constant dense<0.000000e+00> : vector<8x128xf32>
    %17 = tpu.matmul %9, %7, %cst_14 {dimension_numbers = #tpu.dot_dimension_numbers<[1], [0], [0], [1], [0, 0, 1, 1], [], []>} : vector<8x32xf32>, vector<32x128xf32>, vector<8x128xf32> -> vector<8x128xf32>
    %18 = arith.addf %16, %17 : vector<8x128xf32>
    %19 = arith.index_cast %14 : i32 to index
    %c128 = arith.constant 128 : index
    %20 = vector.load %arg10[%19, %c128] : memref<64x256xf32, #tpu.memory_space<vmem>>, vector<8x128xf32>
    %cst_15 = arith.constant dense<0.000000e+00> : vector<8x128xf32>
    %21 = tpu.matmul %9, %8, %cst_15 {dimension_numbers = #tpu.dot_dimension_numbers<[1], [0], [0], [1], [0, 0, 1, 1], [], []>} : vector<8x32xf32>, vector<32x128xf32>, vector<8x128xf32> -> vector<8x128xf32>
    %22 = arith.addf %20, %21 : vector<8x128xf32>
    %23 = vector.extract_strided_slice %18 {offsets = [0, 0], sizes = [8, 32], strides = [1, 1]} : vector<8x128xf32> to vector<8x32xf32>
    %24 = arith.negf %23 : vector<8x32xf32>
    %25 = math.exp %24 : vector<8x32xf32>
    %cst_16 = arith.constant 1.000000e+00 : f32
    %26 = vector.broadcast %cst_16 : f32 to vector<8x32xf32>
    %27 = arith.addf %26, %25 : vector<8x32xf32>
    %28 = arith.divf %26, %27 : vector<8x32xf32>
    %29 = vector.extract_strided_slice %18 {offsets = [0, 32], sizes = [8, 32], strides = [1, 1]} : vector<8x128xf32> to vector<8x32xf32>
    %30 = arith.negf %29 : vector<8x32xf32>
    %31 = math.exp %30 : vector<8x32xf32>
    %cst_17 = arith.constant 1.000000e+00 : f32
    %32 = vector.broadcast %cst_17 : f32 to vector<8x32xf32>
    %33 = arith.addf %32, %31 : vector<8x32xf32>
    %34 = arith.divf %32, %33 : vector<8x32xf32>
    %35 = vector.extract_strided_slice %18 {offsets = [0, 64], sizes = [8, 32], strides = [1, 1]} : vector<8x128xf32> to vector<8x32xf32>
    %36 = math.tanh %35 : vector<8x32xf32>
    %37 = vector.extract_strided_slice %18 {offsets = [0, 96], sizes = [8, 32], strides = [1, 1]} : vector<8x128xf32> to vector<8x32xf32>
    %38 = arith.negf %37 : vector<8x32xf32>
    %39 = math.exp %38 : vector<8x32xf32>
    %cst_18 = arith.constant 1.000000e+00 : f32
    %40 = vector.broadcast %cst_18 : f32 to vector<8x32xf32>
    %41 = arith.addf %40, %39 : vector<8x32xf32>
    %42 = arith.divf %40, %41 : vector<8x32xf32>
    %43 = arith.mulf %34, %9 : vector<8x32xf32>
    %44 = arith.mulf %28, %36 : vector<8x32xf32>
    %45 = arith.addf %43, %44 : vector<8x32xf32>
    %46 = math.tanh %45 : vector<8x32xf32>
    %47 = arith.mulf %42, %46 : vector<8x32xf32>
    %48 = vector.extract_strided_slice %22 {offsets = [0, 0], sizes = [8, 32], strides = [1, 1]} : vector<8x128xf32> to vector<8x32xf32>
    %49 = arith.negf %48 : vector<8x32xf32>
    %50 = math.exp %49 : vector<8x32xf32>
    %cst_19 = arith.constant 1.000000e+00 : f32
    %51 = vector.broadcast %cst_19 : f32 to vector<8x32xf32>
    %52 = arith.addf %51, %50 : vector<8x32xf32>
    %53 = arith.divf %51, %52 : vector<8x32xf32>
    %54 = vector.extract_strided_slice %22 {offsets = [0, 32], sizes = [8, 32], strides = [1, 1]} : vector<8x128xf32> to vector<8x32xf32>
    %55 = arith.negf %54 : vector<8x32xf32>
    %56 = math.exp %55 : vector<8x32xf32>
    %cst_20 = arith.constant 1.000000e+00 : f32
    %57 = vector.broadcast %cst_20 : f32 to vector<8x32xf32>
    %58 = arith.addf %57, %56 : vector<8x32xf32>
    %59 = arith.divf %57, %58 : vector<8x32xf32>
    %60 = vector.extract_strided_slice %22 {offsets = [0, 64], sizes = [8, 32], strides = [1, 1]} : vector<8x128xf32> to vector<8x32xf32>
    %61 = math.tanh %60 : vector<8x32xf32>
    %62 = vector.extract_strided_slice %22 {offsets = [0, 96], sizes = [8, 32], strides = [1, 1]} : vector<8x128xf32> to vector<8x32xf32>
    %63 = arith.negf %62 : vector<8x32xf32>
    %64 = math.exp %63 : vector<8x32xf32>
    %cst_21 = arith.constant 1.000000e+00 : f32
    %65 = vector.broadcast %cst_21 : f32 to vector<8x32xf32>
    %66 = arith.addf %65, %64 : vector<8x32xf32>
    %67 = arith.divf %65, %66 : vector<8x32xf32>
    %68 = arith.mulf %59, %9 : vector<8x32xf32>
    %69 = arith.mulf %53, %61 : vector<8x32xf32>
    %70 = arith.addf %68, %69 : vector<8x32xf32>
    %71 = math.tanh %70 : vector<8x32xf32>
    %72 = arith.mulf %67, %71 : vector<8x32xf32>
    %73 = arith.index_cast %12 : i32 to index
    %c0_22 = arith.constant 0 : index
    %74 = vector.load %arg12[%73, %c0_22] : memref<64x32xf32, #tpu.memory_space<vmem>>, vector<8x32xf32>
    tpu.vector_store %arg12[%73, %c0_22], %47 {strides = array<i32>} : memref<64x32xf32, #tpu.memory_space<vmem>>, vector<8x32xf32>,
    %75 = arith.index_cast %14 : i32 to index
    %c0_23 = arith.constant 0 : index
    %76 = vector.load %arg13[%75, %c0_23] : memref<64x32xf32, #tpu.memory_space<vmem>>, vector<8x32xf32>
    tpu.vector_store %arg13[%75, %c0_23], %72 {strides = array<i32>} : memref<64x32xf32, #tpu.memory_space<vmem>>, vector<8x32xf32>,
    %c1_i32 = arith.constant 1 : i32
    %c7_i32_24 = arith.constant 7 : i32
    %77 = arith.subi %c7_i32_24, %c1_i32 : i32
    %c8_i32_25 = arith.constant 8 : i32
    %78 = arith.muli %c1_i32, %c8_i32_25 : i32
    %79 = tpu.assume_multiple %78, 8 : i32
    %c8_i32_26 = arith.constant 8 : i32
    %80 = arith.muli %77, %c8_i32_26 : i32
    %81 = tpu.assume_multiple %80, 8 : i32
    %82 = arith.index_cast %79 : i32 to index
    %c0_27 = arith.constant 0 : index
    %83 = vector.load %arg10[%82, %c0_27] : memref<64x256xf32, #tpu.memory_space<vmem>>, vector<8x128xf32>
    %cst_28 = arith.constant dense<0.000000e+00> : vector<8x128xf32>
    %84 = tpu.matmul %47, %7, %cst_28 {dimension_numbers = #tpu.dot_dimension_numbers<[1], [0], [0], [1], [0, 0, 1, 1], [], []>} : vector<8x32xf32>, vector<32x128xf32>, vector<8x128xf32> -> vector<8x128xf32>
    %85 = arith.addf %83, %84 : vector<8x128xf32>
    %86 = arith.index_cast %81 : i32 to index
    %c128_29 = arith.constant 128 : index
    %87 = vector.load %arg10[%86, %c128_29] : memref<64x256xf32, #tpu.memory_space<vmem>>, vector<8x128xf32>
    %cst_30 = arith.constant dense<0.000000e+00> : vector<8x128xf32>
    %88 = tpu.matmul %72, %8, %cst_30 {dimension_numbers = #tpu.dot_dimension_numbers<[1], [0], [0], [1], [0, 0, 1, 1], [], []>} : vector<8x32xf32>, vector<32x128xf32>, vector<8x128xf32> -> vector<8x128xf32>
    %89 = arith.addf %87, %88 : vector<8x128xf32>
    %90 = vector.extract_strided_slice %85 {offsets = [0, 0], sizes = [8, 32], strides = [1, 1]} : vector<8x128xf32> to vector<8x32xf32>
    %91 = arith.negf %90 : vector<8x32xf32>
    %92 = math.exp %91 : vector<8x32xf32>
    %cst_31 = arith.constant 1.000000e+00 : f32
    %93 = vector.broadcast %cst_31 : f32 to vector<8x32xf32>
    %94 = arith.addf %93, %92 : vector<8x32xf32>
    %95 = arith.divf %93, %94 : vector<8x32xf32>
    %96 = vector.extract_strided_slice %85 {offsets = [0, 32], sizes = [8, 32], strides = [1, 1]} : vector<8x128xf32> to vector<8x32xf32>
    %97 = arith.negf %96 : vector<8x32xf32>
    %98 = math.exp %97 : vector<8x32xf32>
    %cst_32 = arith.constant 1.000000e+00 : f32
    %99 = vector.broadcast %cst_32 : f32 to vector<8x32xf32>
    %100 = arith.addf %99, %98 : vector<8x32xf32>
    %101 = arith.divf %99, %100 : vector<8x32xf32>
    %102 = vector.extract_strided_slice %85 {offsets = [0, 64], sizes = [8, 32], strides = [1, 1]} : vector<8x128xf32> to vector<8x32xf32>
    %103 = math.tanh %102 : vector<8x32xf32>
    %104 = vector.extract_strided_slice %85 {offsets = [0, 96], sizes = [8, 32], strides = [1, 1]} : vector<8x128xf32> to vector<8x32xf32>
    %105 = arith.negf %104 : vector<8x32xf32>
    %106 = math.exp %105 : vector<8x32xf32>
    %cst_33 = arith.constant 1.000000e+00 : f32
    %107 = vector.broadcast %cst_33 : f32 to vector<8x32xf32>
    %108 = arith.addf %107, %106 : vector<8x32xf32>
    %109 = arith.divf %107, %108 : vector<8x32xf32>
    %110 = arith.mulf %101, %45 : vector<8x32xf32>
    %111 = arith.mulf %95, %103 : vector<8x32xf32>
    %112 = arith.addf %110, %111 : vector<8x32xf32>
    %113 = math.tanh %112 : vector<8x32xf32>
    %114 = arith.mulf %109, %113 : vector<8x32xf32>
    %115 = vector.extract_strided_slice %89 {offsets = [0, 0], sizes = [8, 32], strides = [1, 1]} : vector<8x128xf32> to vector<8x32xf32>
    %116 = arith.negf %115 : vector<8x32xf32>
    %117 = math.exp %116 : vector<8x32xf32>
    %cst_34 = arith.constant 1.000000e+00 : f32
    %118 = vector.broadcast %cst_34 : f32 to vector<8x32xf32>
    %119 = arith.addf %118, %117 : vector<8x32xf32>
    %120 = arith.divf %118, %119 : vector<8x32xf32>
    %121 = vector.extract_strided_slice %89 {offsets = [0, 32], sizes = [8, 32], strides = [1, 1]} : vector<8x128xf32> to vector<8x32xf32>
    %122 = arith.negf %121 : vector<8x32xf32>
    %123 = math.exp %122 : vector<8x32xf32>
    %cst_35 = arith.constant 1.000000e+00 : f32
    %124 = vector.broadcast %cst_35 : f32 to vector<8x32xf32>
    %125 = arith.addf %124, %123 : vector<8x32xf32>
    %126 = arith.divf %124, %125 : vector<8x32xf32>
    %127 = vector.extract_strided_slice %89 {offsets = [0, 64], sizes = [8, 32], strides = [1, 1]} : vector<8x128xf32> to vector<8x32xf32>
    %128 = math.tanh %127 : vector<8x32xf32>
    %129 = vector.extract_strided_slice %89 {offsets = [0, 96], sizes = [8, 32], strides = [1, 1]} : vector<8x128xf32> to vector<8x32xf32>
    %130 = arith.negf %129 : vector<8x32xf32>
    %131 = math.exp %130 : vector<8x32xf32>
    %cst_36 = arith.constant 1.000000e+00 : f32
    %132 = vector.broadcast %cst_36 : f32 to vector<8x32xf32>
    %133 = arith.addf %132, %131 : vector<8x32xf32>
    %134 = arith.divf %132, %133 : vector<8x32xf32>
    %135 = arith.mulf %126, %70 : vector<8x32xf32>
    %136 = arith.mulf %120, %128 : vector<8x32xf32>
    %137 = arith.addf %135, %136 : vector<8x32xf32>
    %138 = math.tanh %137 : vector<8x32xf32>
    %139 = arith.mulf %134, %138 : vector<8x32xf32>
    %140 = arith.index_cast %79 : i32 to index
    %c0_37 = arith.constant 0 : index
    %141 = vector.load %arg12[%140, %c0_37] : memref<64x32xf32, #tpu.memory_space<vmem>>, vector<8x32xf32>
    tpu.vector_store %arg12[%140, %c0_37], %114 {strides = array<i32>} : memref<64x32xf32, #tpu.memory_space<vmem>>, vector<8x32xf32>,
    %142 = arith.index_cast %81 : i32 to index
    %c0_38 = arith.constant 0 : index
    %143 = vector.load %arg13[%142, %c0_38] : memref<64x32xf32, #tpu.memory_space<vmem>>, vector<8x32xf32>
    tpu.vector_store %arg13[%142, %c0_38], %139 {strides = array<i32>} : memref<64x32xf32, #tpu.memory_space<vmem>>, vector<8x32xf32>,
    %c2_i32 = arith.constant 2 : i32
    %c7_i32_39 = arith.constant 7 : i32
    %144 = arith.subi %c7_i32_39, %c2_i32 : i32
    %c8_i32_40 = arith.constant 8 : i32
    %145 = arith.muli %c2_i32, %c8_i32_40 : i32
    %146 = tpu.assume_multiple %145, 8 : i32
    %c8_i32_41 = arith.constant 8 : i32
    %147 = arith.muli %144, %c8_i32_41 : i32
    %148 = tpu.assume_multiple %147, 8 : i32
    %149 = arith.index_cast %146 : i32 to index
    %c0_42 = arith.constant 0 : index
    %150 = vector.load %arg10[%149, %c0_42] : memref<64x256xf32, #tpu.memory_space<vmem>>, vector<8x128xf32>
    %cst_43 = arith.constant dense<0.000000e+00> : vector<8x128xf32>
    %151 = tpu.matmul %114, %7, %cst_43 {dimension_numbers = #tpu.dot_dimension_numbers<[1], [0], [0], [1], [0, 0, 1, 1], [], []>} : vector<8x32xf32>, vector<32x128xf32>, vector<8x128xf32> -> vector<8x128xf32>
    %152 = arith.addf %150, %151 : vector<8x128xf32>
    %153 = arith.index_cast %148 : i32 to index
    %c128_44 = arith.constant 128 : index
    %154 = vector.load %arg10[%153, %c128_44] : memref<64x256xf32, #tpu.memory_space<vmem>>, vector<8x128xf32>
    %cst_45 = arith.constant dense<0.000000e+00> : vector<8x128xf32>
    %155 = tpu.matmul %139, %8, %cst_45 {dimension_numbers = #tpu.dot_dimension_numbers<[1], [0], [0], [1], [0, 0, 1, 1], [], []>} : vector<8x32xf32>, vector<32x128xf32>, vector<8x128xf32> -> vector<8x128xf32>
    %156 = arith.addf %154, %155 : vector<8x128xf32>
    %157 = vector.extract_strided_slice %152 {offsets = [0, 0], sizes = [8, 32], strides = [1, 1]} : vector<8x128xf32> to vector<8x32xf32>
    %158 = arith.negf %157 : vector<8x32xf32>
    %159 = math.exp %158 : vector<8x32xf32>
    %cst_46 = arith.constant 1.000000e+00 : f32
    %160 = vector.broadcast %cst_46 : f32 to vector<8x32xf32>
    %161 = arith.addf %160, %159 : vector<8x32xf32>
    %162 = arith.divf %160, %161 : vector<8x32xf32>
    %163 = vector.extract_strided_slice %152 {offsets = [0, 32], sizes = [8, 32], strides = [1, 1]} : vector<8x128xf32> to vector<8x32xf32>
    %164 = arith.negf %163 : vector<8x32xf32>
    %165 = math.exp %164 : vector<8x32xf32>
    %cst_47 = arith.constant 1.000000e+00 : f32
    %166 = vector.broadcast %cst_47 : f32 to vector<8x32xf32>
    %167 = arith.addf %166, %165 : vector<8x32xf32>
    %168 = arith.divf %166, %167 : vector<8x32xf32>
    %169 = vector.extract_strided_slice %152 {offsets = [0, 64], sizes = [8, 32], strides = [1, 1]} : vector<8x128xf32> to vector<8x32xf32>
    %170 = math.tanh %169 : vector<8x32xf32>
    %171 = vector.extract_strided_slice %152 {offsets = [0, 96], sizes = [8, 32], strides = [1, 1]} : vector<8x128xf32> to vector<8x32xf32>
    %172 = arith.negf %171 : vector<8x32xf32>
    %173 = math.exp %172 : vector<8x32xf32>
    %cst_48 = arith.constant 1.000000e+00 : f32
    %174 = vector.broadcast %cst_48 : f32 to vector<8x32xf32>
    %175 = arith.addf %174, %173 : vector<8x32xf32>
    %176 = arith.divf %174, %175 : vector<8x32xf32>
    %177 = arith.mulf %168, %112 : vector<8x32xf32>
    %178 = arith.mulf %162, %170 : vector<8x32xf32>
    %179 = arith.addf %177, %178 : vector<8x32xf32>
    %180 = math.tanh %179 : vector<8x32xf32>
    %181 = arith.mulf %176, %180 : vector<8x32xf32>
    %182 = vector.extract_strided_slice %156 {offsets = [0, 0], sizes = [8, 32], strides = [1, 1]} : vector<8x128xf32> to vector<8x32xf32>
    %183 = arith.negf %182 : vector<8x32xf32>
    %184 = math.exp %183 : vector<8x32xf32>
    %cst_49 = arith.constant 1.000000e+00 : f32
    %185 = vector.broadcast %cst_49 : f32 to vector<8x32xf32>
    %186 = arith.addf %185, %184 : vector<8x32xf32>
    %187 = arith.divf %185, %186 : vector<8x32xf32>
    %188 = vector.extract_strided_slice %156 {offsets = [0, 32], sizes = [8, 32], strides = [1, 1]} : vector<8x128xf32> to vector<8x32xf32>
    %189 = arith.negf %188 : vector<8x32xf32>
    %190 = math.exp %189 : vector<8x32xf32>
    %cst_50 = arith.constant 1.000000e+00 : f32
    %191 = vector.broadcast %cst_50 : f32 to vector<8x32xf32>
    %192 = arith.addf %191, %190 : vector<8x32xf32>
    %193 = arith.divf %191, %192 : vector<8x32xf32>
    %194 = vector.extract_strided_slice %156 {offsets = [0, 64], sizes = [8, 32], strides = [1, 1]} : vector<8x128xf32> to vector<8x32xf32>
    %195 = math.tanh %194 : vector<8x32xf32>
    %196 = vector.extract_strided_slice %156 {offsets = [0, 96], sizes = [8, 32], strides = [1, 1]} : vector<8x128xf32> to vector<8x32xf32>
    %197 = arith.negf %196 : vector<8x32xf32>
    %198 = math.exp %197 : vector<8x32xf32>
    %cst_51 = arith.constant 1.000000e+00 : f32
    %199 = vector.broadcast %cst_51 : f32 to vector<8x32xf32>
    %200 = arith.addf %199, %198 : vector<8x32xf32>
    %201 = arith.divf %199, %200 : vector<8x32xf32>
    %202 = arith.mulf %193, %137 : vector<8x32xf32>
    %203 = arith.mulf %187, %195 : vector<8x32xf32>
    %204 = arith.addf %202, %203 : vector<8x32xf32>
    %205 = math.tanh %204 : vector<8x32xf32>
    %206 = arith.mulf %201, %205 : vector<8x32xf32>
    %207 = arith.index_cast %146 : i32 to index
    %c0_52 = arith.constant 0 : index
    %208 = vector.load %arg12[%207, %c0_52] : memref<64x32xf32, #tpu.memory_space<vmem>>, vector<8x32xf32>
    tpu.vector_store %arg12[%207, %c0_52], %181 {strides = array<i32>} : memref<64x32xf32, #tpu.memory_space<vmem>>, vector<8x32xf32>,
    %209 = arith.index_cast %148 : i32 to index
    %c0_53 = arith.constant 0 : index
    %210 = vector.load %arg13[%209, %c0_53] : memref<64x32xf32, #tpu.memory_space<vmem>>, vector<8x32xf32>
    tpu.vector_store %arg13[%209, %c0_53], %206 {strides = array<i32>} : memref<64x32xf32, #tpu.memory_space<vmem>>, vector<8x32xf32>,
    %c3_i32 = arith.constant 3 : i32
    %c7_i32_54 = arith.constant 7 : i32
    %211 = arith.subi %c7_i32_54, %c3_i32 : i32
    %c8_i32_55 = arith.constant 8 : i32
    %212 = arith.muli %c3_i32, %c8_i32_55 : i32
    %213 = tpu.assume_multiple %212, 8 : i32
    %c8_i32_56 = arith.constant 8 : i32
    %214 = arith.muli %211, %c8_i32_56 : i32
    %215 = tpu.assume_multiple %214, 8 : i32
    %216 = arith.index_cast %213 : i32 to index
    %c0_57 = arith.constant 0 : index
    %217 = vector.load %arg10[%216, %c0_57] : memref<64x256xf32, #tpu.memory_space<vmem>>, vector<8x128xf32>
    %cst_58 = arith.constant dense<0.000000e+00> : vector<8x128xf32>
    %218 = tpu.matmul %181, %7, %cst_58 {dimension_numbers = #tpu.dot_dimension_numbers<[1], [0], [0], [1], [0, 0, 1, 1], [], []>} : vector<8x32xf32>, vector<32x128xf32>, vector<8x128xf32> -> vector<8x128xf32>
    %219 = arith.addf %217, %218 : vector<8x128xf32>
    %220 = arith.index_cast %215 : i32 to index
    %c128_59 = arith.constant 128 : index
    %221 = vector.load %arg10[%220, %c128_59] : memref<64x256xf32, #tpu.memory_space<vmem>>, vector<8x128xf32>
    %cst_60 = arith.constant dense<0.000000e+00> : vector<8x128xf32>
    %222 = tpu.matmul %206, %8, %cst_60 {dimension_numbers = #tpu.dot_dimension_numbers<[1], [0], [0], [1], [0, 0, 1, 1], [], []>} : vector<8x32xf32>, vector<32x128xf32>, vector<8x128xf32> -> vector<8x128xf32>
    %223 = arith.addf %221, %222 : vector<8x128xf32>
    %224 = vector.extract_strided_slice %219 {offsets = [0, 0], sizes = [8, 32], strides = [1, 1]} : vector<8x128xf32> to vector<8x32xf32>
    %225 = arith.negf %224 : vector<8x32xf32>
    %226 = math.exp %225 : vector<8x32xf32>
    %cst_61 = arith.constant 1.000000e+00 : f32
    %227 = vector.broadcast %cst_61 : f32 to vector<8x32xf32>
    %228 = arith.addf %227, %226 : vector<8x32xf32>
    %229 = arith.divf %227, %228 : vector<8x32xf32>
    %230 = vector.extract_strided_slice %219 {offsets = [0, 32], sizes = [8, 32], strides = [1, 1]} : vector<8x128xf32> to vector<8x32xf32>
    %231 = arith.negf %230 : vector<8x32xf32>
    %232 = math.exp %231 : vector<8x32xf32>
    %cst_62 = arith.constant 1.000000e+00 : f32
    %233 = vector.broadcast %cst_62 : f32 to vector<8x32xf32>
    %234 = arith.addf %233, %232 : vector<8x32xf32>
    %235 = arith.divf %233, %234 : vector<8x32xf32>
    %236 = vector.extract_strided_slice %219 {offsets = [0, 64], sizes = [8, 32], strides = [1, 1]} : vector<8x128xf32> to vector<8x32xf32>
    %237 = math.tanh %236 : vector<8x32xf32>
    %238 = vector.extract_strided_slice %219 {offsets = [0, 96], sizes = [8, 32], strides = [1, 1]} : vector<8x128xf32> to vector<8x32xf32>
    %239 = arith.negf %238 : vector<8x32xf32>
    %240 = math.exp %239 : vector<8x32xf32>
    %cst_63 = arith.constant 1.000000e+00 : f32
    %241 = vector.broadcast %cst_63 : f32 to vector<8x32xf32>
    %242 = arith.addf %241, %240 : vector<8x32xf32>
    %243 = arith.divf %241, %242 : vector<8x32xf32>
    %244 = arith.mulf %235, %179 : vector<8x32xf32>
    %245 = arith.mulf %229, %237 : vector<8x32xf32>
    %246 = arith.addf %244, %245 : vector<8x32xf32>
    %247 = math.tanh %246 : vector<8x32xf32>
    %248 = arith.mulf %243, %247 : vector<8x32xf32>
    %249 = vector.extract_strided_slice %223 {offsets = [0, 0], sizes = [8, 32], strides = [1, 1]} : vector<8x128xf32> to vector<8x32xf32>
    %250 = arith.negf %249 : vector<8x32xf32>
    %251 = math.exp %250 : vector<8x32xf32>
    %cst_64 = arith.constant 1.000000e+00 : f32
    %252 = vector.broadcast %cst_64 : f32 to vector<8x32xf32>
    %253 = arith.addf %252, %251 : vector<8x32xf32>
    %254 = arith.divf %252, %253 : vector<8x32xf32>
    %255 = vector.extract_strided_slice %223 {offsets = [0, 32], sizes = [8, 32], strides = [1, 1]} : vector<8x128xf32> to vector<8x32xf32>
    %256 = arith.negf %255 : vector<8x32xf32>
    %257 = math.exp %256 : vector<8x32xf32>
    %cst_65 = arith.constant 1.000000e+00 : f32
    %258 = vector.broadcast %cst_65 : f32 to vector<8x32xf32>
    %259 = arith.addf %258, %257 : vector<8x32xf32>
    %260 = arith.divf %258, %259 : vector<8x32xf32>
    %261 = vector.extract_strided_slice %223 {offsets = [0, 64], sizes = [8, 32], strides = [1, 1]} : vector<8x128xf32> to vector<8x32xf32>
    %262 = math.tanh %261 : vector<8x32xf32>
    %263 = vector.extract_strided_slice %223 {offsets = [0, 96], sizes = [8, 32], strides = [1, 1]} : vector<8x128xf32> to vector<8x32xf32>
    %264 = arith.negf %263 : vector<8x32xf32>
    %265 = math.exp %264 : vector<8x32xf32>
    %cst_66 = arith.constant 1.000000e+00 : f32
    %266 = vector.broadcast %cst_66 : f32 to vector<8x32xf32>
    %267 = arith.addf %266, %265 : vector<8x32xf32>
    %268 = arith.divf %266, %267 : vector<8x32xf32>
    %269 = arith.mulf %260, %204 : vector<8x32xf32>
    %270 = arith.mulf %254, %262 : vector<8x32xf32>
    %271 = arith.addf %269, %270 : vector<8x32xf32>
    %272 = math.tanh %271 : vector<8x32xf32>
    %273 = arith.mulf %268, %272 : vector<8x32xf32>
    %274 = arith.index_cast %213 : i32 to index
    %c0_67 = arith.constant 0 : index
    %275 = vector.load %arg12[%274, %c0_67] : memref<64x32xf32, #tpu.memory_space<vmem>>, vector<8x32xf32>
    tpu.vector_store %arg12[%274, %c0_67], %248 {strides = array<i32>} : memref<64x32xf32, #tpu.memory_space<vmem>>, vector<8x32xf32>,
    %276 = arith.index_cast %215 : i32 to index
    %c0_68 = arith.constant 0 : index
    %277 = vector.load %arg13[%276, %c0_68] : memref<64x32xf32, #tpu.memory_space<vmem>>, vector<8x32xf32>
    tpu.vector_store %arg13[%276, %c0_68], %273 {strides = array<i32>} : memref<64x32xf32, #tpu.memory_space<vmem>>, vector<8x32xf32>,
    %c4_i32 = arith.constant 4 : i32
    %c7_i32_69 = arith.constant 7 : i32
    %278 = arith.subi %c7_i32_69, %c4_i32 : i32
    %c8_i32_70 = arith.constant 8 : i32
    %279 = arith.muli %c4_i32, %c8_i32_70 : i32
    %280 = tpu.assume_multiple %279, 8 : i32
    %c8_i32_71 = arith.constant 8 : i32
    %281 = arith.muli %278, %c8_i32_71 : i32
    %282 = tpu.assume_multiple %281, 8 : i32
    %283 = arith.index_cast %280 : i32 to index
    %c0_72 = arith.constant 0 : index
    %284 = vector.load %arg10[%283, %c0_72] : memref<64x256xf32, #tpu.memory_space<vmem>>, vector<8x128xf32>
    %cst_73 = arith.constant dense<0.000000e+00> : vector<8x128xf32>
    %285 = tpu.matmul %248, %7, %cst_73 {dimension_numbers = #tpu.dot_dimension_numbers<[1], [0], [0], [1], [0, 0, 1, 1], [], []>} : vector<8x32xf32>, vector<32x128xf32>, vector<8x128xf32> -> vector<8x128xf32>
    %286 = arith.addf %284, %285 : vector<8x128xf32>
    %287 = arith.index_cast %282 : i32 to index
    %c128_74 = arith.constant 128 : index
    %288 = vector.load %arg10[%287, %c128_74] : memref<64x256xf32, #tpu.memory_space<vmem>>, vector<8x128xf32>
    %cst_75 = arith.constant dense<0.000000e+00> : vector<8x128xf32>
    %289 = tpu.matmul %273, %8, %cst_75 {dimension_numbers = #tpu.dot_dimension_numbers<[1], [0], [0], [1], [0, 0, 1, 1], [], []>} : vector<8x32xf32>, vector<32x128xf32>, vector<8x128xf32> -> vector<8x128xf32>
    %290 = arith.addf %288, %289 : vector<8x128xf32>
    %291 = vector.extract_strided_slice %286 {offsets = [0, 0], sizes = [8, 32], strides = [1, 1]} : vector<8x128xf32> to vector<8x32xf32>
    %292 = arith.negf %291 : vector<8x32xf32>
    %293 = math.exp %292 : vector<8x32xf32>
    %cst_76 = arith.constant 1.000000e+00 : f32
    %294 = vector.broadcast %cst_76 : f32 to vector<8x32xf32>
    %295 = arith.addf %294, %293 : vector<8x32xf32>
    %296 = arith.divf %294, %295 : vector<8x32xf32>
    %297 = vector.extract_strided_slice %286 {offsets = [0, 32], sizes = [8, 32], strides = [1, 1]} : vector<8x128xf32> to vector<8x32xf32>
    %298 = arith.negf %297 : vector<8x32xf32>
    %299 = math.exp %298 : vector<8x32xf32>
    %cst_77 = arith.constant 1.000000e+00 : f32
    %300 = vector.broadcast %cst_77 : f32 to vector<8x32xf32>
    %301 = arith.addf %300, %299 : vector<8x32xf32>
    %302 = arith.divf %300, %301 : vector<8x32xf32>
    %303 = vector.extract_strided_slice %286 {offsets = [0, 64], sizes = [8, 32], strides = [1, 1]} : vector<8x128xf32> to vector<8x32xf32>
    %304 = math.tanh %303 : vector<8x32xf32>
    %305 = vector.extract_strided_slice %286 {offsets = [0, 96], sizes = [8, 32], strides = [1, 1]} : vector<8x128xf32> to vector<8x32xf32>
    %306 = arith.negf %305 : vector<8x32xf32>
    %307 = math.exp %306 : vector<8x32xf32>
    %cst_78 = arith.constant 1.000000e+00 : f32
    %308 = vector.broadcast %cst_78 : f32 to vector<8x32xf32>
    %309 = arith.addf %308, %307 : vector<8x32xf32>
    %310 = arith.divf %308, %309 : vector<8x32xf32>
    %311 = arith.mulf %302, %246 : vector<8x32xf32>
    %312 = arith.mulf %296, %304 : vector<8x32xf32>
    %313 = arith.addf %311, %312 : vector<8x32xf32>
    %314 = math.tanh %313 : vector<8x32xf32>
    %315 = arith.mulf %310, %314 : vector<8x32xf32>
    %316 = vector.extract_strided_slice %290 {offsets = [0, 0], sizes = [8, 32], strides = [1, 1]} : vector<8x128xf32> to vector<8x32xf32>
    %317 = arith.negf %316 : vector<8x32xf32>
    %318 = math.exp %317 : vector<8x32xf32>
    %cst_79 = arith.constant 1.000000e+00 : f32
    %319 = vector.broadcast %cst_79 : f32 to vector<8x32xf32>
    %320 = arith.addf %319, %318 : vector<8x32xf32>
    %321 = arith.divf %319, %320 : vector<8x32xf32>
    %322 = vector.extract_strided_slice %290 {offsets = [0, 32], sizes = [8, 32], strides = [1, 1]} : vector<8x128xf32> to vector<8x32xf32>
    %323 = arith.negf %322 : vector<8x32xf32>
    %324 = math.exp %323 : vector<8x32xf32>
    %cst_80 = arith.constant 1.000000e+00 : f32
    %325 = vector.broadcast %cst_80 : f32 to vector<8x32xf32>
    %326 = arith.addf %325, %324 : vector<8x32xf32>
    %327 = arith.divf %325, %326 : vector<8x32xf32>
    %328 = vector.extract_strided_slice %290 {offsets = [0, 64], sizes = [8, 32], strides = [1, 1]} : vector<8x128xf32> to vector<8x32xf32>
    %329 = math.tanh %328 : vector<8x32xf32>
    %330 = vector.extract_strided_slice %290 {offsets = [0, 96], sizes = [8, 32], strides = [1, 1]} : vector<8x128xf32> to vector<8x32xf32>
    %331 = arith.negf %330 : vector<8x32xf32>
    %332 = math.exp %331 : vector<8x32xf32>
    %cst_81 = arith.constant 1.000000e+00 : f32
    %333 = vector.broadcast %cst_81 : f32 to vector<8x32xf32>
    %334 = arith.addf %333, %332 : vector<8x32xf32>
    %335 = arith.divf %333, %334 : vector<8x32xf32>
    %336 = arith.mulf %327, %271 : vector<8x32xf32>
    %337 = arith.mulf %321, %329 : vector<8x32xf32>
    %338 = arith.addf %336, %337 : vector<8x32xf32>
    %339 = math.tanh %338 : vector<8x32xf32>
    %340 = arith.mulf %335, %339 : vector<8x32xf32>
    %341 = arith.index_cast %280 : i32 to index
    %c0_82 = arith.constant 0 : index
    %342 = vector.load %arg12[%341, %c0_82] : memref<64x32xf32, #tpu.memory_space<vmem>>, vector<8x32xf32>
    tpu.vector_store %arg12[%341, %c0_82], %315 {strides = array<i32>} : memref<64x32xf32, #tpu.memory_space<vmem>>, vector<8x32xf32>,
    %343 = arith.index_cast %282 : i32 to index
    %c0_83 = arith.constant 0 : index
    %344 = vector.load %arg13[%343, %c0_83] : memref<64x32xf32, #tpu.memory_space<vmem>>, vector<8x32xf32>
    tpu.vector_store %arg13[%343, %c0_83], %340 {strides = array<i32>} : memref<64x32xf32, #tpu.memory_space<vmem>>, vector<8x32xf32>,
    %c5_i32 = arith.constant 5 : i32
    %c7_i32_84 = arith.constant 7 : i32
    %345 = arith.subi %c7_i32_84, %c5_i32 : i32
    %c8_i32_85 = arith.constant 8 : i32
    %346 = arith.muli %c5_i32, %c8_i32_85 : i32
    %347 = tpu.assume_multiple %346, 8 : i32
    %c8_i32_86 = arith.constant 8 : i32
    %348 = arith.muli %345, %c8_i32_86 : i32
    %349 = tpu.assume_multiple %348, 8 : i32
    %350 = arith.index_cast %347 : i32 to index
    %c0_87 = arith.constant 0 : index
    %351 = vector.load %arg10[%350, %c0_87] : memref<64x256xf32, #tpu.memory_space<vmem>>, vector<8x128xf32>
    %cst_88 = arith.constant dense<0.000000e+00> : vector<8x128xf32>
    %352 = tpu.matmul %315, %7, %cst_88 {dimension_numbers = #tpu.dot_dimension_numbers<[1], [0], [0], [1], [0, 0, 1, 1], [], []>} : vector<8x32xf32>, vector<32x128xf32>, vector<8x128xf32> -> vector<8x128xf32>
    %353 = arith.addf %351, %352 : vector<8x128xf32>
    %354 = arith.index_cast %349 : i32 to index
    %c128_89 = arith.constant 128 : index
    %355 = vector.load %arg10[%354, %c128_89] : memref<64x256xf32, #tpu.memory_space<vmem>>, vector<8x128xf32>
    %cst_90 = arith.constant dense<0.000000e+00> : vector<8x128xf32>
    %356 = tpu.matmul %340, %8, %cst_90 {dimension_numbers = #tpu.dot_dimension_numbers<[1], [0], [0], [1], [0, 0, 1, 1], [], []>} : vector<8x32xf32>, vector<32x128xf32>, vector<8x128xf32> -> vector<8x128xf32>
    %357 = arith.addf %355, %356 : vector<8x128xf32>
    %358 = vector.extract_strided_slice %353 {offsets = [0, 0], sizes = [8, 32], strides = [1, 1]} : vector<8x128xf32> to vector<8x32xf32>
    %359 = arith.negf %358 : vector<8x32xf32>
    %360 = math.exp %359 : vector<8x32xf32>
    %cst_91 = arith.constant 1.000000e+00 : f32
    %361 = vector.broadcast %cst_91 : f32 to vector<8x32xf32>
    %362 = arith.addf %361, %360 : vector<8x32xf32>
    %363 = arith.divf %361, %362 : vector<8x32xf32>
    %364 = vector.extract_strided_slice %353 {offsets = [0, 32], sizes = [8, 32], strides = [1, 1]} : vector<8x128xf32> to vector<8x32xf32>
    %365 = arith.negf %364 : vector<8x32xf32>
    %366 = math.exp %365 : vector<8x32xf32>
    %cst_92 = arith.constant 1.000000e+00 : f32
    %367 = vector.broadcast %cst_92 : f32 to vector<8x32xf32>
    %368 = arith.addf %367, %366 : vector<8x32xf32>
    %369 = arith.divf %367, %368 : vector<8x32xf32>
    %370 = vector.extract_strided_slice %353 {offsets = [0, 64], sizes = [8, 32], strides = [1, 1]} : vector<8x128xf32> to vector<8x32xf32>
    %371 = math.tanh %370 : vector<8x32xf32>
    %372 = vector.extract_strided_slice %353 {offsets = [0, 96], sizes = [8, 32], strides = [1, 1]} : vector<8x128xf32> to vector<8x32xf32>
    %373 = arith.negf %372 : vector<8x32xf32>
    %374 = math.exp %373 : vector<8x32xf32>
    %cst_93 = arith.constant 1.000000e+00 : f32
    %375 = vector.broadcast %cst_93 : f32 to vector<8x32xf32>
    %376 = arith.addf %375, %374 : vector<8x32xf32>
    %377 = arith.divf %375, %376 : vector<8x32xf32>
    %378 = arith.mulf %369, %313 : vector<8x32xf32>
    %379 = arith.mulf %363, %371 : vector<8x32xf32>
    %380 = arith.addf %378, %379 : vector<8x32xf32>
    %381 = math.tanh %380 : vector<8x32xf32>
    %382 = arith.mulf %377, %381 : vector<8x32xf32>
    %383 = vector.extract_strided_slice %357 {offsets = [0, 0], sizes = [8, 32], strides = [1, 1]} : vector<8x128xf32> to vector<8x32xf32>
    %384 = arith.negf %383 : vector<8x32xf32>
    %385 = math.exp %384 : vector<8x32xf32>
    %cst_94 = arith.constant 1.000000e+00 : f32
    %386 = vector.broadcast %cst_94 : f32 to vector<8x32xf32>
    %387 = arith.addf %386, %385 : vector<8x32xf32>
    %388 = arith.divf %386, %387 : vector<8x32xf32>
    %389 = vector.extract_strided_slice %357 {offsets = [0, 32], sizes = [8, 32], strides = [1, 1]} : vector<8x128xf32> to vector<8x32xf32>
    %390 = arith.negf %389 : vector<8x32xf32>
    %391 = math.exp %390 : vector<8x32xf32>
    %cst_95 = arith.constant 1.000000e+00 : f32
    %392 = vector.broadcast %cst_95 : f32 to vector<8x32xf32>
    %393 = arith.addf %392, %391 : vector<8x32xf32>
    %394 = arith.divf %392, %393 : vector<8x32xf32>
    %395 = vector.extract_strided_slice %357 {offsets = [0, 64], sizes = [8, 32], strides = [1, 1]} : vector<8x128xf32> to vector<8x32xf32>
    %396 = math.tanh %395 : vector<8x32xf32>
    %397 = vector.extract_strided_slice %357 {offsets = [0, 96], sizes = [8, 32], strides = [1, 1]} : vector<8x128xf32> to vector<8x32xf32>
    %398 = arith.negf %397 : vector<8x32xf32>
    %399 = math.exp %398 : vector<8x32xf32>
    %cst_96 = arith.constant 1.000000e+00 : f32
    %400 = vector.broadcast %cst_96 : f32 to vector<8x32xf32>
    %401 = arith.addf %400, %399 : vector<8x32xf32>
    %402 = arith.divf %400, %401 : vector<8x32xf32>
    %403 = arith.mulf %394, %338 : vector<8x32xf32>
    %404 = arith.mulf %388, %396 : vector<8x32xf32>
    %405 = arith.addf %403, %404 : vector<8x32xf32>
    %406 = math.tanh %405 : vector<8x32xf32>
    %407 = arith.mulf %402, %406 : vector<8x32xf32>
    %408 = arith.index_cast %347 : i32 to index
    %c0_97 = arith.constant 0 : index
    %409 = vector.load %arg12[%408, %c0_97] : memref<64x32xf32, #tpu.memory_space<vmem>>, vector<8x32xf32>
    tpu.vector_store %arg12[%408, %c0_97], %382 {strides = array<i32>} : memref<64x32xf32, #tpu.memory_space<vmem>>, vector<8x32xf32>,
    %410 = arith.index_cast %349 : i32 to index
    %c0_98 = arith.constant 0 : index
    %411 = vector.load %arg13[%410, %c0_98] : memref<64x32xf32, #tpu.memory_space<vmem>>, vector<8x32xf32>
    tpu.vector_store %arg13[%410, %c0_98], %407 {strides = array<i32>} : memref<64x32xf32, #tpu.memory_space<vmem>>, vector<8x32xf32>,
    %c6_i32 = arith.constant 6 : i32
    %c7_i32_99 = arith.constant 7 : i32
    %412 = arith.subi %c7_i32_99, %c6_i32 : i32
    %c8_i32_100 = arith.constant 8 : i32
    %413 = arith.muli %c6_i32, %c8_i32_100 : i32
    %414 = tpu.assume_multiple %413, 8 : i32
    %c8_i32_101 = arith.constant 8 : i32
    %415 = arith.muli %412, %c8_i32_101 : i32
    %416 = tpu.assume_multiple %415, 8 : i32
    %417 = arith.index_cast %414 : i32 to index
    %c0_102 = arith.constant 0 : index
    %418 = vector.load %arg10[%417, %c0_102] : memref<64x256xf32, #tpu.memory_space<vmem>>, vector<8x128xf32>
    %cst_103 = arith.constant dense<0.000000e+00> : vector<8x128xf32>
    %419 = tpu.matmul %382, %7, %cst_103 {dimension_numbers = #tpu.dot_dimension_numbers<[1], [0], [0], [1], [0, 0, 1, 1], [], []>} : vector<8x32xf32>, vector<32x128xf32>, vector<8x128xf32> -> vector<8x128xf32>
    %420 = arith.addf %418, %419 : vector<8x128xf32>
    %421 = arith.index_cast %416 : i32 to index
    %c128_104 = arith.constant 128 : index
    %422 = vector.load %arg10[%421, %c128_104] : memref<64x256xf32, #tpu.memory_space<vmem>>, vector<8x128xf32>
    %cst_105 = arith.constant dense<0.000000e+00> : vector<8x128xf32>
    %423 = tpu.matmul %407, %8, %cst_105 {dimension_numbers = #tpu.dot_dimension_numbers<[1], [0], [0], [1], [0, 0, 1, 1], [], []>} : vector<8x32xf32>, vector<32x128xf32>, vector<8x128xf32> -> vector<8x128xf32>
    %424 = arith.addf %422, %423 : vector<8x128xf32>
    %425 = vector.extract_strided_slice %420 {offsets = [0, 0], sizes = [8, 32], strides = [1, 1]} : vector<8x128xf32> to vector<8x32xf32>
    %426 = arith.negf %425 : vector<8x32xf32>
    %427 = math.exp %426 : vector<8x32xf32>
    %cst_106 = arith.constant 1.000000e+00 : f32
    %428 = vector.broadcast %cst_106 : f32 to vector<8x32xf32>
    %429 = arith.addf %428, %427 : vector<8x32xf32>
    %430 = arith.divf %428, %429 : vector<8x32xf32>
    %431 = vector.extract_strided_slice %420 {offsets = [0, 32], sizes = [8, 32], strides = [1, 1]} : vector<8x128xf32> to vector<8x32xf32>
    %432 = arith.negf %431 : vector<8x32xf32>
    %433 = math.exp %432 : vector<8x32xf32>
    %cst_107 = arith.constant 1.000000e+00 : f32
    %434 = vector.broadcast %cst_107 : f32 to vector<8x32xf32>
    %435 = arith.addf %434, %433 : vector<8x32xf32>
    %436 = arith.divf %434, %435 : vector<8x32xf32>
    %437 = vector.extract_strided_slice %420 {offsets = [0, 64], sizes = [8, 32], strides = [1, 1]} : vector<8x128xf32> to vector<8x32xf32>
    %438 = math.tanh %437 : vector<8x32xf32>
    %439 = vector.extract_strided_slice %420 {offsets = [0, 96], sizes = [8, 32], strides = [1, 1]} : vector<8x128xf32> to vector<8x32xf32>
    %440 = arith.negf %439 : vector<8x32xf32>
    %441 = math.exp %440 : vector<8x32xf32>
    %cst_108 = arith.constant 1.000000e+00 : f32
    %442 = vector.broadcast %cst_108 : f32 to vector<8x32xf32>
    %443 = arith.addf %442, %441 : vector<8x32xf32>
    %444 = arith.divf %442, %443 : vector<8x32xf32>
    %445 = arith.mulf %436, %380 : vector<8x32xf32>
    %446 = arith.mulf %430, %438 : vector<8x32xf32>
    %447 = arith.addf %445, %446 : vector<8x32xf32>
    %448 = math.tanh %447 : vector<8x32xf32>
    %449 = arith.mulf %444, %448 : vector<8x32xf32>
    %450 = vector.extract_strided_slice %424 {offsets = [0, 0], sizes = [8, 32], strides = [1, 1]} : vector<8x128xf32> to vector<8x32xf32>
    %451 = arith.negf %450 : vector<8x32xf32>
    %452 = math.exp %451 : vector<8x32xf32>
    %cst_109 = arith.constant 1.000000e+00 : f32
    %453 = vector.broadcast %cst_109 : f32 to vector<8x32xf32>
    %454 = arith.addf %453, %452 : vector<8x32xf32>
    %455 = arith.divf %453, %454 : vector<8x32xf32>
    %456 = vector.extract_strided_slice %424 {offsets = [0, 32], sizes = [8, 32], strides = [1, 1]} : vector<8x128xf32> to vector<8x32xf32>
    %457 = arith.negf %456 : vector<8x32xf32>
    %458 = math.exp %457 : vector<8x32xf32>
    %cst_110 = arith.constant 1.000000e+00 : f32
    %459 = vector.broadcast %cst_110 : f32 to vector<8x32xf32>
    %460 = arith.addf %459, %458 : vector<8x32xf32>
    %461 = arith.divf %459, %460 : vector<8x32xf32>
    %462 = vector.extract_strided_slice %424 {offsets = [0, 64], sizes = [8, 32], strides = [1, 1]} : vector<8x128xf32> to vector<8x32xf32>
    %463 = math.tanh %462 : vector<8x32xf32>
    %464 = vector.extract_strided_slice %424 {offsets = [0, 96], sizes = [8, 32], strides = [1, 1]} : vector<8x128xf32> to vector<8x32xf32>
    %465 = arith.negf %464 : vector<8x32xf32>
    %466 = math.exp %465 : vector<8x32xf32>
    %cst_111 = arith.constant 1.000000e+00 : f32
    %467 = vector.broadcast %cst_111 : f32 to vector<8x32xf32>
    %468 = arith.addf %467, %466 : vector<8x32xf32>
    %469 = arith.divf %467, %468 : vector<8x32xf32>
    %470 = arith.mulf %461, %405 : vector<8x32xf32>
    %471 = arith.mulf %455, %463 : vector<8x32xf32>
    %472 = arith.addf %470, %471 : vector<8x32xf32>
    %473 = math.tanh %472 : vector<8x32xf32>
    %474 = arith.mulf %469, %473 : vector<8x32xf32>
    %475 = arith.index_cast %414 : i32 to index
    %c0_112 = arith.constant 0 : index
    %476 = vector.load %arg12[%475, %c0_112] : memref<64x32xf32, #tpu.memory_space<vmem>>, vector<8x32xf32>
    tpu.vector_store %arg12[%475, %c0_112], %449 {strides = array<i32>} : memref<64x32xf32, #tpu.memory_space<vmem>>, vector<8x32xf32>,
    %477 = arith.index_cast %416 : i32 to index
    %c0_113 = arith.constant 0 : index
    %478 = vector.load %arg13[%477, %c0_113] : memref<64x32xf32, #tpu.memory_space<vmem>>, vector<8x32xf32>
    tpu.vector_store %arg13[%477, %c0_113], %474 {strides = array<i32>} : memref<64x32xf32, #tpu.memory_space<vmem>>, vector<8x32xf32>,
    %c7_i32_114 = arith.constant 7 : i32
    %c7_i32_115 = arith.constant 7 : i32
    %479 = arith.subi %c7_i32_115, %c7_i32_114 : i32
    %c8_i32_116 = arith.constant 8 : i32
    %480 = arith.muli %c7_i32_114, %c8_i32_116 : i32
    %481 = tpu.assume_multiple %480, 8 : i32
    %c8_i32_117 = arith.constant 8 : i32
    %482 = arith.muli %479, %c8_i32_117 : i32
    %483 = tpu.assume_multiple %482, 8 : i32
    %484 = arith.index_cast %481 : i32 to index
    %c0_118 = arith.constant 0 : index
    %485 = vector.load %arg10[%484, %c0_118] : memref<64x256xf32, #tpu.memory_space<vmem>>, vector<8x128xf32>
    %cst_119 = arith.constant dense<0.000000e+00> : vector<8x128xf32>
    %486 = tpu.matmul %449, %7, %cst_119 {dimension_numbers = #tpu.dot_dimension_numbers<[1], [0], [0], [1], [0, 0, 1, 1], [], []>} : vector<8x32xf32>, vector<32x128xf32>, vector<8x128xf32> -> vector<8x128xf32>
    %487 = arith.addf %485, %486 : vector<8x128xf32>
    %488 = arith.index_cast %483 : i32 to index
    %c128_120 = arith.constant 128 : index
    %489 = vector.load %arg10[%488, %c128_120] : memref<64x256xf32, #tpu.memory_space<vmem>>, vector<8x128xf32>
    %cst_121 = arith.constant dense<0.000000e+00> : vector<8x128xf32>
    %490 = tpu.matmul %474, %8, %cst_121 {dimension_numbers = #tpu.dot_dimension_numbers<[1], [0], [0], [1], [0, 0, 1, 1], [], []>} : vector<8x32xf32>, vector<32x128xf32>, vector<8x128xf32> -> vector<8x128xf32>
    %491 = arith.addf %489, %490 : vector<8x128xf32>
    %492 = vector.extract_strided_slice %487 {offsets = [0, 0], sizes = [8, 32], strides = [1, 1]} : vector<8x128xf32> to vector<8x32xf32>
    %493 = arith.negf %492 : vector<8x32xf32>
    %494 = math.exp %493 : vector<8x32xf32>
    %cst_122 = arith.constant 1.000000e+00 : f32
    %495 = vector.broadcast %cst_122 : f32 to vector<8x32xf32>
    %496 = arith.addf %495, %494 : vector<8x32xf32>
    %497 = arith.divf %495, %496 : vector<8x32xf32>
    %498 = vector.extract_strided_slice %487 {offsets = [0, 32], sizes = [8, 32], strides = [1, 1]} : vector<8x128xf32> to vector<8x32xf32>
    %499 = arith.negf %498 : vector<8x32xf32>
    %500 = math.exp %499 : vector<8x32xf32>
    %cst_123 = arith.constant 1.000000e+00 : f32
    %501 = vector.broadcast %cst_123 : f32 to vector<8x32xf32>
    %502 = arith.addf %501, %500 : vector<8x32xf32>
    %503 = arith.divf %501, %502 : vector<8x32xf32>
    %504 = vector.extract_strided_slice %487 {offsets = [0, 64], sizes = [8, 32], strides = [1, 1]} : vector<8x128xf32> to vector<8x32xf32>
    %505 = math.tanh %504 : vector<8x32xf32>
    %506 = vector.extract_strided_slice %487 {offsets = [0, 96], sizes = [8, 32], strides = [1, 1]} : vector<8x128xf32> to vector<8x32xf32>
    %507 = arith.negf %506 : vector<8x32xf32>
    %508 = math.exp %507 : vector<8x32xf32>
    %cst_124 = arith.constant 1.000000e+00 : f32
    %509 = vector.broadcast %cst_124 : f32 to vector<8x32xf32>
    %510 = arith.addf %509, %508 : vector<8x32xf32>
    %511 = arith.divf %509, %510 : vector<8x32xf32>
    %512 = arith.mulf %503, %447 : vector<8x32xf32>
    %513 = arith.mulf %497, %505 : vector<8x32xf32>
    %514 = arith.addf %512, %513 : vector<8x32xf32>
    %515 = math.tanh %514 : vector<8x32xf32>
    %516 = arith.mulf %511, %515 : vector<8x32xf32>
    %517 = vector.extract_strided_slice %491 {offsets = [0, 0], sizes = [8, 32], strides = [1, 1]} : vector<8x128xf32> to vector<8x32xf32>
    %518 = arith.negf %517 : vector<8x32xf32>
    %519 = math.exp %518 : vector<8x32xf32>
    %cst_125 = arith.constant 1.000000e+00 : f32
    %520 = vector.broadcast %cst_125 : f32 to vector<8x32xf32>
    %521 = arith.addf %520, %519 : vector<8x32xf32>
    %522 = arith.divf %520, %521 : vector<8x32xf32>
    %523 = vector.extract_strided_slice %491 {offsets = [0, 32], sizes = [8, 32], strides = [1, 1]} : vector<8x128xf32> to vector<8x32xf32>
    %524 = arith.negf %523 : vector<8x32xf32>
    %525 = math.exp %524 : vector<8x32xf32>
    %cst_126 = arith.constant 1.000000e+00 : f32
    %526 = vector.broadcast %cst_126 : f32 to vector<8x32xf32>
    %527 = arith.addf %526, %525 : vector<8x32xf32>
    %528 = arith.divf %526, %527 : vector<8x32xf32>
    %529 = vector.extract_strided_slice %491 {offsets = [0, 64], sizes = [8, 32], strides = [1, 1]} : vector<8x128xf32> to vector<8x32xf32>
    %530 = math.tanh %529 : vector<8x32xf32>
    %531 = vector.extract_strided_slice %491 {offsets = [0, 96], sizes = [8, 32], strides = [1, 1]} : vector<8x128xf32> to vector<8x32xf32>
    %532 = arith.negf %531 : vector<8x32xf32>
    %533 = math.exp %532 : vector<8x32xf32>
    %cst_127 = arith.constant 1.000000e+00 : f32
    %534 = vector.broadcast %cst_127 : f32 to vector<8x32xf32>
    %535 = arith.addf %534, %533 : vector<8x32xf32>
    %536 = arith.divf %534, %535 : vector<8x32xf32>
    %537 = arith.mulf %528, %472 : vector<8x32xf32>
    %538 = arith.mulf %522, %530 : vector<8x32xf32>
    %539 = arith.addf %537, %538 : vector<8x32xf32>
    %540 = math.tanh %539 : vector<8x32xf32>
    %541 = arith.mulf %536, %540 : vector<8x32xf32>
    %542 = arith.index_cast %481 : i32 to index
    %c0_128 = arith.constant 0 : index
    %543 = vector.load %arg12[%542, %c0_128] : memref<64x32xf32, #tpu.memory_space<vmem>>, vector<8x32xf32>
    tpu.vector_store %arg12[%542, %c0_128], %516 {strides = array<i32>} : memref<64x32xf32, #tpu.memory_space<vmem>>, vector<8x32xf32>,
    %544 = arith.index_cast %483 : i32 to index
    %c0_129 = arith.constant 0 : index
    %545 = vector.load %arg13[%544, %c0_129] : memref<64x32xf32, #tpu.memory_space<vmem>>, vector<8x32xf32>
    tpu.vector_store %arg13[%544, %c0_129], %541 {strides = array<i32>} : memref<64x32xf32, #tpu.memory_space<vmem>>, vector<8x32xf32>,
    %c8_i32_130 = arith.constant 8 : i32
    %c0_131 = arith.constant 0 : index
    %c0_132 = arith.constant 0 : index
    %546 = vector.load %arg12[%c0_131, %c0_132] : memref<64x32xf32, #tpu.memory_space<vmem>>, vector<64x32xf32>
    %c0_133 = arith.constant 0 : index
    %c0_134 = arith.constant 0 : index
    %547 = vector.load %arg11[%c0_133, %c0_134] : memref<64x64xf32, #tpu.memory_space<vmem>>, vector<64x32xf32>
    tpu.vector_store %arg11[%c0_133, %c0_134], %546 {strides = array<i32>} : memref<64x64xf32, #tpu.memory_space<vmem>>, vector<64x32xf32>,
    %c0_135 = arith.constant 0 : index
    %c0_136 = arith.constant 0 : index
    %548 = vector.load %arg13[%c0_135, %c0_136] : memref<64x32xf32, #tpu.memory_space<vmem>>, vector<64x32xf32>
    %c0_137 = arith.constant 0 : index
    %c32 = arith.constant 32 : index
    %549 = vector.load %arg11[%c0_137, %c32] : memref<64x64xf32, #tpu.memory_space<vmem>>, vector<64x32xf32>
    tpu.vector_store %arg11[%c0_137, %c32], %548 {strides = array<i32>} : memref<64x64xf32, #tpu.memory_space<vmem>>, vector<64x32xf32>,
    %c0_138 = arith.constant 0 : index
    %c0_139 = arith.constant 0 : index
    %550 = vector.load %arg11[%c0_138, %c0_139] : memref<64x64xf32, #tpu.memory_space<vmem>>, vector<64x64xf32>
    %c0_140 = arith.constant 0 : index
    %c0_141 = arith.constant 0 : index
    %551 = vector.load %arg5[%c0_140, %c0_141] : memref<64x256xf32, #tpu.memory_space<vmem>>, vector<64x256xf32>
    %cst_142 = arith.constant dense<0.000000e+00> : vector<64x256xf32>
    %552 = tpu.matmul %550, %551, %cst_142 {dimension_numbers = #tpu.dot_dimension_numbers<[1], [0], [0], [1], [0, 0, 1, 1], [], []>} : vector<64x64xf32>, vector<64x256xf32>, vector<64x256xf32> -> vector<64x256xf32>
    %c0_143 = arith.constant 0 : index
    %c0_144 = arith.constant 0 : index
    %553 = vector.load %arg8[%c0_143, %c0_144] : memref<1x256xf32, #tpu.memory_space<vmem>>, vector<1x256xf32>
    %554 = vector.broadcast %553 : vector<1x256xf32> to vector<64x256xf32>
    %555 = arith.addf %552, %554 : vector<64x256xf32>
    %c0_145 = arith.constant 0 : index
    %c0_146 = arith.constant 0 : index
    %556 = vector.load %arg10[%c0_145, %c0_146] : memref<64x256xf32, #tpu.memory_space<vmem>>, vector<64x256xf32>
    tpu.vector_store %arg10[%c0_145, %c0_146], %555 {strides = array<i32>} : memref<64x256xf32, #tpu.memory_space<vmem>>, vector<64x256xf32>,
    %c0_147 = arith.constant 0 : index
    %c0_148 = arith.constant 0 : index
    %557 = vector.load %arg6[%c0_147, %c0_148] : memref<32x128xf32, #tpu.memory_space<vmem>>, vector<32x128xf32>
    %c0_149 = arith.constant 0 : index
    %c0_150 = arith.constant 0 : index
    %558 = vector.load %arg7[%c0_149, %c0_150] : memref<32x128xf32, #tpu.memory_space<vmem>>, vector<32x128xf32>
    %cst_151 = arith.constant 0.000000e+00 : f32
    %559 = vector.broadcast %cst_151 : f32 to vector<8x32xf32>
    %c0_i32_152 = arith.constant 0 : i32
    %c7_i32_153 = arith.constant 7 : i32
    %560 = arith.subi %c7_i32_153, %c0_i32_152 : i32
    %c8_i32_154 = arith.constant 8 : i32
    %561 = arith.muli %c0_i32_152, %c8_i32_154 : i32
    %562 = tpu.assume_multiple %561, 8 : i32
    %c8_i32_155 = arith.constant 8 : i32
    %563 = arith.muli %560, %c8_i32_155 : i32
    %564 = tpu.assume_multiple %563, 8 : i32
    %565 = arith.index_cast %562 : i32 to index
    %c0_156 = arith.constant 0 : index
    %566 = vector.load %arg10[%565, %c0_156] : memref<64x256xf32, #tpu.memory_space<vmem>>, vector<8x128xf32>
    %cst_157 = arith.constant dense<0.000000e+00> : vector<8x128xf32>
    %567 = tpu.matmul %559, %557, %cst_157 {dimension_numbers = #tpu.dot_dimension_numbers<[1], [0], [0], [1], [0, 0, 1, 1], [], []>} : vector<8x32xf32>, vector<32x128xf32>, vector<8x128xf32> -> vector<8x128xf32>
    %568 = arith.addf %566, %567 : vector<8x128xf32>
    %569 = arith.index_cast %564 : i32 to index
    %c128_158 = arith.constant 128 : index
    %570 = vector.load %arg10[%569, %c128_158] : memref<64x256xf32, #tpu.memory_space<vmem>>, vector<8x128xf32>
    %cst_159 = arith.constant dense<0.000000e+00> : vector<8x128xf32>
    %571 = tpu.matmul %559, %558, %cst_159 {dimension_numbers = #tpu.dot_dimension_numbers<[1], [0], [0], [1], [0, 0, 1, 1], [], []>} : vector<8x32xf32>, vector<32x128xf32>, vector<8x128xf32> -> vector<8x128xf32>
    %572 = arith.addf %570, %571 : vector<8x128xf32>
    %573 = vector.extract_strided_slice %568 {offsets = [0, 0], sizes = [8, 32], strides = [1, 1]} : vector<8x128xf32> to vector<8x32xf32>
    %574 = arith.negf %573 : vector<8x32xf32>
    %575 = math.exp %574 : vector<8x32xf32>
    %cst_160 = arith.constant 1.000000e+00 : f32
    %576 = vector.broadcast %cst_160 : f32 to vector<8x32xf32>
    %577 = arith.addf %576, %575 : vector<8x32xf32>
    %578 = arith.divf %576, %577 : vector<8x32xf32>
    %579 = vector.extract_strided_slice %568 {offsets = [0, 32], sizes = [8, 32], strides = [1, 1]} : vector<8x128xf32> to vector<8x32xf32>
    %580 = arith.negf %579 : vector<8x32xf32>
    %581 = math.exp %580 : vector<8x32xf32>
    %cst_161 = arith.constant 1.000000e+00 : f32
    %582 = vector.broadcast %cst_161 : f32 to vector<8x32xf32>
    %583 = arith.addf %582, %581 : vector<8x32xf32>
    %584 = arith.divf %582, %583 : vector<8x32xf32>
    %585 = vector.extract_strided_slice %568 {offsets = [0, 64], sizes = [8, 32], strides = [1, 1]} : vector<8x128xf32> to vector<8x32xf32>
    %586 = math.tanh %585 : vector<8x32xf32>
    %587 = vector.extract_strided_slice %568 {offsets = [0, 96], sizes = [8, 32], strides = [1, 1]} : vector<8x128xf32> to vector<8x32xf32>
    %588 = arith.negf %587 : vector<8x32xf32>
    %589 = math.exp %588 : vector<8x32xf32>
    %cst_162 = arith.constant 1.000000e+00 : f32
    %590 = vector.broadcast %cst_162 : f32 to vector<8x32xf32>
    %591 = arith.addf %590, %589 : vector<8x32xf32>
    %592 = arith.divf %590, %591 : vector<8x32xf32>
    %593 = arith.mulf %584, %559 : vector<8x32xf32>
    %594 = arith.mulf %578, %586 : vector<8x32xf32>
    %595 = arith.addf %593, %594 : vector<8x32xf32>
    %596 = math.tanh %595 : vector<8x32xf32>
    %597 = arith.mulf %592, %596 : vector<8x32xf32>
    %598 = vector.extract_strided_slice %572 {offsets = [0, 0], sizes = [8, 32], strides = [1, 1]} : vector<8x128xf32> to vector<8x32xf32>
    %599 = arith.negf %598 : vector<8x32xf32>
    %600 = math.exp %599 : vector<8x32xf32>
    %cst_163 = arith.constant 1.000000e+00 : f32
    %601 = vector.broadcast %cst_163 : f32 to vector<8x32xf32>
    %602 = arith.addf %601, %600 : vector<8x32xf32>
    %603 = arith.divf %601, %602 : vector<8x32xf32>
    %604 = vector.extract_strided_slice %572 {offsets = [0, 32], sizes = [8, 32], strides = [1, 1]} : vector<8x128xf32> to vector<8x32xf32>
    %605 = arith.negf %604 : vector<8x32xf32>
    %606 = math.exp %605 : vector<8x32xf32>
    %cst_164 = arith.constant 1.000000e+00 : f32
    %607 = vector.broadcast %cst_164 : f32 to vector<8x32xf32>
    %608 = arith.addf %607, %606 : vector<8x32xf32>
    %609 = arith.divf %607, %608 : vector<8x32xf32>
    %610 = vector.extract_strided_slice %572 {offsets = [0, 64], sizes = [8, 32], strides = [1, 1]} : vector<8x128xf32> to vector<8x32xf32>
    %611 = math.tanh %610 : vector<8x32xf32>
    %612 = vector.extract_strided_slice %572 {offsets = [0, 96], sizes = [8, 32], strides = [1, 1]} : vector<8x128xf32> to vector<8x32xf32>
    %613 = arith.negf %612 : vector<8x32xf32>
    %614 = math.exp %613 : vector<8x32xf32>
    %cst_165 = arith.constant 1.000000e+00 : f32
    %615 = vector.broadcast %cst_165 : f32 to vector<8x32xf32>
    %616 = arith.addf %615, %614 : vector<8x32xf32>
    %617 = arith.divf %615, %616 : vector<8x32xf32>
    %618 = arith.mulf %609, %559 : vector<8x32xf32>
    %619 = arith.mulf %603, %611 : vector<8x32xf32>
    %620 = arith.addf %618, %619 : vector<8x32xf32>
    %621 = math.tanh %620 : vector<8x32xf32>
    %622 = arith.mulf %617, %621 : vector<8x32xf32>
    %623 = arith.index_cast %562 : i32 to index
    %c0_166 = arith.constant 0 : index
    %624 = vector.load %arg12[%623, %c0_166] : memref<64x32xf32, #tpu.memory_space<vmem>>, vector<8x32xf32>
    tpu.vector_store %arg12[%623, %c0_166], %597 {strides = array<i32>} : memref<64x32xf32, #tpu.memory_space<vmem>>, vector<8x32xf32>,
    %625 = arith.index_cast %564 : i32 to index
    %c0_167 = arith.constant 0 : index
    %626 = vector.load %arg13[%625, %c0_167] : memref<64x32xf32, #tpu.memory_space<vmem>>, vector<8x32xf32>
    tpu.vector_store %arg13[%625, %c0_167], %622 {strides = array<i32>} : memref<64x32xf32, #tpu.memory_space<vmem>>, vector<8x32xf32>,
    %c1_i32_168 = arith.constant 1 : i32
    %c7_i32_169 = arith.constant 7 : i32
    %627 = arith.subi %c7_i32_169, %c1_i32_168 : i32
    %c8_i32_170 = arith.constant 8 : i32
    %628 = arith.muli %c1_i32_168, %c8_i32_170 : i32
    %629 = tpu.assume_multiple %628, 8 : i32
    %c8_i32_171 = arith.constant 8 : i32
    %630 = arith.muli %627, %c8_i32_171 : i32
    %631 = tpu.assume_multiple %630, 8 : i32
    %632 = arith.index_cast %629 : i32 to index
    %c0_172 = arith.constant 0 : index
    %633 = vector.load %arg10[%632, %c0_172] : memref<64x256xf32, #tpu.memory_space<vmem>>, vector<8x128xf32>
    %cst_173 = arith.constant dense<0.000000e+00> : vector<8x128xf32>
    %634 = tpu.matmul %597, %557, %cst_173 {dimension_numbers = #tpu.dot_dimension_numbers<[1], [0], [0], [1], [0, 0, 1, 1], [], []>} : vector<8x32xf32>, vector<32x128xf32>, vector<8x128xf32> -> vector<8x128xf32>
    %635 = arith.addf %633, %634 : vector<8x128xf32>
    %636 = arith.index_cast %631 : i32 to index
    %c128_174 = arith.constant 128 : index
    %637 = vector.load %arg10[%636, %c128_174] : memref<64x256xf32, #tpu.memory_space<vmem>>, vector<8x128xf32>
    %cst_175 = arith.constant dense<0.000000e+00> : vector<8x128xf32>
    %638 = tpu.matmul %622, %558, %cst_175 {dimension_numbers = #tpu.dot_dimension_numbers<[1], [0], [0], [1], [0, 0, 1, 1], [], []>} : vector<8x32xf32>, vector<32x128xf32>, vector<8x128xf32> -> vector<8x128xf32>
    %639 = arith.addf %637, %638 : vector<8x128xf32>
    %640 = vector.extract_strided_slice %635 {offsets = [0, 0], sizes = [8, 32], strides = [1, 1]} : vector<8x128xf32> to vector<8x32xf32>
    %641 = arith.negf %640 : vector<8x32xf32>
    %642 = math.exp %641 : vector<8x32xf32>
    %cst_176 = arith.constant 1.000000e+00 : f32
    %643 = vector.broadcast %cst_176 : f32 to vector<8x32xf32>
    %644 = arith.addf %643, %642 : vector<8x32xf32>
    %645 = arith.divf %643, %644 : vector<8x32xf32>
    %646 = vector.extract_strided_slice %635 {offsets = [0, 32], sizes = [8, 32], strides = [1, 1]} : vector<8x128xf32> to vector<8x32xf32>
    %647 = arith.negf %646 : vector<8x32xf32>
    %648 = math.exp %647 : vector<8x32xf32>
    %cst_177 = arith.constant 1.000000e+00 : f32
    %649 = vector.broadcast %cst_177 : f32 to vector<8x32xf32>
    %650 = arith.addf %649, %648 : vector<8x32xf32>
    %651 = arith.divf %649, %650 : vector<8x32xf32>
    %652 = vector.extract_strided_slice %635 {offsets = [0, 64], sizes = [8, 32], strides = [1, 1]} : vector<8x128xf32> to vector<8x32xf32>
    %653 = math.tanh %652 : vector<8x32xf32>
    %654 = vector.extract_strided_slice %635 {offsets = [0, 96], sizes = [8, 32], strides = [1, 1]} : vector<8x128xf32> to vector<8x32xf32>
    %655 = arith.negf %654 : vector<8x32xf32>
    %656 = math.exp %655 : vector<8x32xf32>
    %cst_178 = arith.constant 1.000000e+00 : f32
    %657 = vector.broadcast %cst_178 : f32 to vector<8x32xf32>
    %658 = arith.addf %657, %656 : vector<8x32xf32>
    %659 = arith.divf %657, %658 : vector<8x32xf32>
    %660 = arith.mulf %651, %595 : vector<8x32xf32>
    %661 = arith.mulf %645, %653 : vector<8x32xf32>
    %662 = arith.addf %660, %661 : vector<8x32xf32>
    %663 = math.tanh %662 : vector<8x32xf32>
    %664 = arith.mulf %659, %663 : vector<8x32xf32>
    %665 = vector.extract_strided_slice %639 {offsets = [0, 0], sizes = [8, 32], strides = [1, 1]} : vector<8x128xf32> to vector<8x32xf32>
    %666 = arith.negf %665 : vector<8x32xf32>
    %667 = math.exp %666 : vector<8x32xf32>
    %cst_179 = arith.constant 1.000000e+00 : f32
    %668 = vector.broadcast %cst_179 : f32 to vector<8x32xf32>
    %669 = arith.addf %668, %667 : vector<8x32xf32>
    %670 = arith.divf %668, %669 : vector<8x32xf32>
    %671 = vector.extract_strided_slice %639 {offsets = [0, 32], sizes = [8, 32], strides = [1, 1]} : vector<8x128xf32> to vector<8x32xf32>
    %672 = arith.negf %671 : vector<8x32xf32>
    %673 = math.exp %672 : vector<8x32xf32>
    %cst_180 = arith.constant 1.000000e+00 : f32
    %674 = vector.broadcast %cst_180 : f32 to vector<8x32xf32>
    %675 = arith.addf %674, %673 : vector<8x32xf32>
    %676 = arith.divf %674, %675 : vector<8x32xf32>
    %677 = vector.extract_strided_slice %639 {offsets = [0, 64], sizes = [8, 32], strides = [1, 1]} : vector<8x128xf32> to vector<8x32xf32>
    %678 = math.tanh %677 : vector<8x32xf32>
    %679 = vector.extract_strided_slice %639 {offsets = [0, 96], sizes = [8, 32], strides = [1, 1]} : vector<8x128xf32> to vector<8x32xf32>
    %680 = arith.negf %679 : vector<8x32xf32>
    %681 = math.exp %680 : vector<8x32xf32>
    %cst_181 = arith.constant 1.000000e+00 : f32
    %682 = vector.broadcast %cst_181 : f32 to vector<8x32xf32>
    %683 = arith.addf %682, %681 : vector<8x32xf32>
    %684 = arith.divf %682, %683 : vector<8x32xf32>
    %685 = arith.mulf %676, %620 : vector<8x32xf32>
    %686 = arith.mulf %670, %678 : vector<8x32xf32>
    %687 = arith.addf %685, %686 : vector<8x32xf32>
    %688 = math.tanh %687 : vector<8x32xf32>
    %689 = arith.mulf %684, %688 : vector<8x32xf32>
    %690 = arith.index_cast %629 : i32 to index
    %c0_182 = arith.constant 0 : index
    %691 = vector.load %arg12[%690, %c0_182] : memref<64x32xf32, #tpu.memory_space<vmem>>, vector<8x32xf32>
    tpu.vector_store %arg12[%690, %c0_182], %664 {strides = array<i32>} : memref<64x32xf32, #tpu.memory_space<vmem>>, vector<8x32xf32>,
    %692 = arith.index_cast %631 : i32 to index
    %c0_183 = arith.constant 0 : index
    %693 = vector.load %arg13[%692, %c0_183] : memref<64x32xf32, #tpu.memory_space<vmem>>, vector<8x32xf32>
    tpu.vector_store %arg13[%692, %c0_183], %689 {strides = array<i32>} : memref<64x32xf32, #tpu.memory_space<vmem>>, vector<8x32xf32>,
    %c2_i32_184 = arith.constant 2 : i32
    %c7_i32_185 = arith.constant 7 : i32
    %694 = arith.subi %c7_i32_185, %c2_i32_184 : i32
    %c8_i32_186 = arith.constant 8 : i32
    %695 = arith.muli %c2_i32_184, %c8_i32_186 : i32
    %696 = tpu.assume_multiple %695, 8 : i32
    %c8_i32_187 = arith.constant 8 : i32
    %697 = arith.muli %694, %c8_i32_187 : i32
    %698 = tpu.assume_multiple %697, 8 : i32
    %699 = arith.index_cast %696 : i32 to index
    %c0_188 = arith.constant 0 : index
    %700 = vector.load %arg10[%699, %c0_188] : memref<64x256xf32, #tpu.memory_space<vmem>>, vector<8x128xf32>
    %cst_189 = arith.constant dense<0.000000e+00> : vector<8x128xf32>
    %701 = tpu.matmul %664, %557, %cst_189 {dimension_numbers = #tpu.dot_dimension_numbers<[1], [0], [0], [1], [0, 0, 1, 1], [], []>} : vector<8x32xf32>, vector<32x128xf32>, vector<8x128xf32> -> vector<8x128xf32>
    %702 = arith.addf %700, %701 : vector<8x128xf32>
    %703 = arith.index_cast %698 : i32 to index
    %c128_190 = arith.constant 128 : index
    %704 = vector.load %arg10[%703, %c128_190] : memref<64x256xf32, #tpu.memory_space<vmem>>, vector<8x128xf32>
    %cst_191 = arith.constant dense<0.000000e+00> : vector<8x128xf32>
    %705 = tpu.matmul %689, %558, %cst_191 {dimension_numbers = #tpu.dot_dimension_numbers<[1], [0], [0], [1], [0, 0, 1, 1], [], []>} : vector<8x32xf32>, vector<32x128xf32>, vector<8x128xf32> -> vector<8x128xf32>
    %706 = arith.addf %704, %705 : vector<8x128xf32>
    %707 = vector.extract_strided_slice %702 {offsets = [0, 0], sizes = [8, 32], strides = [1, 1]} : vector<8x128xf32> to vector<8x32xf32>
    %708 = arith.negf %707 : vector<8x32xf32>
    %709 = math.exp %708 : vector<8x32xf32>
    %cst_192 = arith.constant 1.000000e+00 : f32
    %710 = vector.broadcast %cst_192 : f32 to vector<8x32xf32>
    %711 = arith.addf %710, %709 : vector<8x32xf32>
    %712 = arith.divf %710, %711 : vector<8x32xf32>
    %713 = vector.extract_strided_slice %702 {offsets = [0, 32], sizes = [8, 32], strides = [1, 1]} : vector<8x128xf32> to vector<8x32xf32>
    %714 = arith.negf %713 : vector<8x32xf32>
    %715 = math.exp %714 : vector<8x32xf32>
    %cst_193 = arith.constant 1.000000e+00 : f32
    %716 = vector.broadcast %cst_193 : f32 to vector<8x32xf32>
    %717 = arith.addf %716, %715 : vector<8x32xf32>
    %718 = arith.divf %716, %717 : vector<8x32xf32>
    %719 = vector.extract_strided_slice %702 {offsets = [0, 64], sizes = [8, 32], strides = [1, 1]} : vector<8x128xf32> to vector<8x32xf32>
    %720 = math.tanh %719 : vector<8x32xf32>
    %721 = vector.extract_strided_slice %702 {offsets = [0, 96], sizes = [8, 32], strides = [1, 1]} : vector<8x128xf32> to vector<8x32xf32>
    %722 = arith.negf %721 : vector<8x32xf32>
    %723 = math.exp %722 : vector<8x32xf32>
    %cst_194 = arith.constant 1.000000e+00 : f32
    %724 = vector.broadcast %cst_194 : f32 to vector<8x32xf32>
    %725 = arith.addf %724, %723 : vector<8x32xf32>
    %726 = arith.divf %724, %725 : vector<8x32xf32>
    %727 = arith.mulf %718, %662 : vector<8x32xf32>
    %728 = arith.mulf %712, %720 : vector<8x32xf32>
    %729 = arith.addf %727, %728 : vector<8x32xf32>
    %730 = math.tanh %729 : vector<8x32xf32>
    %731 = arith.mulf %726, %730 : vector<8x32xf32>
    %732 = vector.extract_strided_slice %706 {offsets = [0, 0], sizes = [8, 32], strides = [1, 1]} : vector<8x128xf32> to vector<8x32xf32>
    %733 = arith.negf %732 : vector<8x32xf32>
    %734 = math.exp %733 : vector<8x32xf32>
    %cst_195 = arith.constant 1.000000e+00 : f32
    %735 = vector.broadcast %cst_195 : f32 to vector<8x32xf32>
    %736 = arith.addf %735, %734 : vector<8x32xf32>
    %737 = arith.divf %735, %736 : vector<8x32xf32>
    %738 = vector.extract_strided_slice %706 {offsets = [0, 32], sizes = [8, 32], strides = [1, 1]} : vector<8x128xf32> to vector<8x32xf32>
    %739 = arith.negf %738 : vector<8x32xf32>
    %740 = math.exp %739 : vector<8x32xf32>
    %cst_196 = arith.constant 1.000000e+00 : f32
    %741 = vector.broadcast %cst_196 : f32 to vector<8x32xf32>
    %742 = arith.addf %741, %740 : vector<8x32xf32>
    %743 = arith.divf %741, %742 : vector<8x32xf32>
    %744 = vector.extract_strided_slice %706 {offsets = [0, 64], sizes = [8, 32], strides = [1, 1]} : vector<8x128xf32> to vector<8x32xf32>
    %745 = math.tanh %744 : vector<8x32xf32>
    %746 = vector.extract_strided_slice %706 {offsets = [0, 96], sizes = [8, 32], strides = [1, 1]} : vector<8x128xf32> to vector<8x32xf32>
    %747 = arith.negf %746 : vector<8x32xf32>
    %748 = math.exp %747 : vector<8x32xf32>
    %cst_197 = arith.constant 1.000000e+00 : f32
    %749 = vector.broadcast %cst_197 : f32 to vector<8x32xf32>
    %750 = arith.addf %749, %748 : vector<8x32xf32>
    %751 = arith.divf %749, %750 : vector<8x32xf32>
    %752 = arith.mulf %743, %687 : vector<8x32xf32>
    %753 = arith.mulf %737, %745 : vector<8x32xf32>
    %754 = arith.addf %752, %753 : vector<8x32xf32>
    %755 = math.tanh %754 : vector<8x32xf32>
    %756 = arith.mulf %751, %755 : vector<8x32xf32>
    %757 = arith.index_cast %696 : i32 to index
    %c0_198 = arith.constant 0 : index
    %758 = vector.load %arg12[%757, %c0_198] : memref<64x32xf32, #tpu.memory_space<vmem>>, vector<8x32xf32>
    tpu.vector_store %arg12[%757, %c0_198], %731 {strides = array<i32>} : memref<64x32xf32, #tpu.memory_space<vmem>>, vector<8x32xf32>,
    %759 = arith.index_cast %698 : i32 to index
    %c0_199 = arith.constant 0 : index
    %760 = vector.load %arg13[%759, %c0_199] : memref<64x32xf32, #tpu.memory_space<vmem>>, vector<8x32xf32>
    tpu.vector_store %arg13[%759, %c0_199], %756 {strides = array<i32>} : memref<64x32xf32, #tpu.memory_space<vmem>>, vector<8x32xf32>,
    %c3_i32_200 = arith.constant 3 : i32
    %c7_i32_201 = arith.constant 7 : i32
    %761 = arith.subi %c7_i32_201, %c3_i32_200 : i32
    %c8_i32_202 = arith.constant 8 : i32
    %762 = arith.muli %c3_i32_200, %c8_i32_202 : i32
    %763 = tpu.assume_multiple %762, 8 : i32
    %c8_i32_203 = arith.constant 8 : i32
    %764 = arith.muli %761, %c8_i32_203 : i32
    %765 = tpu.assume_multiple %764, 8 : i32
    %766 = arith.index_cast %763 : i32 to index
    %c0_204 = arith.constant 0 : index
    %767 = vector.load %arg10[%766, %c0_204] : memref<64x256xf32, #tpu.memory_space<vmem>>, vector<8x128xf32>
    %cst_205 = arith.constant dense<0.000000e+00> : vector<8x128xf32>
    %768 = tpu.matmul %731, %557, %cst_205 {dimension_numbers = #tpu.dot_dimension_numbers<[1], [0], [0], [1], [0, 0, 1, 1], [], []>} : vector<8x32xf32>, vector<32x128xf32>, vector<8x128xf32> -> vector<8x128xf32>
    %769 = arith.addf %767, %768 : vector<8x128xf32>
    %770 = arith.index_cast %765 : i32 to index
    %c128_206 = arith.constant 128 : index
    %771 = vector.load %arg10[%770, %c128_206] : memref<64x256xf32, #tpu.memory_space<vmem>>, vector<8x128xf32>
    %cst_207 = arith.constant dense<0.000000e+00> : vector<8x128xf32>
    %772 = tpu.matmul %756, %558, %cst_207 {dimension_numbers = #tpu.dot_dimension_numbers<[1], [0], [0], [1], [0, 0, 1, 1], [], []>} : vector<8x32xf32>, vector<32x128xf32>, vector<8x128xf32> -> vector<8x128xf32>
    %773 = arith.addf %771, %772 : vector<8x128xf32>
    %774 = vector.extract_strided_slice %769 {offsets = [0, 0], sizes = [8, 32], strides = [1, 1]} : vector<8x128xf32> to vector<8x32xf32>
    %775 = arith.negf %774 : vector<8x32xf32>
    %776 = math.exp %775 : vector<8x32xf32>
    %cst_208 = arith.constant 1.000000e+00 : f32
    %777 = vector.broadcast %cst_208 : f32 to vector<8x32xf32>
    %778 = arith.addf %777, %776 : vector<8x32xf32>
    %779 = arith.divf %777, %778 : vector<8x32xf32>
    %780 = vector.extract_strided_slice %769 {offsets = [0, 32], sizes = [8, 32], strides = [1, 1]} : vector<8x128xf32> to vector<8x32xf32>
    %781 = arith.negf %780 : vector<8x32xf32>
    %782 = math.exp %781 : vector<8x32xf32>
    %cst_209 = arith.constant 1.000000e+00 : f32
    %783 = vector.broadcast %cst_209 : f32 to vector<8x32xf32>
    %784 = arith.addf %783, %782 : vector<8x32xf32>
    %785 = arith.divf %783, %784 : vector<8x32xf32>
    %786 = vector.extract_strided_slice %769 {offsets = [0, 64], sizes = [8, 32], strides = [1, 1]} : vector<8x128xf32> to vector<8x32xf32>
    %787 = math.tanh %786 : vector<8x32xf32>
    %788 = vector.extract_strided_slice %769 {offsets = [0, 96], sizes = [8, 32], strides = [1, 1]} : vector<8x128xf32> to vector<8x32xf32>
    %789 = arith.negf %788 : vector<8x32xf32>
    %790 = math.exp %789 : vector<8x32xf32>
    %cst_210 = arith.constant 1.000000e+00 : f32
    %791 = vector.broadcast %cst_210 : f32 to vector<8x32xf32>
    %792 = arith.addf %791, %790 : vector<8x32xf32>
    %793 = arith.divf %791, %792 : vector<8x32xf32>
    %794 = arith.mulf %785, %729 : vector<8x32xf32>
    %795 = arith.mulf %779, %787 : vector<8x32xf32>
    %796 = arith.addf %794, %795 : vector<8x32xf32>
    %797 = math.tanh %796 : vector<8x32xf32>
    %798 = arith.mulf %793, %797 : vector<8x32xf32>
    %799 = vector.extract_strided_slice %773 {offsets = [0, 0], sizes = [8, 32], strides = [1, 1]} : vector<8x128xf32> to vector<8x32xf32>
    %800 = arith.negf %799 : vector<8x32xf32>
    %801 = math.exp %800 : vector<8x32xf32>
    %cst_211 = arith.constant 1.000000e+00 : f32
    %802 = vector.broadcast %cst_211 : f32 to vector<8x32xf32>
    %803 = arith.addf %802, %801 : vector<8x32xf32>
    %804 = arith.divf %802, %803 : vector<8x32xf32>
    %805 = vector.extract_strided_slice %773 {offsets = [0, 32], sizes = [8, 32], strides = [1, 1]} : vector<8x128xf32> to vector<8x32xf32>
    %806 = arith.negf %805 : vector<8x32xf32>
    %807 = math.exp %806 : vector<8x32xf32>
    %cst_212 = arith.constant 1.000000e+00 : f32
    %808 = vector.broadcast %cst_212 : f32 to vector<8x32xf32>
    %809 = arith.addf %808, %807 : vector<8x32xf32>
    %810 = arith.divf %808, %809 : vector<8x32xf32>
    %811 = vector.extract_strided_slice %773 {offsets = [0, 64], sizes = [8, 32], strides = [1, 1]} : vector<8x128xf32> to vector<8x32xf32>
    %812 = math.tanh %811 : vector<8x32xf32>
    %813 = vector.extract_strided_slice %773 {offsets = [0, 96], sizes = [8, 32], strides = [1, 1]} : vector<8x128xf32> to vector<8x32xf32>
    %814 = arith.negf %813 : vector<8x32xf32>
    %815 = math.exp %814 : vector<8x32xf32>
    %cst_213 = arith.constant 1.000000e+00 : f32
    %816 = vector.broadcast %cst_213 : f32 to vector<8x32xf32>
    %817 = arith.addf %816, %815 : vector<8x32xf32>
    %818 = arith.divf %816, %817 : vector<8x32xf32>
    %819 = arith.mulf %810, %754 : vector<8x32xf32>
    %820 = arith.mulf %804, %812 : vector<8x32xf32>
    %821 = arith.addf %819, %820 : vector<8x32xf32>
    %822 = math.tanh %821 : vector<8x32xf32>
    %823 = arith.mulf %818, %822 : vector<8x32xf32>
    %824 = arith.index_cast %763 : i32 to index
    %c0_214 = arith.constant 0 : index
    %825 = vector.load %arg12[%824, %c0_214] : memref<64x32xf32, #tpu.memory_space<vmem>>, vector<8x32xf32>
    tpu.vector_store %arg12[%824, %c0_214], %798 {strides = array<i32>} : memref<64x32xf32, #tpu.memory_space<vmem>>, vector<8x32xf32>,
    %826 = arith.index_cast %765 : i32 to index
    %c0_215 = arith.constant 0 : index
    %827 = vector.load %arg13[%826, %c0_215] : memref<64x32xf32, #tpu.memory_space<vmem>>, vector<8x32xf32>
    tpu.vector_store %arg13[%826, %c0_215], %823 {strides = array<i32>} : memref<64x32xf32, #tpu.memory_space<vmem>>, vector<8x32xf32>,
    %c4_i32_216 = arith.constant 4 : i32
    %c7_i32_217 = arith.constant 7 : i32
    %828 = arith.subi %c7_i32_217, %c4_i32_216 : i32
    %c8_i32_218 = arith.constant 8 : i32
    %829 = arith.muli %c4_i32_216, %c8_i32_218 : i32
    %830 = tpu.assume_multiple %829, 8 : i32
    %c8_i32_219 = arith.constant 8 : i32
    %831 = arith.muli %828, %c8_i32_219 : i32
    %832 = tpu.assume_multiple %831, 8 : i32
    %833 = arith.index_cast %830 : i32 to index
    %c0_220 = arith.constant 0 : index
    %834 = vector.load %arg10[%833, %c0_220] : memref<64x256xf32, #tpu.memory_space<vmem>>, vector<8x128xf32>
    %cst_221 = arith.constant dense<0.000000e+00> : vector<8x128xf32>
    %835 = tpu.matmul %798, %557, %cst_221 {dimension_numbers = #tpu.dot_dimension_numbers<[1], [0], [0], [1], [0, 0, 1, 1], [], []>} : vector<8x32xf32>, vector<32x128xf32>, vector<8x128xf32> -> vector<8x128xf32>
    %836 = arith.addf %834, %835 : vector<8x128xf32>
    %837 = arith.index_cast %832 : i32 to index
    %c128_222 = arith.constant 128 : index
    %838 = vector.load %arg10[%837, %c128_222] : memref<64x256xf32, #tpu.memory_space<vmem>>, vector<8x128xf32>
    %cst_223 = arith.constant dense<0.000000e+00> : vector<8x128xf32>
    %839 = tpu.matmul %823, %558, %cst_223 {dimension_numbers = #tpu.dot_dimension_numbers<[1], [0], [0], [1], [0, 0, 1, 1], [], []>} : vector<8x32xf32>, vector<32x128xf32>, vector<8x128xf32> -> vector<8x128xf32>
    %840 = arith.addf %838, %839 : vector<8x128xf32>
    %841 = vector.extract_strided_slice %836 {offsets = [0, 0], sizes = [8, 32], strides = [1, 1]} : vector<8x128xf32> to vector<8x32xf32>
    %842 = arith.negf %841 : vector<8x32xf32>
    %843 = math.exp %842 : vector<8x32xf32>
    %cst_224 = arith.constant 1.000000e+00 : f32
    %844 = vector.broadcast %cst_224 : f32 to vector<8x32xf32>
    %845 = arith.addf %844, %843 : vector<8x32xf32>
    %846 = arith.divf %844, %845 : vector<8x32xf32>
    %847 = vector.extract_strided_slice %836 {offsets = [0, 32], sizes = [8, 32], strides = [1, 1]} : vector<8x128xf32> to vector<8x32xf32>
    %848 = arith.negf %847 : vector<8x32xf32>
    %849 = math.exp %848 : vector<8x32xf32>
    %cst_225 = arith.constant 1.000000e+00 : f32
    %850 = vector.broadcast %cst_225 : f32 to vector<8x32xf32>
    %851 = arith.addf %850, %849 : vector<8x32xf32>
    %852 = arith.divf %850, %851 : vector<8x32xf32>
    %853 = vector.extract_strided_slice %836 {offsets = [0, 64], sizes = [8, 32], strides = [1, 1]} : vector<8x128xf32> to vector<8x32xf32>
    %854 = math.tanh %853 : vector<8x32xf32>
    %855 = vector.extract_strided_slice %836 {offsets = [0, 96], sizes = [8, 32], strides = [1, 1]} : vector<8x128xf32> to vector<8x32xf32>
    %856 = arith.negf %855 : vector<8x32xf32>
    %857 = math.exp %856 : vector<8x32xf32>
    %cst_226 = arith.constant 1.000000e+00 : f32
    %858 = vector.broadcast %cst_226 : f32 to vector<8x32xf32>
    %859 = arith.addf %858, %857 : vector<8x32xf32>
    %860 = arith.divf %858, %859 : vector<8x32xf32>
    %861 = arith.mulf %852, %796 : vector<8x32xf32>
    %862 = arith.mulf %846, %854 : vector<8x32xf32>
    %863 = arith.addf %861, %862 : vector<8x32xf32>
    %864 = math.tanh %863 : vector<8x32xf32>
    %865 = arith.mulf %860, %864 : vector<8x32xf32>
    %866 = vector.extract_strided_slice %840 {offsets = [0, 0], sizes = [8, 32], strides = [1, 1]} : vector<8x128xf32> to vector<8x32xf32>
    %867 = arith.negf %866 : vector<8x32xf32>
    %868 = math.exp %867 : vector<8x32xf32>
    %cst_227 = arith.constant 1.000000e+00 : f32
    %869 = vector.broadcast %cst_227 : f32 to vector<8x32xf32>
    %870 = arith.addf %869, %868 : vector<8x32xf32>
    %871 = arith.divf %869, %870 : vector<8x32xf32>
    %872 = vector.extract_strided_slice %840 {offsets = [0, 32], sizes = [8, 32], strides = [1, 1]} : vector<8x128xf32> to vector<8x32xf32>
    %873 = arith.negf %872 : vector<8x32xf32>
    %874 = math.exp %873 : vector<8x32xf32>
    %cst_228 = arith.constant 1.000000e+00 : f32
    %875 = vector.broadcast %cst_228 : f32 to vector<8x32xf32>
    %876 = arith.addf %875, %874 : vector<8x32xf32>
    %877 = arith.divf %875, %876 : vector<8x32xf32>
    %878 = vector.extract_strided_slice %840 {offsets = [0, 64], sizes = [8, 32], strides = [1, 1]} : vector<8x128xf32> to vector<8x32xf32>
    %879 = math.tanh %878 : vector<8x32xf32>
    %880 = vector.extract_strided_slice %840 {offsets = [0, 96], sizes = [8, 32], strides = [1, 1]} : vector<8x128xf32> to vector<8x32xf32>
    %881 = arith.negf %880 : vector<8x32xf32>
    %882 = math.exp %881 : vector<8x32xf32>
    %cst_229 = arith.constant 1.000000e+00 : f32
    %883 = vector.broadcast %cst_229 : f32 to vector<8x32xf32>
    %884 = arith.addf %883, %882 : vector<8x32xf32>
    %885 = arith.divf %883, %884 : vector<8x32xf32>
    %886 = arith.mulf %877, %821 : vector<8x32xf32>
    %887 = arith.mulf %871, %879 : vector<8x32xf32>
    %888 = arith.addf %886, %887 : vector<8x32xf32>
    %889 = math.tanh %888 : vector<8x32xf32>
    %890 = arith.mulf %885, %889 : vector<8x32xf32>
    %891 = arith.index_cast %830 : i32 to index
    %c0_230 = arith.constant 0 : index
    %892 = vector.load %arg12[%891, %c0_230] : memref<64x32xf32, #tpu.memory_space<vmem>>, vector<8x32xf32>
    tpu.vector_store %arg12[%891, %c0_230], %865 {strides = array<i32>} : memref<64x32xf32, #tpu.memory_space<vmem>>, vector<8x32xf32>,
    %893 = arith.index_cast %832 : i32 to index
    %c0_231 = arith.constant 0 : index
    %894 = vector.load %arg13[%893, %c0_231] : memref<64x32xf32, #tpu.memory_space<vmem>>, vector<8x32xf32>
    tpu.vector_store %arg13[%893, %c0_231], %890 {strides = array<i32>} : memref<64x32xf32, #tpu.memory_space<vmem>>, vector<8x32xf32>,
    %c5_i32_232 = arith.constant 5 : i32
    %c7_i32_233 = arith.constant 7 : i32
    %895 = arith.subi %c7_i32_233, %c5_i32_232 : i32
    %c8_i32_234 = arith.constant 8 : i32
    %896 = arith.muli %c5_i32_232, %c8_i32_234 : i32
    %897 = tpu.assume_multiple %896, 8 : i32
    %c8_i32_235 = arith.constant 8 : i32
    %898 = arith.muli %895, %c8_i32_235 : i32
    %899 = tpu.assume_multiple %898, 8 : i32
    %900 = arith.index_cast %897 : i32 to index
    %c0_236 = arith.constant 0 : index
    %901 = vector.load %arg10[%900, %c0_236] : memref<64x256xf32, #tpu.memory_space<vmem>>, vector<8x128xf32>
    %cst_237 = arith.constant dense<0.000000e+00> : vector<8x128xf32>
    %902 = tpu.matmul %865, %557, %cst_237 {dimension_numbers = #tpu.dot_dimension_numbers<[1], [0], [0], [1], [0, 0, 1, 1], [], []>} : vector<8x32xf32>, vector<32x128xf32>, vector<8x128xf32> -> vector<8x128xf32>
    %903 = arith.addf %901, %902 : vector<8x128xf32>
    %904 = arith.index_cast %899 : i32 to index
    %c128_238 = arith.constant 128 : index
    %905 = vector.load %arg10[%904, %c128_238] : memref<64x256xf32, #tpu.memory_space<vmem>>, vector<8x128xf32>
    %cst_239 = arith.constant dense<0.000000e+00> : vector<8x128xf32>
    %906 = tpu.matmul %890, %558, %cst_239 {dimension_numbers = #tpu.dot_dimension_numbers<[1], [0], [0], [1], [0, 0, 1, 1], [], []>} : vector<8x32xf32>, vector<32x128xf32>, vector<8x128xf32> -> vector<8x128xf32>
    %907 = arith.addf %905, %906 : vector<8x128xf32>
    %908 = vector.extract_strided_slice %903 {offsets = [0, 0], sizes = [8, 32], strides = [1, 1]} : vector<8x128xf32> to vector<8x32xf32>
    %909 = arith.negf %908 : vector<8x32xf32>
    %910 = math.exp %909 : vector<8x32xf32>
    %cst_240 = arith.constant 1.000000e+00 : f32
    %911 = vector.broadcast %cst_240 : f32 to vector<8x32xf32>
    %912 = arith.addf %911, %910 : vector<8x32xf32>
    %913 = arith.divf %911, %912 : vector<8x32xf32>
    %914 = vector.extract_strided_slice %903 {offsets = [0, 32], sizes = [8, 32], strides = [1, 1]} : vector<8x128xf32> to vector<8x32xf32>
    %915 = arith.negf %914 : vector<8x32xf32>
    %916 = math.exp %915 : vector<8x32xf32>
    %cst_241 = arith.constant 1.000000e+00 : f32
    %917 = vector.broadcast %cst_241 : f32 to vector<8x32xf32>
    %918 = arith.addf %917, %916 : vector<8x32xf32>
    %919 = arith.divf %917, %918 : vector<8x32xf32>
    %920 = vector.extract_strided_slice %903 {offsets = [0, 64], sizes = [8, 32], strides = [1, 1]} : vector<8x128xf32> to vector<8x32xf32>
    %921 = math.tanh %920 : vector<8x32xf32>
    %922 = vector.extract_strided_slice %903 {offsets = [0, 96], sizes = [8, 32], strides = [1, 1]} : vector<8x128xf32> to vector<8x32xf32>
    %923 = arith.negf %922 : vector<8x32xf32>
    %924 = math.exp %923 : vector<8x32xf32>
    %cst_242 = arith.constant 1.000000e+00 : f32
    %925 = vector.broadcast %cst_242 : f32 to vector<8x32xf32>
    %926 = arith.addf %925, %924 : vector<8x32xf32>
    %927 = arith.divf %925, %926 : vector<8x32xf32>
    %928 = arith.mulf %919, %863 : vector<8x32xf32>
    %929 = arith.mulf %913, %921 : vector<8x32xf32>
    %930 = arith.addf %928, %929 : vector<8x32xf32>
    %931 = math.tanh %930 : vector<8x32xf32>
    %932 = arith.mulf %927, %931 : vector<8x32xf32>
    %933 = vector.extract_strided_slice %907 {offsets = [0, 0], sizes = [8, 32], strides = [1, 1]} : vector<8x128xf32> to vector<8x32xf32>
    %934 = arith.negf %933 : vector<8x32xf32>
    %935 = math.exp %934 : vector<8x32xf32>
    %cst_243 = arith.constant 1.000000e+00 : f32
    %936 = vector.broadcast %cst_243 : f32 to vector<8x32xf32>
    %937 = arith.addf %936, %935 : vector<8x32xf32>
    %938 = arith.divf %936, %937 : vector<8x32xf32>
    %939 = vector.extract_strided_slice %907 {offsets = [0, 32], sizes = [8, 32], strides = [1, 1]} : vector<8x128xf32> to vector<8x32xf32>
    %940 = arith.negf %939 : vector<8x32xf32>
    %941 = math.exp %940 : vector<8x32xf32>
    %cst_244 = arith.constant 1.000000e+00 : f32
    %942 = vector.broadcast %cst_244 : f32 to vector<8x32xf32>
    %943 = arith.addf %942, %941 : vector<8x32xf32>
    %944 = arith.divf %942, %943 : vector<8x32xf32>
    %945 = vector.extract_strided_slice %907 {offsets = [0, 64], sizes = [8, 32], strides = [1, 1]} : vector<8x128xf32> to vector<8x32xf32>
    %946 = math.tanh %945 : vector<8x32xf32>
    %947 = vector.extract_strided_slice %907 {offsets = [0, 96], sizes = [8, 32], strides = [1, 1]} : vector<8x128xf32> to vector<8x32xf32>
    %948 = arith.negf %947 : vector<8x32xf32>
    %949 = math.exp %948 : vector<8x32xf32>
    %cst_245 = arith.constant 1.000000e+00 : f32
    %950 = vector.broadcast %cst_245 : f32 to vector<8x32xf32>
    %951 = arith.addf %950, %949 : vector<8x32xf32>
    %952 = arith.divf %950, %951 : vector<8x32xf32>
    %953 = arith.mulf %944, %888 : vector<8x32xf32>
    %954 = arith.mulf %938, %946 : vector<8x32xf32>
    %955 = arith.addf %953, %954 : vector<8x32xf32>
    %956 = math.tanh %955 : vector<8x32xf32>
    %957 = arith.mulf %952, %956 : vector<8x32xf32>
    %958 = arith.index_cast %897 : i32 to index
    %c0_246 = arith.constant 0 : index
    %959 = vector.load %arg12[%958, %c0_246] : memref<64x32xf32, #tpu.memory_space<vmem>>, vector<8x32xf32>
    tpu.vector_store %arg12[%958, %c0_246], %932 {strides = array<i32>} : memref<64x32xf32, #tpu.memory_space<vmem>>, vector<8x32xf32>,
    %960 = arith.index_cast %899 : i32 to index
    %c0_247 = arith.constant 0 : index
    %961 = vector.load %arg13[%960, %c0_247] : memref<64x32xf32, #tpu.memory_space<vmem>>, vector<8x32xf32>
    tpu.vector_store %arg13[%960, %c0_247], %957 {strides = array<i32>} : memref<64x32xf32, #tpu.memory_space<vmem>>, vector<8x32xf32>,
    %c6_i32_248 = arith.constant 6 : i32
    %c7_i32_249 = arith.constant 7 : i32
    %962 = arith.subi %c7_i32_249, %c6_i32_248 : i32
    %c8_i32_250 = arith.constant 8 : i32
    %963 = arith.muli %c6_i32_248, %c8_i32_250 : i32
    %964 = tpu.assume_multiple %963, 8 : i32
    %c8_i32_251 = arith.constant 8 : i32
    %965 = arith.muli %962, %c8_i32_251 : i32
    %966 = tpu.assume_multiple %965, 8 : i32
    %967 = arith.index_cast %964 : i32 to index
    %c0_252 = arith.constant 0 : index
    %968 = vector.load %arg10[%967, %c0_252] : memref<64x256xf32, #tpu.memory_space<vmem>>, vector<8x128xf32>
    %cst_253 = arith.constant dense<0.000000e+00> : vector<8x128xf32>
    %969 = tpu.matmul %932, %557, %cst_253 {dimension_numbers = #tpu.dot_dimension_numbers<[1], [0], [0], [1], [0, 0, 1, 1], [], []>} : vector<8x32xf32>, vector<32x128xf32>, vector<8x128xf32> -> vector<8x128xf32>
    %970 = arith.addf %968, %969 : vector<8x128xf32>
    %971 = arith.index_cast %966 : i32 to index
    %c128_254 = arith.constant 128 : index
    %972 = vector.load %arg10[%971, %c128_254] : memref<64x256xf32, #tpu.memory_space<vmem>>, vector<8x128xf32>
    %cst_255 = arith.constant dense<0.000000e+00> : vector<8x128xf32>
    %973 = tpu.matmul %957, %558, %cst_255 {dimension_numbers = #tpu.dot_dimension_numbers<[1], [0], [0], [1], [0, 0, 1, 1], [], []>} : vector<8x32xf32>, vector<32x128xf32>, vector<8x128xf32> -> vector<8x128xf32>
    %974 = arith.addf %972, %973 : vector<8x128xf32>
    %975 = vector.extract_strided_slice %970 {offsets = [0, 0], sizes = [8, 32], strides = [1, 1]} : vector<8x128xf32> to vector<8x32xf32>
    %976 = arith.negf %975 : vector<8x32xf32>
    %977 = math.exp %976 : vector<8x32xf32>
    %cst_256 = arith.constant 1.000000e+00 : f32
    %978 = vector.broadcast %cst_256 : f32 to vector<8x32xf32>
    %979 = arith.addf %978, %977 : vector<8x32xf32>
    %980 = arith.divf %978, %979 : vector<8x32xf32>
    %981 = vector.extract_strided_slice %970 {offsets = [0, 32], sizes = [8, 32], strides = [1, 1]} : vector<8x128xf32> to vector<8x32xf32>
    %982 = arith.negf %981 : vector<8x32xf32>
    %983 = math.exp %982 : vector<8x32xf32>
    %cst_257 = arith.constant 1.000000e+00 : f32
    %984 = vector.broadcast %cst_257 : f32 to vector<8x32xf32>
    %985 = arith.addf %984, %983 : vector<8x32xf32>
    %986 = arith.divf %984, %985 : vector<8x32xf32>
    %987 = vector.extract_strided_slice %970 {offsets = [0, 64], sizes = [8, 32], strides = [1, 1]} : vector<8x128xf32> to vector<8x32xf32>
    %988 = math.tanh %987 : vector<8x32xf32>
    %989 = vector.extract_strided_slice %970 {offsets = [0, 96], sizes = [8, 32], strides = [1, 1]} : vector<8x128xf32> to vector<8x32xf32>
    %990 = arith.negf %989 : vector<8x32xf32>
    %991 = math.exp %990 : vector<8x32xf32>
    %cst_258 = arith.constant 1.000000e+00 : f32
    %992 = vector.broadcast %cst_258 : f32 to vector<8x32xf32>
    %993 = arith.addf %992, %991 : vector<8x32xf32>
    %994 = arith.divf %992, %993 : vector<8x32xf32>
    %995 = arith.mulf %986, %930 : vector<8x32xf32>
    %996 = arith.mulf %980, %988 : vector<8x32xf32>
    %997 = arith.addf %995, %996 : vector<8x32xf32>
    %998 = math.tanh %997 : vector<8x32xf32>
    %999 = arith.mulf %994, %998 : vector<8x32xf32>
    %1000 = vector.extract_strided_slice %974 {offsets = [0, 0], sizes = [8, 32], strides = [1, 1]} : vector<8x128xf32> to vector<8x32xf32>
    %1001 = arith.negf %1000 : vector<8x32xf32>
    %1002 = math.exp %1001 : vector<8x32xf32>
    %cst_259 = arith.constant 1.000000e+00 : f32
    %1003 = vector.broadcast %cst_259 : f32 to vector<8x32xf32>
    %1004 = arith.addf %1003, %1002 : vector<8x32xf32>
    %1005 = arith.divf %1003, %1004 : vector<8x32xf32>
    %1006 = vector.extract_strided_slice %974 {offsets = [0, 32], sizes = [8, 32], strides = [1, 1]} : vector<8x128xf32> to vector<8x32xf32>
    %1007 = arith.negf %1006 : vector<8x32xf32>
    %1008 = math.exp %1007 : vector<8x32xf32>
    %cst_260 = arith.constant 1.000000e+00 : f32
    %1009 = vector.broadcast %cst_260 : f32 to vector<8x32xf32>
    %1010 = arith.addf %1009, %1008 : vector<8x32xf32>
    %1011 = arith.divf %1009, %1010 : vector<8x32xf32>
    %1012 = vector.extract_strided_slice %974 {offsets = [0, 64], sizes = [8, 32], strides = [1, 1]} : vector<8x128xf32> to vector<8x32xf32>
    %1013 = math.tanh %1012 : vector<8x32xf32>
    %1014 = vector.extract_strided_slice %974 {offsets = [0, 96], sizes = [8, 32], strides = [1, 1]} : vector<8x128xf32> to vector<8x32xf32>
    %1015 = arith.negf %1014 : vector<8x32xf32>
    %1016 = math.exp %1015 : vector<8x32xf32>
    %cst_261 = arith.constant 1.000000e+00 : f32
    %1017 = vector.broadcast %cst_261 : f32 to vector<8x32xf32>
    %1018 = arith.addf %1017, %1016 : vector<8x32xf32>
    %1019 = arith.divf %1017, %1018 : vector<8x32xf32>
    %1020 = arith.mulf %1011, %955 : vector<8x32xf32>
    %1021 = arith.mulf %1005, %1013 : vector<8x32xf32>
    %1022 = arith.addf %1020, %1021 : vector<8x32xf32>
    %1023 = math.tanh %1022 : vector<8x32xf32>
    %1024 = arith.mulf %1019, %1023 : vector<8x32xf32>
    %1025 = arith.index_cast %964 : i32 to index
    %c0_262 = arith.constant 0 : index
    %1026 = vector.load %arg12[%1025, %c0_262] : memref<64x32xf32, #tpu.memory_space<vmem>>, vector<8x32xf32>
    tpu.vector_store %arg12[%1025, %c0_262], %999 {strides = array<i32>} : memref<64x32xf32, #tpu.memory_space<vmem>>, vector<8x32xf32>,
    %1027 = arith.index_cast %966 : i32 to index
    %c0_263 = arith.constant 0 : index
    %1028 = vector.load %arg13[%1027, %c0_263] : memref<64x32xf32, #tpu.memory_space<vmem>>, vector<8x32xf32>
    tpu.vector_store %arg13[%1027, %c0_263], %1024 {strides = array<i32>} : memref<64x32xf32, #tpu.memory_space<vmem>>, vector<8x32xf32>,
    %c7_i32_264 = arith.constant 7 : i32
    %c7_i32_265 = arith.constant 7 : i32
    %1029 = arith.subi %c7_i32_265, %c7_i32_264 : i32
    %c8_i32_266 = arith.constant 8 : i32
    %1030 = arith.muli %c7_i32_264, %c8_i32_266 : i32
    %1031 = tpu.assume_multiple %1030, 8 : i32
    %c8_i32_267 = arith.constant 8 : i32
    %1032 = arith.muli %1029, %c8_i32_267 : i32
    %1033 = tpu.assume_multiple %1032, 8 : i32
    %1034 = arith.index_cast %1031 : i32 to index
    %c0_268 = arith.constant 0 : index
    %1035 = vector.load %arg10[%1034, %c0_268] : memref<64x256xf32, #tpu.memory_space<vmem>>, vector<8x128xf32>
    %cst_269 = arith.constant dense<0.000000e+00> : vector<8x128xf32>
    %1036 = tpu.matmul %999, %557, %cst_269 {dimension_numbers = #tpu.dot_dimension_numbers<[1], [0], [0], [1], [0, 0, 1, 1], [], []>} : vector<8x32xf32>, vector<32x128xf32>, vector<8x128xf32> -> vector<8x128xf32>
    %1037 = arith.addf %1035, %1036 : vector<8x128xf32>
    %1038 = arith.index_cast %1033 : i32 to index
    %c128_270 = arith.constant 128 : index
    %1039 = vector.load %arg10[%1038, %c128_270] : memref<64x256xf32, #tpu.memory_space<vmem>>, vector<8x128xf32>
    %cst_271 = arith.constant dense<0.000000e+00> : vector<8x128xf32>
    %1040 = tpu.matmul %1024, %558, %cst_271 {dimension_numbers = #tpu.dot_dimension_numbers<[1], [0], [0], [1], [0, 0, 1, 1], [], []>} : vector<8x32xf32>, vector<32x128xf32>, vector<8x128xf32> -> vector<8x128xf32>
    %1041 = arith.addf %1039, %1040 : vector<8x128xf32>
    %1042 = vector.extract_strided_slice %1037 {offsets = [0, 0], sizes = [8, 32], strides = [1, 1]} : vector<8x128xf32> to vector<8x32xf32>
    %1043 = arith.negf %1042 : vector<8x32xf32>
    %1044 = math.exp %1043 : vector<8x32xf32>
    %cst_272 = arith.constant 1.000000e+00 : f32
    %1045 = vector.broadcast %cst_272 : f32 to vector<8x32xf32>
    %1046 = arith.addf %1045, %1044 : vector<8x32xf32>
    %1047 = arith.divf %1045, %1046 : vector<8x32xf32>
    %1048 = vector.extract_strided_slice %1037 {offsets = [0, 32], sizes = [8, 32], strides = [1, 1]} : vector<8x128xf32> to vector<8x32xf32>
    %1049 = arith.negf %1048 : vector<8x32xf32>
    %1050 = math.exp %1049 : vector<8x32xf32>
    %cst_273 = arith.constant 1.000000e+00 : f32
    %1051 = vector.broadcast %cst_273 : f32 to vector<8x32xf32>
    %1052 = arith.addf %1051, %1050 : vector<8x32xf32>
    %1053 = arith.divf %1051, %1052 : vector<8x32xf32>
    %1054 = vector.extract_strided_slice %1037 {offsets = [0, 64], sizes = [8, 32], strides = [1, 1]} : vector<8x128xf32> to vector<8x32xf32>
    %1055 = math.tanh %1054 : vector<8x32xf32>
    %1056 = vector.extract_strided_slice %1037 {offsets = [0, 96], sizes = [8, 32], strides = [1, 1]} : vector<8x128xf32> to vector<8x32xf32>
    %1057 = arith.negf %1056 : vector<8x32xf32>
    %1058 = math.exp %1057 : vector<8x32xf32>
    %cst_274 = arith.constant 1.000000e+00 : f32
    %1059 = vector.broadcast %cst_274 : f32 to vector<8x32xf32>
    %1060 = arith.addf %1059, %1058 : vector<8x32xf32>
    %1061 = arith.divf %1059, %1060 : vector<8x32xf32>
    %1062 = arith.mulf %1053, %997 : vector<8x32xf32>
    %1063 = arith.mulf %1047, %1055 : vector<8x32xf32>
    %1064 = arith.addf %1062, %1063 : vector<8x32xf32>
    %1065 = math.tanh %1064 : vector<8x32xf32>
    %1066 = arith.mulf %1061, %1065 : vector<8x32xf32>
    %1067 = vector.extract_strided_slice %1041 {offsets = [0, 0], sizes = [8, 32], strides = [1, 1]} : vector<8x128xf32> to vector<8x32xf32>
    %1068 = arith.negf %1067 : vector<8x32xf32>
    %1069 = math.exp %1068 : vector<8x32xf32>
    %cst_275 = arith.constant 1.000000e+00 : f32
    %1070 = vector.broadcast %cst_275 : f32 to vector<8x32xf32>
    %1071 = arith.addf %1070, %1069 : vector<8x32xf32>
    %1072 = arith.divf %1070, %1071 : vector<8x32xf32>
    %1073 = vector.extract_strided_slice %1041 {offsets = [0, 32], sizes = [8, 32], strides = [1, 1]} : vector<8x128xf32> to vector<8x32xf32>
    %1074 = arith.negf %1073 : vector<8x32xf32>
    %1075 = math.exp %1074 : vector<8x32xf32>
    %cst_276 = arith.constant 1.000000e+00 : f32
    %1076 = vector.broadcast %cst_276 : f32 to vector<8x32xf32>
    %1077 = arith.addf %1076, %1075 : vector<8x32xf32>
    %1078 = arith.divf %1076, %1077 : vector<8x32xf32>
    %1079 = vector.extract_strided_slice %1041 {offsets = [0, 64], sizes = [8, 32], strides = [1, 1]} : vector<8x128xf32> to vector<8x32xf32>
    %1080 = math.tanh %1079 : vector<8x32xf32>
    %1081 = vector.extract_strided_slice %1041 {offsets = [0, 96], sizes = [8, 32], strides = [1, 1]} : vector<8x128xf32> to vector<8x32xf32>
    %1082 = arith.negf %1081 : vector<8x32xf32>
    %1083 = math.exp %1082 : vector<8x32xf32>
    %cst_277 = arith.constant 1.000000e+00 : f32
    %1084 = vector.broadcast %cst_277 : f32 to vector<8x32xf32>
    %1085 = arith.addf %1084, %1083 : vector<8x32xf32>
    %1086 = arith.divf %1084, %1085 : vector<8x32xf32>
    %1087 = arith.mulf %1078, %1022 : vector<8x32xf32>
    %1088 = arith.mulf %1072, %1080 : vector<8x32xf32>
    %1089 = arith.addf %1087, %1088 : vector<8x32xf32>
    %1090 = math.tanh %1089 : vector<8x32xf32>
    %1091 = arith.mulf %1086, %1090 : vector<8x32xf32>
    %1092 = arith.index_cast %1031 : i32 to index
    %c0_278 = arith.constant 0 : index
    %1093 = vector.load %arg12[%1092, %c0_278] : memref<64x32xf32, #tpu.memory_space<vmem>>, vector<8x32xf32>
    tpu.vector_store %arg12[%1092, %c0_278], %1066 {strides = array<i32>} : memref<64x32xf32, #tpu.memory_space<vmem>>, vector<8x32xf32>,
    %1094 = arith.index_cast %1033 : i32 to index
    %c0_279 = arith.constant 0 : index
    %1095 = vector.load %arg13[%1094, %c0_279] : memref<64x32xf32, #tpu.memory_space<vmem>>, vector<8x32xf32>
    tpu.vector_store %arg13[%1094, %c0_279], %1091 {strides = array<i32>} : memref<64x32xf32, #tpu.memory_space<vmem>>, vector<8x32xf32>,
    %c8_i32_280 = arith.constant 8 : i32
    %c0_281 = arith.constant 0 : index
    %c0_282 = arith.constant 0 : index
    %1096 = vector.load %arg12[%c0_281, %c0_282] : memref<64x32xf32, #tpu.memory_space<vmem>>, vector<64x32xf32>
    %c0_283 = arith.constant 0 : index
    %c0_284 = arith.constant 0 : index
    %1097 = vector.load %arg9[%c0_283, %c0_284] : memref<64x64xf32, #tpu.memory_space<vmem>>, vector<64x32xf32>
    tpu.vector_store %arg9[%c0_283, %c0_284], %1096 {strides = array<i32>} : memref<64x64xf32, #tpu.memory_space<vmem>>, vector<64x32xf32>,
    %c0_285 = arith.constant 0 : index
    %c0_286 = arith.constant 0 : index
    %1098 = vector.load %arg13[%c0_285, %c0_286] : memref<64x32xf32, #tpu.memory_space<vmem>>, vector<64x32xf32>
    %c0_287 = arith.constant 0 : index
    %c32_288 = arith.constant 32 : index
    %1099 = vector.load %arg9[%c0_287, %c32_288] : memref<64x64xf32, #tpu.memory_space<vmem>>, vector<64x32xf32>
    tpu.vector_store %arg9[%c0_287, %c32_288], %1098 {strides = array<i32>} : memref<64x64xf32, #tpu.memory_space<vmem>>, vector<64x32xf32>,
    return
  }
}

</mosaic_0001>

<bundles_post_ra>
// kernel: _encoder_impl.1
= control target key start
LH: loop header
LB: loop body
LE: loop exit
PB: predicated region body
PF: predicated region fallthrough
CT: control target
= control target key end

     0   :  { %14 = vsyncpa [#allocation7], 0  ;;  %s3931_s0 = inlined_call_operand.vmem [shape: f32[64,16], index: 0, kind: input, shape index: {}]   ;;  %s3932_s1 = inlined_call_operand.vmem [shape: f32[16,256], index: 1, kind: input, shape index: {}]   ;;  %s3933_s2 = inlined_call_operand.vmem [shape: f32[32,128], index: 2, kind: input, shape index: {}]   ;;  %s3934_s3 = inlined_call_operand.vmem [shape: f32[32,128], index: 3, kind: input, shape index: {}]   ;;  %s3935_s4 = inlined_call_operand.vmem [shape: f32[1,256], index: 4, kind: input, shape index: {}]   ;;  %s3936_s5 = inlined_call_operand.hbm [shape: f32[64,256], index: 5, kind: input, shape index: {}]   ;;  %s3937_s6 = inlined_call_operand.hbm [shape: f32[32,128], index: 6, kind: input, shape index: {}]   ;;  %s3938_s7 = inlined_call_operand.hbm [shape: f32[32,128], index: 7, kind: input, shape index: {}]   ;;  %s3939_s8 = inlined_call_operand.vmem [shape: f32[1,256], index: 8, kind: input, shape index: {}]   ;;  %s3940_s9 = inlined_call_operand.vmem [shape: f32[64,64], index: 9, kind: output, shape index: {}]  }
   0x1   :  { %15 = vsyncpa [#allocation9], 0  ;;  %s43_s11 = sshll.u32 %s3937_s6, 4  ;;  %s3115_s12 = smov [#allocation8]   ;;  %s44_s11 = int_to_ptr.hbm [resolvable:$true] %s43_s11 }
   0x2   :  { %s45_s13 = sshll.u32 %s3115_s12, 4  ;;  %s30_s16 = sshll.u32 %s3936_s5, 4  ;;  %s46_s13 = int_to_ptr.vmem [resolvable:$true] %s45_s13  ;;  %s31_s16 = int_to_ptr.hbm [resolvable:$true] %s30_s16 }
   0x3   :  { %s3116_s17 = smov 128   ;;  %s3117_s18 = smov 8  }
   0x4   :  { %51 = dma.hbm_to_vmem [thread:$0]  %s44_s11, 512, %s46_s13, [#allocation9], %s3116_s17, %s3116_s17, %s3117_s18  }
   0x5   :  { %s3118_s19 = smov [#allocation6]   ;;  %s3119_s21 = smov 256  }
   0x6   :  { %s32_s20 = sshll.u32 %s3118_s19, 4  ;;  %s3120_s22 = smov 16   ;;  %s33_s20 = int_to_ptr.vmem [resolvable:$true] %s32_s20 }
   0x7   :  { %38 = dma.hbm_to_vmem [thread:$0]  %s31_s16, 2048, %s33_s20, [#allocation7], %s3119_s21, %s3119_s21, %s3120_s22  }
   0x8   :  { %s56_s24 = sshll.u32 %s3938_s7, 4  ;;  %s3121_s25 = smov [#allocation10]   ;;  %s57_s24 = int_to_ptr.hbm [resolvable:$true] %s56_s24 }
   0x9   :  { %s58_s26 = sshll.u32 %s3121_s25, 4  ;;  %s59_s26 = int_to_ptr.vmem [resolvable:$true] %s58_s26 }
   0xa   :  { %64 = dma.hbm_to_vmem [thread:$0]  %s57_s24, 512, %s59_s26, [#allocation9], %s3116_s17, %s3116_s17, %s3117_s18  }
   0xb   :  { %3111 = dma.done.wait [#allocation7], 2048  }
   0xc   :  { %3112 = vsyncadd [#allocation7], 4294965248 }
   0xd   :  { %3113 = dma.done.wait [#allocation9], 1024  }
   0xe   :  { %3114 = vsyncadd [#allocation9], 4294966272  ;;  %v90_v0 = vld [vmem:[%s3932_s1 + $0x18] sm:$0xff]  ;;  %v88_v1 = vld [vmem:[%s3932_s1 + $0x8] sm:$0xff]  ;;  %vm97_vm0 = vcmask 130048   ;;  %v3122_v9 = vmov 0.0  }
   0xf   :  { %177 = vmatpush.msra.mxu1 %v90_v0  ;;  %v79_v2 = vld [vmem:[%s3931_s0] sm:$0xff]  ;;  %v3197_v3 = vld [vmem:[%s3931_s0 + $0x8] sm:$0xff]  ;;  %v3204_v4 = vld [vmem:[%s3934_s3 + $0x18] sm:$0xff]  ;;  %vm232_vm9 = vcmask 261120  }
  0x10   :  { %v3209_v5 = vld [vmem:[%s3934_s3 + $0x10] sm:$0xff]  ;;  %273 = vmatpush.msra.mxu3 %v3204_v4  ;;  %v3223_v7 = vld [vmem:[%s3934_s3 + $0x8] sm:$0xff]  ;;  %v3228_v8 = vld [vmem:[%s3934_s3] sm:$0xff] }
  0x11   :  { %178 = vmatpush.msra.mxu1 %v88_v1  ;;  %v3216_v6 = vld [vmem:[%s3931_s0 + $0x10] sm:$0xff]  ;;  %v3236_v10 = vld [vmem:[%s3931_s0 + $0x18] sm:$0xff]  ;;  %v83_v11 = vld [vmem:[%s3931_s0 + $0x20] sm:$0xff] }
  0x12   :  { %2685 = vmatmul.msk.f32.vlgmr.msra.gmra.mxu1 %vm97_vm0, %v79_v2  ;;  %274 = vmatpush.msra.mxu3 %v3209_v5  ;;  %v84_v12 = vld [vmem:[%s3931_s0 + $0x28] sm:$0xff]  ;;  %v85_v13 = vld [vmem:[%s3931_s0 + $0x30] sm:$0xff]  ;;  %v86_v14 = vld [vmem:[%s3931_s0 + $0x38] sm:$0xff] }
  0x13   :  { %v3267_v15 = vld [vmem:[%s3935_s4] sm:$0x3]  ;;  %v3283_v28 = vld [vmem:[%s3933_s2 + $0x18] sm:$0xff]  ;;  %v3288_v29 = vld [vmem:[%s3933_s2 + $0x10] sm:$0xff] }
  0x14   :  { %275 = vmatpush.msra.mxu3 %v3223_v7  ;;  %v94_v16 = vperm.slane %v3267_v15, 1  ;;  %248 = vmatpush.msra.mxu2 %v3283_v28  ;;  %v89_v31 = vld [vmem:[%s3932_s1 + $0x10] sm:$0xff]  ;;  %v87_v32 = vld [vmem:[%s3932_s1] sm:$0xff]  ;;  %v3302_v33 = vld [vmem:[%s3933_s2 + $0x8] sm:$0xff]  ;;  %s3123_s1 = smov 64   ;;  %v3337_v57 = vperm.slane %v3267_v15, 0 }
  0x15   :  { %136 = vmatpush.msra.mxu0 %v89_v31  ;;  %v3308_v34 = vld [vmem:[%s3933_s2] sm:$0xff]  ;;  %s3124_s2 = smov 32  }
  0x16   :  { %276 = vmatpush.msra.mxu3 %v3228_v8  ;;  %249 = vmatpush.msra.mxu2 %v3288_v29 }
  0x17   :  { %277 = vmatmul.f32.vlgmr.msra.gmra.mxu3 %v3122_v9  ;;  %137 = vmatpush.msra.mxu0 %v87_v32 }
  0x18   :  { %412 = vmatpush.msrb.mxu3 %v3204_v4  ;;  %250 = vmatpush.msra.mxu2 %v3302_v33 }
  0x19   :  { %2677 = vmatmul.msk.f32.vlgmr.msra.gmra.mxu0 %vm97_vm0, %v79_v2 }
  0x1a   :  { %2686 = vmatmul.msk.f32.gmra.mxu1 %vm97_vm0, %v3197_v3  ;;  %413 = vmatpush.msrb.mxu3 %v3209_v5 }
  0x1b   :  { %251 = vmatpush.msra.mxu2 %v3308_v34 }
  0x1c   :  { %414 = vmatpush.msrb.mxu3 %v3223_v7  ;;  %252 = vmatmul.f32.vlgmr.msra.gmra.mxu2 %v3122_v9 }
  0x1d   :  { %385 = vmatpush.msrb.mxu2 %v3283_v28 }
  0x1e   :  { %415 = vmatpush.msrb.mxu3 %v3228_v8 }
  0x1f   :  { %386 = vmatpush.msrb.mxu2 %v3288_v29 }
  0x20   :  { %552 = vmatpush.msra.mxu3 %v3204_v4 }
  0x21   :  { %387 = vmatpush.msrb.mxu2 %v3302_v33  ;;  %2678 = vmatmul.msk.f32.gmra.mxu0 %vm97_vm0, %v3197_v3 }
  0x22   :  { %2687 = vmatmul.msk.f32.gmra.mxu1 %vm97_vm0, %v3216_v6  ;;  %553 = vmatpush.msra.mxu3 %v3209_v5 }
  0x23   :  { %388 = vmatpush.msrb.mxu2 %v3308_v34 }
  0x24   :  { %554 = vmatpush.msra.mxu3 %v3223_v7 }
  0x25   :  { %525 = vmatpush.msra.mxu2 %v3283_v28 }
  0x26   :  { %555 = vmatpush.msra.mxu3 %v3228_v8 }
  0x27   :  { %526 = vmatpush.msra.mxu2 %v3288_v29 }
  0x29   :  { %527 = vmatpush.msra.mxu2 %v3302_v33  ;;  %2679 = vmatmul.msk.f32.gmra.mxu0 %vm97_vm0, %v3216_v6 }
  0x2a   :  { %2688 = vmatmul.msk.f32.gmra.mxu1 %vm97_vm0, %v3236_v10 }
  0x2b   :  { %528 = vmatpush.msra.mxu2 %v3308_v34 }
  0x31   :  { %2680 = vmatmul.msk.f32.gmra.mxu0 %vm97_vm0, %v3236_v10 }
  0x32   :  { %2689 = vmatmul.msk.f32.gmra.mxu1 %vm97_vm0, %v83_v11 }
  0x39   :  { %2681 = vmatmul.msk.f32.gmra.mxu0 %vm97_vm0, %v83_v11 }
  0x3a   :  { %2690 = vmatmul.msk.f32.gmra.mxu1 %vm97_vm0, %v84_v12 }
  0x41   :  { %2682 = vmatmul.msk.f32.gmra.mxu0 %vm97_vm0, %v84_v12 }
  0x42   :  { %2691 = vmatmul.msk.f32.gmra.mxu1 %vm97_vm0, %v85_v13 }
  0x49   :  { %2683 = vmatmul.msk.f32.gmra.mxu0 %vm97_vm0, %v85_v13 }
  0x4a   :  { %2692 = vmatmul.msk.f32.gmra.mxu1 %vm97_vm0, %v86_v14 }
  0x51   :  { %2684 = vmatmul.msk.f32.gmra.mxu0 %vm97_vm0, %v86_v14 }
  0x8f   :  { %v180_v17 = vpop.f32.mrf.mxu1 }
  0x90   :  { %v3270_v18 = vadd.f32 %v180_v17, %v94_v16 }
  0x96   :  { %v139_v59 = vpop.f32.mrf.mxu0 }
  0x97   :  { %v183_v19 = vpop.f32.mrf.mxu1  ;;  %v140_v62 = vadd.f32 %v139_v59, %v3337_v57 }
  0x98   :  { %v3272_v20 = vadd.f32 %v183_v19, %v94_v16 }
  0x9a   :  { %v278_v38 = vpop.f32.mrf.mxu3 }
  0x9f   :  { %v186_v21 = vpop.f32.mrf.mxu1  ;;  %v253_v63 = vpop.f32.mrf.mxu2 }
  0xa0   :  { %v3274_v22 = vadd.f32 %v186_v21, %v94_v16  ;;  %v256_v0 = vadd.f32 %v253_v63, %v140_v62 }
  0xa2   :  { %v2693_v3 = vmul.f32 -1.442695, %v256_v0 }
  0xa7   :  { %v189_v23 = vpop.f32.mrf.mxu1 }
  0xa8   :  { %v3276_v24 = vadd.f32 %v189_v23, %v94_v16 }
  0xaf   :  { %v192_v25 = vpop.f32.mrf.mxu1 }
  0xb0   :  { %v3278_v26 = vadd.f32 %v192_v25, %v94_v16 }
  0xb7   :  { %v195_v27 = vpop.f32.mrf.mxu1 }
  0xb8   :  { %v3290_v30 = vadd.f32 %v195_v27, %v94_v16 }
  0xbf   :  { %v198_v35 = vpop.f32.mrf.mxu1 }
  0xc0   :  { %v3314_v36 = vadd.f32 %v198_v35, %v94_v16 }
  0xc7   :  { %v201_v37 = vpop.f32.mrf.mxu1 }
  0xc8   :  { %v202_v39 = vadd.f32 %v201_v37, %v94_v16 }
  0xca   :  { %v281_v40 = vadd.f32 %v278_v38, %v202_v39 }
  0xcc   :  { %2779 = vtanh.f32 %v281_v40  ;;  %v2694_v42 = vmul.f32 -1.442695, %v281_v40 }
  0xce   :  { %2781 = vpow2.f32 %v2694_v42 }
  0xd2   :  { %v2780_v41 = vpop.eup %2779 }
  0xd3   :  { %341 = vrot.lane.b32.xlu0 %v2780_v41, %s3123_s1 }
  0xd4   :  { %v2782_v43 = vpop.eup %2781 }
  0xd5   :  { %v322_v44 = vadd.f32 1.0, %v2782_v43 }
  0xd7   :  { %2783 = vrcp.f32 %v322_v44  ;;  %v334_v50 = vand.u32 2147483648, %v322_v44  ;;  %vm328_vm2 = vweird.f32 %v322_v44  ;;  %v332_v51 = vand.u32 2147483647, %v322_v44 }
  0xd9   :  { %v335_v53 = vor.u32 1.1754944e-38, %v334_v50  ;;  %vm333_vm4 = vcmp.eq.f32.partialorder %v332_v51, 8.507059e+37 }
  0xdd   :  { %v2784_v45 = vpop.eup %2783 }
  0xde   :  { %v324_v46 = vmul.f32 %v2784_v45, %v322_v44  ;;  %vm329_vm1 = vweird.f32 %v2784_v45 }
  0xdf   :  { %vm330_vm3 = vmor %vm328_vm2, %vm329_vm1 }
  0xe0   :  { %v325_v47 = vsub.f32 1.0, %v324_v46 }
  0xe2   :  { %v326_v48 = vmul.f32 %v2784_v45, %v325_v47 }
  0xe4   :  { %v327_v49 = vadd.f32 %v2784_v45, %v326_v48 }
  0xe6   :  { %v331_v52 = vsel %vm330_vm3, %v2784_v45, %v327_v49 }
  0xe7   :  { %v336_v55 = vsel %vm333_vm4, %v335_v53, %v331_v52 }
  0xe8   :  { %v339_v58 = vmul.f32 0.0, %v336_v55 }
 0x145   :  { %v342_v54 = vpop.permute.xlu0 %341 }
 0x146   :  { %v344_v56 = vmul.f32 %v342_v54, %v336_v55 }
 0x148   :  { %346 = vrot.lane.b32.xlu0 %v344_v56, %s3124_s2 }
 0x1ba   :  { %v347_v60 = vpop.permute.xlu0 %346 }
 0x1bb   :  { %v3339_v61 = vadd.f32 %v347_v60, %v339_v58 }
 0x1bd   :  { %2785 = vtanh.f32 %v3339_v61 }
 0x1be   :  { %2787 = vtanh.f32 %v256_v0 }
 0x1bf   :  { %2789 = vpow2.f32 %v2693_v3 }
 0x1c3   :  { %v2786_v1 = vpop.eup %2785 }
 0x1c4   :  { %352 = vrot.lane.b32.xlu1 %v2786_v1, %s3123_s1  ;;  %v2788_v2 = vpop.eup %2787 }
 0x1c5   :  { %v2790_v6 = vpop.eup %2789 }
 0x1c6   :  { %v285_v10 = vadd.f32 1.0, %v2790_v6  ;;  %v142_v6 = vpop.f32.mrf.mxu0 }
 0x1c8   :  { %2791 = vrcp.f32 %v285_v10  ;;  %vm291_vm5 = vweird.f32 %v285_v10  ;;  %v297_v16 = vand.u32 2147483648, %v285_v10  ;;  %v295_v21 = vand.u32 2147483647, %v285_v10 }
 0x1ca   :  { %v298_v23 = vor.u32 1.1754944e-38, %v297_v16  ;;  %vm296_vm8 = vcmp.eq.f32.partialorder %v295_v21, 8.507059e+37 }
 0x1cc   :  { %304 = vrot.lane.b32.xlu1 %v2788_v2, %s3123_s1 }
 0x1ce   :  { %v2792_v11 = vpop.eup %2791 }
 0x1cf   :  { %v287_v12 = vmul.f32 %v2792_v11, %v285_v10  ;;  %vm292_vm6 = vweird.f32 %v2792_v11  ;;  %v143_v10 = vadd.f32 %v142_v6, %v3337_v57 }
 0x1d0   :  { %vm293_vm7 = vmor %vm291_vm5, %vm292_vm6 }
 0x1d1   :  { %v288_v13 = vsub.f32 1.0, %v287_v12 }
 0x1d3   :  { %v289_v14 = vmul.f32 %v2792_v11, %v288_v13 }
 0x1d5   :  { %v290_v19 = vadd.f32 %v2792_v11, %v289_v14 }
 0x1d7   :  { %v294_v25 = vsel %vm293_vm7, %v2792_v11, %v290_v19 }
 0x1d8   :  { %v299_v31 = vsel %vm296_vm8, %v298_v23, %v294_v25 }
 0x1d9   :  { %v302_v37 = vmul.f32 0.0, %v299_v31 }
 0x236   :  { %v353_v15 = vpop.permute.xlu1 %352 }
 0x237   :  { %v355_v17 = vmul.f32 %v353_v15, %v336_v55 }
 0x239   :  { %362 = vrot.lane.b32.xlu2 %v355_v17, %s3124_s2 }
 0x23e   :  { %v305_v27 = vpop.permute.xlu1 %304 }
 0x23f   :  { %v307_v32 = vmul.f32 %v305_v27, %v299_v31 }
 0x241   :  { %309 = vrot.lane.b32.xlu2 %v307_v32, %s3124_s2 }
 0x293   :  { %v363_v35 = vpop.permute.xlu2 %362 }
 0x294   :  { %366 = vst.msk [vmem:[#allocation5 + $0x38] sm:$0xff] %vm232_vm9, %v363_v35  ;;  %2696 = vmatmul.msk.f32.vlgmr.msrb.gmra.mxu3 %vm232_vm9, %v363_v35 }
 0x295   :  { %692 = vmatpush.msrb.mxu3 %v3204_v4 }
 0x297   :  { %693 = vmatpush.msrb.mxu3 %v3209_v5 }
 0x299   :  { %694 = vmatpush.msrb.mxu3 %v3223_v7 }
 0x29b   :  { %v310_v38 = vpop.permute.xlu2 %309  ;;  %695 = vmatpush.msrb.mxu3 %v3228_v8 }
 0x29c   :  { %v3353_v39 = vadd.f32 %v310_v38, %v302_v37 }
 0x29e   :  { %2793 = vtanh.f32 %v3353_v39 }
 0x2a4   :  { %v2794_v40 = vpop.eup %2793 }
 0x2a5   :  { %315 = vrot.lane.b32.xlu0 %v2794_v40, %s3123_s1 }
 0x317   :  { %v417_v41 = vpop.f32.mrf.mxu3  ;;  %v316_v42 = vpop.permute.xlu0 %315 }
 0x318   :  { %v420_v43 = vadd.f32 %v417_v41, %v3314_v36  ;;  %v318_v44 = vmul.f32 %v316_v42, %v299_v31 }
 0x31a   :  { %2795 = vtanh.f32 %v420_v43  ;;  %357 = vrot.lane.b32.xlu1 %v318_v44, %s3124_s2  ;;  %v2698_v46 = vmul.f32 -1.442695, %v420_v43 }
 0x31c   :  { %2797 = vpow2.f32 %v2698_v46 }
 0x320   :  { %v2796_v45 = vpop.eup %2795 }
 0x321   :  { %480 = vrot.lane.b32.xlu2 %v2796_v45, %s3123_s1 }
 0x322   :  { %v2798_v47 = vpop.eup %2797 }
 0x323   :  { %v461_v48 = vadd.f32 1.0, %v2798_v47 }
 0x325   :  { %2799 = vrcp.f32 %v461_v48  ;;  %v473_v54 = vand.u32 2147483648, %v461_v48  ;;  %vm467_vm11 = vweird.f32 %v461_v48  ;;  %v471_v36 = vand.u32 2147483647, %v461_v48 }
 0x327   :  { %v474_v56 = vor.u32 1.1754944e-38, %v473_v54  ;;  %vm472_vm13 = vcmp.eq.f32.partialorder %v471_v36, 8.507059e+37 }
 0x32b   :  { %v2800_v49 = vpop.eup %2799 }
 0x32c   :  { %v463_v50 = vmul.f32 %v2800_v49, %v461_v48  ;;  %vm468_vm10 = vweird.f32 %v2800_v49 }
 0x32d   :  { %vm469_vm12 = vmor %vm467_vm11, %vm468_vm10 }
 0x32e   :  { %v464_v51 = vsub.f32 1.0, %v463_v50 }
 0x330   :  { %v465_v52 = vmul.f32 %v2800_v49, %v464_v51 }
 0x332   :  { %v466_v53 = vadd.f32 %v2800_v49, %v465_v52 }
 0x334   :  { %v470_v55 = vsel %vm469_vm12, %v2800_v49, %v466_v53 }
 0x335   :  { %v475_v58 = vsel %vm472_vm13, %v474_v56, %v470_v55 }
 0x336   :  { %v478_v0 = vmul.f32 %v475_v58, %v3339_v61 }
 0x37b   :  { %v481_v59 = vpop.permute.xlu2 %480 }
 0x37c   :  { %v483_v60 = vmul.f32 %v481_v59, %v475_v58 }
 0x37e   :  { %485 = vrot.lane.b32.xlu0 %v483_v60, %s3124_s2 }
 0x38c   :  { %v358_v62 = vpop.permute.xlu1 %357 }
 0x38d   :  { %360 = vst.msk [vmem:[#allocation4] sm:$0xff] %vm232_vm9, %v358_v62  ;;  %2695 = vmatmul.msk.f32.vlgmr.msrb.gmra.mxu2 %vm232_vm9, %v358_v62 }
 0x38e   :  { %665 = vmatpush.msrb.mxu2 %v3283_v28 }
 0x390   :  { %666 = vmatpush.msrb.mxu2 %v3288_v29 }
 0x392   :  { %667 = vmatpush.msrb.mxu2 %v3302_v33 }
 0x394   :  { %668 = vmatpush.msrb.mxu2 %v3308_v34  ;;  %v1322_v63 = vld [vmem:[#allocation4] sm:$0xff] }
 0x395   :  { %1330 = vst.msk [vmem:[#allocation3] sm:$0xff] %vm232_vm9, %v1322_v63 }
 0x3f0   :  { %v486_v1 = vpop.permute.xlu0 %485 }
 0x3f1   :  { %v3369_v2 = vadd.f32 %v486_v1, %v478_v0 }
 0x3f3   :  { %2801 = vtanh.f32 %v3369_v2 }
 0x3f9   :  { %v2802_v3 = vpop.eup %2801 }
 0x3fa   :  { %491 = vrot.lane.b32.xlu1 %v2802_v3, %s3123_s1 }
 0x410   :  { %v390_v11 = vpop.f32.mrf.mxu2 }
 0x411   :  { %v393_v12 = vadd.f32 %v390_v11, %v143_v10 }
 0x413   :  { %2803 = vtanh.f32 %v393_v12  ;;  %v2697_v14 = vmul.f32 -1.442695, %v393_v12 }
 0x415   :  { %2805 = vpow2.f32 %v2697_v14 }
 0x419   :  { %v2804_v13 = vpop.eup %2803 }
 0x41a   :  { %443 = vrot.lane.b32.xlu2 %v2804_v13, %s3123_s1  ;;  %v145_v13 = vpop.f32.mrf.mxu0 }
 0x41b   :  { %v2806_v61 = vpop.eup %2805  ;;  %v146_v14 = vadd.f32 %v145_v13, %v3337_v57 }
 0x41c   :  { %v424_v15 = vadd.f32 1.0, %v2806_v61 }
 0x41e   :  { %2807 = vrcp.f32 %v424_v15  ;;  %v436_v31 = vand.u32 2147483648, %v424_v15  ;;  %vm430_vm15 = vweird.f32 %v424_v15  ;;  %v434_v32 = vand.u32 2147483647, %v424_v15 }
 0x420   :  { %v437_v37 = vor.u32 1.1754944e-38, %v436_v31  ;;  %vm435_vm1 = vcmp.eq.f32.partialorder %v434_v32, 8.507059e+37 }
 0x424   :  { %v2808_v16 = vpop.eup %2807 }
 0x425   :  { %v426_v17 = vmul.f32 %v2808_v16, %v424_v15  ;;  %vm431_vm14 = vweird.f32 %v2808_v16 }
 0x426   :  { %vm432_vm0 = vmor %vm430_vm15, %vm431_vm14 }
 0x427   :  { %v427_v19 = vsub.f32 1.0, %v426_v17 }
 0x429   :  { %v428_v21 = vmul.f32 %v2808_v16, %v427_v19 }
 0x42b   :  { %v429_v27 = vadd.f32 %v2808_v16, %v428_v21 }
 0x42d   :  { %v433_v35 = vsel %vm432_vm0, %v2808_v16, %v429_v27 }
 0x42e   :  { %v438_v40 = vsel %vm435_vm1, %v437_v37, %v433_v35 }
 0x42f   :  { %v441_v43 = vmul.f32 %v438_v40, %v3353_v39 }
 0x46c   :  { %v492_v23 = vpop.permute.xlu1 %491 }
 0x46d   :  { %v494_v25 = vmul.f32 %v492_v23, %v475_v58 }
 0x46f   :  { %502 = vrot.lane.b32.xlu0 %v494_v25, %s3124_s2 }
 0x474   :  { %v444_v38 = vpop.permute.xlu2 %443 }
 0x475   :  { %v446_v41 = vmul.f32 %v444_v38, %v438_v40 }
 0x477   :  { %448 = vrot.lane.b32.xlu1 %v446_v41, %s3124_s2 }
 0x4e1   :  { %v503_v42 = vpop.permute.xlu0 %502 }
 0x4e2   :  { %506 = vst.msk [vmem:[#allocation5 + $0x30] sm:$0xff] %vm232_vm9, %v503_v42  ;;  %2700 = vmatmul.msk.f32.vlgmr.msra.gmra.mxu3 %vm232_vm9, %v503_v42 }
 0x4e3   :  { %826 = vmatpush.msra.mxu3 %v3204_v4 }
 0x4e5   :  { %827 = vmatpush.msra.mxu3 %v3209_v5 }
 0x4e7   :  { %828 = vmatpush.msra.mxu3 %v3223_v7 }
 0x4e9   :  { %v449_v44 = vpop.permute.xlu1 %448  ;;  %829 = vmatpush.msra.mxu3 %v3228_v8 }
 0x4ea   :  { %v3384_v45 = vadd.f32 %v449_v44, %v441_v43 }
 0x4ec   :  { %2809 = vtanh.f32 %v3384_v45 }
 0x4f2   :  { %v2810_v46 = vpop.eup %2809 }
 0x4f3   :  { %454 = vrot.lane.b32.xlu2 %v2810_v46, %s3123_s1 }
 0x54d   :  { %v455_v47 = vpop.permute.xlu2 %454 }
 0x54e   :  { %v457_v48 = vmul.f32 %v455_v47, %v438_v40 }
 0x550   :  { %496 = vrot.lane.b32.xlu0 %v457_v48, %s3124_s2 }
 0x565   :  { %v557_v49 = vpop.f32.mrf.mxu3 }
 0x566   :  { %v560_v50 = vadd.f32 %v557_v49, %v3290_v30 }
 0x568   :  { %2811 = vtanh.f32 %v560_v50  ;;  %v2702_v39 = vmul.f32 -1.442695, %v560_v50 }
 0x56a   :  { %2813 = vpow2.f32 %v2702_v39 }
 0x56e   :  { %v2812_v51 = vpop.eup %2811 }
 0x56f   :  { %620 = vrot.lane.b32.xlu1 %v2812_v51, %s3123_s1 }
 0x570   :  { %v2814_v52 = vpop.eup %2813 }
 0x571   :  { %v601_v53 = vadd.f32 1.0, %v2814_v52 }
 0x573   :  { %2815 = vrcp.f32 %v601_v53  ;;  %v613_v60 = vand.u32 2147483648, %v601_v53  ;;  %vm607_vm3 = vweird.f32 %v601_v53  ;;  %v611_v62 = vand.u32 2147483647, %v601_v53 }
 0x575   :  { %v614_v0 = vor.u32 1.1754944e-38, %v613_v60  ;;  %vm612_vm5 = vcmp.eq.f32.partialorder %v611_v62, 8.507059e+37 }
 0x579   :  { %v2816_v36 = vpop.eup %2815 }
 0x57a   :  { %v603_v55 = vmul.f32 %v2816_v36, %v601_v53  ;;  %vm608_vm2 = vweird.f32 %v2816_v36 }
 0x57b   :  { %vm609_vm4 = vmor %vm607_vm3, %vm608_vm2 }
 0x57c   :  { %v604_v56 = vsub.f32 1.0, %v603_v55 }
 0x57e   :  { %v605_v58 = vmul.f32 %v2816_v36, %v604_v56 }
 0x580   :  { %v606_v59 = vadd.f32 %v2816_v36, %v605_v58 }
 0x582   :  { %v610_v63 = vsel %vm609_vm4, %v2816_v36, %v606_v59 }
 0x583   :  { %v615_v1 = vsel %vm612_vm5, %v614_v0, %v610_v63 }
 0x584   :  { %v618_v10 = vmul.f32 %v615_v1, %v3369_v2 }
 0x5c2   :  { %v497_v54 = vpop.permute.xlu0 %496 }
 0x5c3   :  { %500 = vst.msk [vmem:[#allocation4 + $0x8] sm:$0xff] %vm232_vm9, %v497_v54  ;;  %2699 = vmatmul.msk.f32.vlgmr.msra.gmra.mxu2 %vm232_vm9, %v497_v54 }
 0x5c4   :  { %802 = vmatpush.msra.mxu2 %v3283_v28 }
 0x5c6   :  { %803 = vmatpush.msra.mxu2 %v3288_v29 }
 0x5c8   :  { %804 = vmatpush.msra.mxu2 %v3302_v33 }
 0x5ca   :  { %805 = vmatpush.msra.mxu2 %v3308_v34  ;;  %v1323_v30 = vld [vmem:[#allocation4 + $0x8] sm:$0xff] }
 0x5cb   :  { %1331 = vst.msk [vmem:[#allocation3 + $0x8] sm:$0xff] %vm232_vm9, %v1323_v30 }
 0x5e1   :  { %v621_v3 = vpop.permute.xlu1 %620 }
 0x5e2   :  { %v623_v6 = vmul.f32 %v621_v3, %v615_v1 }
 0x5e4   :  { %625 = vrot.lane.b32.xlu2 %v623_v6, %s3124_s2 }
 0x63e   :  { %v626_v11 = vpop.permute.xlu2 %625 }
 0x63f   :  { %v3400_v12 = vadd.f32 %v626_v11, %v618_v10 }
 0x641   :  { %2817 = vtanh.f32 %v3400_v12 }
 0x646   :  { %v530_v61 = vpop.f32.mrf.mxu2 }
 0x647   :  { %v2818_v15 = vpop.eup %2817  ;;  %v533_v16 = vadd.f32 %v530_v61, %v146_v14 }
 0x648   :  { %631 = vrot.lane.b32.xlu0 %v2818_v15, %s3123_s1 }
 0x649   :  { %2819 = vtanh.f32 %v533_v16  ;;  %v2701_v19 = vmul.f32 -1.442695, %v533_v16  ;;  %v148_v16 = vpop.f32.mrf.mxu0 }
 0x64b   :  { %2821 = vpow2.f32 %v2701_v19 }
 0x64f   :  { %v2820_v17 = vpop.eup %2819 }
 0x650   :  { %583 = vrot.lane.b32.xlu1 %v2820_v17, %s3123_s1  ;;  %v149_v17 = vadd.f32 %v148_v16, %v3337_v57 }
 0x651   :  { %v2822_v2 = vpop.eup %2821 }
 0x652   :  { %v564_v21 = vadd.f32 1.0, %v2822_v2 }
 0x654   :  { %2823 = vrcp.f32 %v564_v21  ;;  %v576_v38 = vand.u32 2147483648, %v564_v21  ;;  %vm570_vm7 = vweird.f32 %v564_v21  ;;  %v574_v40 = vand.u32 2147483647, %v564_v21 }
 0x656   :  { %v577_v42 = vor.u32 1.1754944e-38, %v576_v38  ;;  %vm575_vm10 = vcmp.eq.f32.partialorder %v574_v40, 8.507059e+37 }
 0x65a   :  { %v2824_v23 = vpop.eup %2823 }
 0x65b   :  { %v566_v25 = vmul.f32 %v2824_v23, %v564_v21  ;;  %vm571_vm6 = vweird.f32 %v2824_v23 }
 0x65c   :  { %vm572_vm8 = vmor %vm570_vm7, %vm571_vm6 }
 0x65d   :  { %v567_v27 = vsub.f32 1.0, %v566_v25 }
 0x65f   :  { %v568_v31 = vmul.f32 %v2824_v23, %v567_v27 }
 0x661   :  { %v569_v37 = vadd.f32 %v2824_v23, %v568_v31 }
 0x663   :  { %v573_v41 = vsel %vm572_vm8, %v2824_v23, %v569_v37 }
 0x664   :  { %v578_v43 = vsel %vm575_vm10, %v577_v42, %v573_v41 }
 0x665   :  { %v581_v48 = vmul.f32 %v578_v43, %v3384_v45 }
 0x6ba   :  { %v632_v32 = vpop.permute.xlu0 %631 }
 0x6bb   :  { %v634_v35 = vmul.f32 %v632_v32, %v615_v1 }
 0x6bd   :  { %642 = vrot.lane.b32.xlu2 %v634_v35, %s3124_s2 }
 0x6c2   :  { %v584_v44 = vpop.permute.xlu1 %583 }
 0x6c3   :  { %v586_v46 = vmul.f32 %v584_v44, %v578_v43 }
 0x6c5   :  { %588 = vrot.lane.b32.xlu0 %v586_v46, %s3124_s2 }
 0x717   :  { %v643_v47 = vpop.permute.xlu2 %642 }
 0x718   :  { %646 = vst.msk [vmem:[#allocation5 + $0x28] sm:$0xff] %vm232_vm9, %v643_v47  ;;  %2704 = vmatmul.msk.f32.vlgmr.msrb.gmra.mxu3 %vm232_vm9, %v643_v47 }
 0x719   :  { %960 = vmatpush.msrb.mxu3 %v3204_v4 }
 0x71b   :  { %961 = vmatpush.msrb.mxu3 %v3209_v5 }
 0x71d   :  { %962 = vmatpush.msrb.mxu3 %v3223_v7 }
 0x71f   :  { %963 = vmatpush.msrb.mxu3 %v3228_v8 }
 0x737   :  { %v589_v49 = vpop.permute.xlu0 %588 }
 0x738   :  { %v3415_v50 = vadd.f32 %v589_v49, %v581_v48 }
 0x73a   :  { %2825 = vtanh.f32 %v3415_v50 }
 0x740   :  { %v2826_v51 = vpop.eup %2825 }
 0x741   :  { %594 = vrot.lane.b32.xlu1 %v2826_v51, %s3123_s1 }
 0x79b   :  { %v697_v39 = vpop.f32.mrf.mxu3 }
 0x79c   :  { %v700_v52 = vadd.f32 %v697_v39, %v3278_v26 }
 0x79e   :  { %2827 = vtanh.f32 %v700_v52  ;;  %v2706_v45 = vmul.f32 -1.442695, %v700_v52 }
 0x7a0   :  { %2829 = vpow2.f32 %v2706_v45 }
 0x7a4   :  { %v2828_v53 = vpop.eup %2827 }
 0x7a5   :  { %760 = vrot.lane.b32.xlu0 %v2828_v53, %s3123_s1 }
 0x7a6   :  { %v2830_v36 = vpop.eup %2829 }
 0x7a7   :  { %v741_v55 = vadd.f32 1.0, %v2830_v36 }
 0x7a9   :  { %2831 = vrcp.f32 %v741_v55  ;;  %v753_v26 = vand.u32 2147483648, %v741_v55  ;;  %vm747_vm12 = vweird.f32 %v741_v55  ;;  %v751_v0 = vand.u32 2147483647, %v741_v55 }
 0x7ab   :  { %v754_v3 = vor.u32 1.1754944e-38, %v753_v26  ;;  %vm752_vm14 = vcmp.eq.f32.partialorder %v751_v0, 8.507059e+37 }
 0x7af   :  { %v2832_v56 = vpop.eup %2831 }
 0x7b0   :  { %v743_v58 = vmul.f32 %v2832_v56, %v741_v55  ;;  %vm748_vm11 = vweird.f32 %v2832_v56 }
 0x7b1   :  { %vm749_vm13 = vmor %vm747_vm12, %vm748_vm11 }
 0x7b2   :  { %v744_v59 = vsub.f32 1.0, %v743_v58 }
 0x7b3   :  { %v595_v54 = vpop.permute.xlu1 %594 }
 0x7b4   :  { %v597_v30 = vmul.f32 %v595_v54, %v578_v43  ;;  %v745_v60 = vmul.f32 %v2832_v56, %v744_v59 }
 0x7b6   :  { %636 = vrot.lane.b32.xlu2 %v597_v30, %s3124_s2  ;;  %v746_v63 = vadd.f32 %v2832_v56, %v745_v60 }
 0x7b8   :  { %v750_v1 = vsel %vm749_vm13, %v2832_v56, %v746_v63 }
 0x7b9   :  { %v755_v6 = vsel %vm752_vm14, %v754_v3, %v750_v1 }
 0x7ba   :  { %v758_v14 = vmul.f32 %v755_v6, %v3400_v12 }
 0x810   :  { %v637_v62 = vpop.permute.xlu2 %636 }
 0x811   :  { %640 = vst.msk [vmem:[#allocation4 + $0x10] sm:$0xff] %vm232_vm9, %v637_v62  ;;  %2703 = vmatmul.msk.f32.vlgmr.msrb.gmra.mxu2 %vm232_vm9, %v637_v62 }
 0x812   :  { %936 = vmatpush.msrb.mxu2 %v3283_v28 }
 0x814   :  { %937 = vmatpush.msrb.mxu2 %v3288_v29 }
 0x816   :  { %938 = vmatpush.msrb.mxu2 %v3302_v33 }
 0x817   :  { %v761_v10 = vpop.permute.xlu0 %760 }
 0x818   :  { %v763_v11 = vmul.f32 %v761_v10, %v755_v6  ;;  %939 = vmatpush.msrb.mxu2 %v3308_v34  ;;  %v1324_v13 = vld [vmem:[#allocation4 + $0x10] sm:$0xff] }
 0x819   :  { %1332 = vst.msk [vmem:[#allocation3 + $0x10] sm:$0xff] %vm232_vm9, %v1324_v13 }
 0x81a   :  { %765 = vrot.lane.b32.xlu1 %v763_v11, %s3124_s2 }
 0x88c   :  { %v766_v61 = vpop.permute.xlu1 %765 }
 0x88d   :  { %v3431_v15 = vadd.f32 %v766_v61, %v758_v14 }
 0x88f   :  { %2833 = vtanh.f32 %v3431_v15 }
 0x894   :  { %v670_v19 = vpop.f32.mrf.mxu2 }
 0x895   :  { %v2834_v2 = vpop.eup %2833  ;;  %v673_v21 = vadd.f32 %v670_v19, %v149_v17 }
 0x896   :  { %771 = vrot.lane.b32.xlu2 %v2834_v2, %s3123_s1 }
 0x897   :  { %2835 = vtanh.f32 %v673_v21  ;;  %v2705_v25 = vmul.f32 -1.442695, %v673_v21  ;;  %v151_v21 = vpop.f32.mrf.mxu0 }
 0x899   :  { %2837 = vpow2.f32 %v2705_v25 }
 0x89d   :  { %v2836_v23 = vpop.eup %2835 }
 0x89e   :  { %723 = vrot.lane.b32.xlu0 %v2836_v23, %s3123_s1  ;;  %v152_v23 = vadd.f32 %v151_v21, %v3337_v57 }
 0x89f   :  { %v2838_v12 = vpop.eup %2837 }
 0x8a0   :  { %v704_v27 = vadd.f32 1.0, %v2838_v12 }
 0x8a2   :  { %2839 = vrcp.f32 %v704_v27  ;;  %v716_v42 = vand.u32 2147483648, %v704_v27  ;;  %vm710_vm0 = vweird.f32 %v704_v27  ;;  %v714_v43 = vand.u32 2147483647, %v704_v27 }
 0x8a4   :  { %v717_v46 = vor.u32 1.1754944e-38, %v716_v42  ;;  %vm715_vm2 = vcmp.eq.f32.partialorder %v714_v43, 8.507059e+37 }
 0x8a8   :  { %v2840_v35 = vpop.eup %2839 }
 0x8a9   :  { %v706_v37 = vmul.f32 %v2840_v35, %v704_v27  ;;  %vm711_vm15 = vweird.f32 %v2840_v35 }
 0x8aa   :  { %vm712_vm1 = vmor %vm710_vm0, %vm711_vm15 }
 0x8ab   :  { %v707_v38 = vsub.f32 1.0, %v706_v37 }
 0x8ad   :  { %v708_v40 = vmul.f32 %v2840_v35, %v707_v38 }
 0x8af   :  { %v709_v41 = vadd.f32 %v2840_v35, %v708_v40 }
 0x8b1   :  { %v713_v44 = vsel %vm712_vm1, %v2840_v35, %v709_v41 }
 0x8b2   :  { %v718_v47 = vsel %vm715_vm2, %v717_v46, %v713_v44 }
 0x8b3   :  { %v721_v39 = vmul.f32 %v718_v47, %v3415_v50 }
 0x8f0   :  { %v772_v31 = vpop.permute.xlu2 %771 }
 0x8f1   :  { %v774_v32 = vmul.f32 %v772_v31, %v755_v6 }
 0x8f3   :  { %782 = vrot.lane.b32.xlu1 %v774_v32, %s3124_s2 }
 0x910   :  { %v724_v48 = vpop.permute.xlu0 %723 }
 0x911   :  { %v726_v49 = vmul.f32 %v724_v48, %v718_v47 }
 0x913   :  { %728 = vrot.lane.b32.xlu2 %v726_v49, %s3124_s2 }
 0x965   :  { %v783_v51 = vpop.permute.xlu1 %782 }
 0x966   :  { %786 = vst.msk [vmem:[#allocation5 + $0x20] sm:$0xff] %vm232_vm9, %v783_v51  ;;  %2708 = vmatmul.msk.f32.vlgmr.msra.gmra.mxu3 %vm232_vm9, %v783_v51 }
 0x967   :  { %1094 = vmatpush.msra.mxu3 %v3204_v4 }
 0x969   :  { %1095 = vmatpush.msra.mxu3 %v3209_v5 }
 0x96b   :  { %1096 = vmatpush.msra.mxu3 %v3223_v7 }
 0x96d   :  { %v729_v52 = vpop.permute.xlu2 %728  ;;  %1097 = vmatpush.msra.mxu3 %v3228_v8 }
 0x96e   :  { %v3446_v53 = vadd.f32 %v729_v52, %v721_v39 }
 0x970   :  { %2841 = vtanh.f32 %v3446_v53 }
 0x976   :  { %v2842_v54 = vpop.eup %2841 }
 0x977   :  { %734 = vrot.lane.b32.xlu0 %v2842_v54, %s3123_s1 }
 0x9e9   :  { %v831_v30 = vpop.f32.mrf.mxu3  ;;  %v735_v45 = vpop.permute.xlu0 %734 }
 0x9ea   :  { %v834_v36 = vadd.f32 %v831_v30, %v3276_v24  ;;  %v737_v55 = vmul.f32 %v735_v45, %v718_v47 }
 0x9ec   :  { %2843 = vtanh.f32 %v834_v36  ;;  %776 = vrot.lane.b32.xlu1 %v737_v55, %s3124_s2  ;;  %v2710_v50 = vmul.f32 -1.442695, %v834_v36 }
 0x9ee   :  { %2845 = vpow2.f32 %v2710_v50 }
 0x9f2   :  { %v2844_v56 = vpop.eup %2843 }
 0x9f3   :  { %894 = vrot.lane.b32.xlu2 %v2844_v56, %s3123_s1 }
 0x9f4   :  { %v2846_v58 = vpop.eup %2845 }
 0x9f5   :  { %v875_v59 = vadd.f32 1.0, %v2846_v58 }
 0x9f7   :  { %2847 = vrcp.f32 %v875_v59  ;;  %v887_v1 = vand.u32 2147483648, %v875_v59  ;;  %vm881_vm4 = vweird.f32 %v875_v59  ;;  %v885_v24 = vand.u32 2147483647, %v875_v59 }
 0x9f9   :  { %v888_v6 = vor.u32 1.1754944e-38, %v887_v1  ;;  %vm886_vm6 = vcmp.eq.f32.partialorder %v885_v24, 8.507059e+37 }
 0x9fd   :  { %v2848_v60 = vpop.eup %2847 }
 0x9fe   :  { %v877_v62 = vmul.f32 %v2848_v60, %v875_v59  ;;  %vm882_vm3 = vweird.f32 %v2848_v60 }
 0x9ff   :  { %vm883_vm5 = vmor %vm881_vm4, %vm882_vm3 }
 0xa00   :  { %v878_v63 = vsub.f32 1.0, %v877_v62 }
 0xa02   :  { %v879_v26 = vmul.f32 %v2848_v60, %v878_v63 }
 0xa04   :  { %v880_v0 = vadd.f32 %v2848_v60, %v879_v26 }
 0xa06   :  { %v884_v3 = vsel %vm883_vm5, %v2848_v60, %v880_v0 }
 0xa07   :  { %v889_v10 = vsel %vm886_vm6, %v888_v6, %v884_v3 }
 0xa08   :  { %v892_v16 = vmul.f32 %v889_v10, %v3431_v15 }
 0xa4d   :  { %v895_v11 = vpop.permute.xlu2 %894 }
 0xa4e   :  { %v897_v13 = vmul.f32 %v895_v11, %v889_v10  ;;  %v154_v11 = vpop.f32.mrf.mxu0 }
 0xa50   :  { %899 = vrot.lane.b32.xlu0 %v897_v13, %s3124_s2  ;;  %v155_v13 = vadd.f32 %v154_v11, %v3337_v57 }
 0xa5e   :  { %v777_v14 = vpop.permute.xlu1 %776 }
 0xa5f   :  { %780 = vst.msk [vmem:[#allocation4 + $0x18] sm:$0xff] %vm232_vm9, %v777_v14  ;;  %2707 = vmatmul.msk.f32.vlgmr.msra.gmra.mxu2 %vm232_vm9, %v777_v14 }
 0xa60   :  { %1070 = vmatpush.msra.mxu2 %v3283_v28 }
 0xa62   :  { %1071 = vmatpush.msra.mxu2 %v3288_v29 }
 0xa64   :  { %1072 = vmatpush.msra.mxu2 %v3302_v33 }
 0xa66   :  { %1073 = vmatpush.msra.mxu2 %v3308_v34  ;;  %v1325_v61 = vld [vmem:[#allocation4 + $0x18] sm:$0xff] }
 0xa67   :  { %1333 = vst.msk [vmem:[#allocation3 + $0x18] sm:$0xff] %vm232_vm9, %v1325_v61 }
 0xac2   :  { %v900_v17 = vpop.permute.xlu0 %899 }
 0xac3   :  { %v3462_v19 = vadd.f32 %v900_v17, %v892_v16 }
 0xac5   :  { %2849 = vtanh.f32 %v3462_v19 }
 0xacb   :  { %v2850_v2 = vpop.eup %2849 }
 0xacc   :  { %905 = vrot.lane.b32.xlu1 %v2850_v2, %s3123_s1 }
 0xae2   :  { %v807_v25 = vpop.f32.mrf.mxu2 }
 0xae3   :  { %v810_v12 = vadd.f32 %v807_v25, %v152_v23 }
 0xae5   :  { %2851 = vtanh.f32 %v810_v12  ;;  %v2709_v31 = vmul.f32 -1.442695, %v810_v12 }
 0xae7   :  { %2853 = vpow2.f32 %v2709_v31 }
 0xaeb   :  { %v2852_v27 = vpop.eup %2851 }
 0xaec   :  { %857 = vrot.lane.b32.xlu2 %v2852_v27, %s3123_s1 }
 0xaed   :  { %v2854_v15 = vpop.eup %2853 }
 0xaee   :  { %v838_v32 = vadd.f32 1.0, %v2854_v15 }
 0xaf0   :  { %2855 = vrcp.f32 %v838_v32  ;;  %v850_v44 = vand.u32 2147483648, %v838_v32  ;;  %vm844_vm8 = vweird.f32 %v838_v32  ;;  %v848_v46 = vand.u32 2147483647, %v838_v32 }
 0xaf2   :  { %v851_v48 = vor.u32 1.1754944e-38, %v850_v44  ;;  %vm849_vm11 = vcmp.eq.f32.partialorder %v848_v46, 8.507059e+37 }
 0xaf6   :  { %v2856_v35 = vpop.eup %2855 }
 0xaf7   :  { %v840_v37 = vmul.f32 %v2856_v35, %v838_v32  ;;  %vm845_vm7 = vweird.f32 %v2856_v35 }
 0xaf8   :  { %vm846_vm10 = vmor %vm844_vm8, %vm845_vm7 }
 0xaf9   :  { %v841_v38 = vsub.f32 1.0, %v840_v37 }
 0xafb   :  { %v842_v40 = vmul.f32 %v2856_v35, %v841_v38 }
 0xafd   :  { %v843_v43 = vadd.f32 %v2856_v35, %v842_v40 }
 0xaff   :  { %v847_v47 = vsel %vm846_vm10, %v2856_v35, %v843_v43 }
 0xb00   :  { %v852_v49 = vsel %vm849_vm11, %v851_v48, %v847_v47 }
 0xb01   :  { %v855_v54 = vmul.f32 %v852_v49, %v3446_v53 }
 0xb3e   :  { %v906_v41 = vpop.permute.xlu1 %905 }
 0xb3f   :  { %v908_v42 = vmul.f32 %v906_v41, %v889_v10 }
 0xb41   :  { %916 = vrot.lane.b32.xlu0 %v908_v42, %s3124_s2 }
 0xb46   :  { %v858_v51 = vpop.permute.xlu2 %857 }
 0xb47   :  { %v860_v39 = vmul.f32 %v858_v51, %v852_v49 }
 0xb49   :  { %862 = vrot.lane.b32.xlu1 %v860_v39, %s3124_s2 }
 0xbb3   :  { %v917_v52 = vpop.permute.xlu0 %916 }
 0xbb4   :  { %920 = vst.msk [vmem:[#allocation5 + $0x18] sm:$0xff] %vm232_vm9, %v917_v52  ;;  %2712 = vmatmul.msk.f32.vlgmr.msrb.gmra.mxu3 %vm232_vm9, %v917_v52 }
 0xbb5   :  { %1228 = vmatpush.msrb.mxu3 %v3204_v4 }
 0xbb7   :  { %1229 = vmatpush.msrb.mxu3 %v3209_v5 }
 0xbb9   :  { %1230 = vmatpush.msrb.mxu3 %v3223_v7 }
 0xbbb   :  { %v863_v30 = vpop.permute.xlu1 %862  ;;  %1231 = vmatpush.msrb.mxu3 %v3228_v8 }
 0xbbc   :  { %v3477_v45 = vadd.f32 %v863_v30, %v855_v54 }
 0xbbe   :  { %2857 = vtanh.f32 %v3477_v45 }
 0xbc4   :  { %v2858_v36 = vpop.eup %2857 }
 0xbc5   :  { %868 = vrot.lane.b32.xlu2 %v2858_v36, %s3123_s1 }
 0xc1f   :  { %v869_v55 = vpop.permute.xlu2 %868 }
 0xc20   :  { %v871_v56 = vmul.f32 %v869_v55, %v852_v49 }
 0xc22   :  { %910 = vrot.lane.b32.xlu0 %v871_v56, %s3124_s2 }
 0xc37   :  { %v965_v4 = vpop.f32.mrf.mxu3 }
 0xc38   :  { %v968_v5 = vadd.f32 %v965_v4, %v3274_v22 }
 0xc3a   :  { %2859 = vtanh.f32 %v968_v5  ;;  %v2714_v53 = vmul.f32 -1.442695, %v968_v5 }
 0xc3c   :  { %2861 = vpow2.f32 %v2714_v53 }
 0xc40   :  { %v2860_v7 = vpop.eup %2859 }
 0xc41   :  { %1028 = vrot.lane.b32.xlu1 %v2860_v7, %s3123_s1 }
 0xc42   :  { %v2862_v8 = vpop.eup %2861 }
 0xc43   :  { %v1009_v50 = vadd.f32 1.0, %v2862_v8 }
 0xc45   :  { %2863 = vrcp.f32 %v1009_v50  ;;  %v1021_v0 = vand.u32 2147483648, %v1009_v50  ;;  %vm1015_vm13 = vweird.f32 %v1009_v50  ;;  %v1019_v1 = vand.u32 2147483647, %v1009_v50 }
 0xc47   :  { %v1022_v24 = vor.u32 1.1754944e-38, %v1021_v0  ;;  %vm1020_vm15 = vcmp.eq.f32.partialorder %v1019_v1, 8.507059e+37 }
 0xc4b   :  { %v2864_v59 = vpop.eup %2863 }
 0xc4c   :  { %v1011_v60 = vmul.f32 %v2864_v59, %v1009_v50  ;;  %vm1016_vm12 = vweird.f32 %v2864_v59 }
 0xc4d   :  { %vm1017_vm14 = vmor %vm1015_vm13, %vm1016_vm12 }
 0xc4e   :  { %v1012_v62 = vsub.f32 1.0, %v1011_v60 }
 0xc50   :  { %v1013_v63 = vmul.f32 %v2864_v59, %v1012_v62 }
 0xc52   :  { %v1014_v26 = vadd.f32 %v2864_v59, %v1013_v63 }
 0xc94   :  { %v911_v58 = vpop.permute.xlu0 %910 }
 0xc95   :  { %914 = vst.msk [vmem:[#allocation4 + $0x20] sm:$0xff] %vm232_vm9, %v911_v58  ;;  %2711 = vmatmul.msk.f32.vlgmr.msrb.gmra.mxu2 %vm232_vm9, %v911_v58 }
 0xc96   :  { %1204 = vmatpush.msrb.mxu2 %v3283_v28  ;;  %v1018_v28 = vsel %vm1017_vm14, %v2864_v59, %v1014_v26 }
 0xc98   :  { %1205 = vmatpush.msrb.mxu2 %v3288_v29  ;;  %v1023_v29 = vsel %vm1020_vm15, %v1022_v24, %v1018_v28  ;;  %v157_v28 = vpop.f32.mrf.mxu0 }
 0xc99   :  { %v158_v24 = vadd.f32 %v157_v28, %v3337_v57 }
 0xc9a   :  { %1206 = vmatpush.msrb.mxu2 %v3302_v33 }
 0xc9c   :  { %1207 = vmatpush.msrb.mxu2 %v3308_v34  ;;  %v1326_v22 = vld [vmem:[#allocation4 + $0x20] sm:$0xff]  ;;  %v1026_v34 = vmul.f32 %v1023_v29, %v3462_v19 }
 0xc9d   :  { %1334 = vst.msk [vmem:[#allocation3 + $0x20] sm:$0xff] %vm232_vm9, %v1326_v22 }
 0xcb3   :  { %v1029_v33 = vpop.permute.xlu1 %1028 }
 0xcb4   :  { %v1031_v3 = vmul.f32 %v1029_v33, %v1023_v29 }
 0xcb6   :  { %1033 = vrot.lane.b32.xlu2 %v1031_v3, %s3124_s2 }
 0xd10   :  { %v1034_v6 = vpop.permute.xlu2 %1033 }
 0xd11   :  { %v3493_v10 = vadd.f32 %v1034_v6, %v1026_v34 }
 0xd13   :  { %2865 = vtanh.f32 %v3493_v10 }
 0xd18   :  { %v941_v14 = vpop.f32.mrf.mxu2 }
 0xd19   :  { %v2866_v61 = vpop.eup %2865  ;;  %v944_v16 = vadd.f32 %v941_v14, %v155_v13 }
 0xd1a   :  { %1039 = vrot.lane.b32.xlu0 %v2866_v61, %s3123_s1 }
 0xd1b   :  { %2867 = vtanh.f32 %v944_v16  ;;  %v2713_v2 = vmul.f32 -1.442695, %v944_v16 }
 0xd1d   :  { %2869 = vpow2.f32 %v2713_v2 }
 0xd21   :  { %v2868_v17 = vpop.eup %2867 }
 0xd22   :  { %991 = vrot.lane.b32.xlu1 %v2868_v17, %s3123_s1 }
 0xd23   :  { %v2870_v19 = vpop.eup %2869 }
 0xd24   :  { %v972_v21 = vadd.f32 1.0, %v2870_v19 }
 0xd26   :  { %2871 = vrcp.f32 %v972_v21  ;;  %v984_v35 = vand.u32 2147483648, %v972_v21  ;;  %vm978_vm1 = vweird.f32 %v972_v21  ;;  %v982_v37 = vand.u32 2147483647, %v972_v21 }
 0xd28   :  { %v985_v40 = vor.u32 1.1754944e-38, %v984_v35  ;;  %vm983_vm3 = vcmp.eq.f32.partialorder %v982_v37, 8.507059e+37 }
 0xd2c   :  { %v2872_v23 = vpop.eup %2871 }
 0xd2d   :  { %v974_v25 = vmul.f32 %v2872_v23, %v972_v21  ;;  %vm979_vm0 = vweird.f32 %v2872_v23 }
 0xd2e   :  { %vm980_vm2 = vmor %vm978_vm1, %vm979_vm0 }
 0xd2f   :  { %v975_v12 = vsub.f32 1.0, %v974_v25 }
 0xd31   :  { %v976_v27 = vmul.f32 %v2872_v23, %v975_v12 }
 0xd33   :  { %v977_v32 = vadd.f32 %v2872_v23, %v976_v27 }
 0xd35   :  { %v981_v38 = vsel %vm980_vm2, %v2872_v23, %v977_v32 }
 0xd36   :  { %v986_v41 = vsel %vm983_vm3, %v985_v40, %v981_v38 }
 0xd37   :  { %v989_v46 = vmul.f32 %v986_v41, %v3477_v45 }
 0xd8c   :  { %v1040_v31 = vpop.permute.xlu0 %1039 }
 0xd8d   :  { %v1042_v15 = vmul.f32 %v1040_v31, %v1023_v29 }
 0xd8f   :  { %1050 = vrot.lane.b32.xlu2 %v1042_v15, %s3124_s2 }
 0xd94   :  { %v992_v42 = vpop.permute.xlu1 %991 }
 0xd95   :  { %v994_v43 = vmul.f32 %v992_v42, %v986_v41 }
 0xd97   :  { %996 = vrot.lane.b32.xlu0 %v994_v43, %s3124_s2 }
 0xde9   :  { %v1051_v44 = vpop.permute.xlu2 %1050 }
 0xdea   :  { %1054 = vst.msk [vmem:[#allocation5 + $0x10] sm:$0xff] %vm232_vm9, %v1051_v44  ;;  %2716 = vmatmul.msk.f32.vlgmr.msra.gmra.mxu3 %vm232_vm9, %v1051_v44 }
 0xe09   :  { %v997_v47 = vpop.permute.xlu0 %996 }
 0xe0a   :  { %v3504_v48 = vadd.f32 %v997_v47, %v989_v46 }
 0xe0c   :  { %2873 = vtanh.f32 %v3504_v48 }
 0xe12   :  { %v2874_v49 = vpop.eup %2873 }
 0xe13   :  { %1002 = vrot.lane.b32.xlu1 %v2874_v49, %s3123_s1 }
 0xe6d   :  { %v1099_v51 = vpop.f32.mrf.mxu3 }
 0xe6e   :  { %v1102_v39 = vadd.f32 %v1099_v51, %v3272_v20 }
 0xe70   :  { %2875 = vtanh.f32 %v1102_v39  ;;  %v2718_v45 = vmul.f32 -1.442695, %v1102_v39 }
 0xe72   :  { %2877 = vpow2.f32 %v2718_v45 }
 0xe76   :  { %v2876_v52 = vpop.eup %2875 }
 0xe77   :  { %1162 = vrot.lane.b32.xlu0 %v2876_v52, %s3123_s1 }
 0xe78   :  { %v2878_v36 = vpop.eup %2877 }
 0xe79   :  { %v1143_v55 = vadd.f32 1.0, %v2878_v36 }
 0xe7b   :  { %2879 = vrcp.f32 %v1143_v55  ;;  %v1155_v20 = vand.u32 2147483648, %v1143_v55  ;;  %vm1149_vm5 = vweird.f32 %v1143_v55  ;;  %v1153_v50 = vand.u32 2147483647, %v1143_v55 }
 0xe7d   :  { %v1156_v22 = vor.u32 1.1754944e-38, %v1155_v20  ;;  %vm1154_vm7 = vcmp.eq.f32.partialorder %v1153_v50, 8.507059e+37 }
 0xe81   :  { %v2880_v56 = vpop.eup %2879 }
 0xe82   :  { %v1145_v4 = vmul.f32 %v2880_v56, %v1143_v55  ;;  %vm1150_vm4 = vweird.f32 %v2880_v56 }
 0xe83   :  { %vm1151_vm6 = vmor %vm1149_vm5, %vm1150_vm4  ;;  %vm1378_vm5 = vcmask 523520  }
 0xe84   :  { %v1146_v5 = vsub.f32 1.0, %v1145_v4 }
 0xe85   :  { %v1003_v54 = vpop.permute.xlu1 %1002 }
 0xe86   :  { %v1005_v30 = vmul.f32 %v1003_v54, %v986_v41  ;;  %v1147_v7 = vmul.f32 %v2880_v56, %v1146_v5 }
 0xe88   :  { %1044 = vrot.lane.b32.xlu2 %v1005_v30, %s3124_s2  ;;  %v1148_v8 = vadd.f32 %v2880_v56, %v1147_v7 }
 0xe8a   :  { %v1152_v58 = vsel %vm1151_vm6, %v2880_v56, %v1148_v8  ;;  %vm1417_vm6 = vcmask 523264  }
 0xe8b   :  { %v1157_v59 = vsel %vm1154_vm7, %v1156_v22, %v1152_v58  ;;  %v160_v22 = vpop.f32.mrf.mxu0 }
 0xe8c   :  { %v1160_v26 = vmul.f32 %v1157_v59, %v3493_v10 }
 0xee2   :  { %v1045_v53 = vpop.permute.xlu2 %1044 }
 0xee3   :  { %1048 = vst.msk [vmem:[#allocation4 + $0x28] sm:$0xff] %vm232_vm9, %v1045_v53  ;;  %2715 = vmatmul.msk.f32.vlgmr.msra.gmra.mxu2 %vm232_vm9, %v1045_v53 }
 0xee9   :  { %v1163_v60 = vpop.permute.xlu0 %1162 }
 0xeea   :  { %v1165_v62 = vmul.f32 %v1163_v60, %v1157_v59  ;;  %v1327_v63 = vld [vmem:[#allocation4 + $0x28] sm:$0xff] }
 0xeeb   :  { %1335 = vst.msk [vmem:[#allocation3 + $0x28] sm:$0xff] %vm232_vm9, %v1327_v63 }
 0xeec   :  { %1167 = vrot.lane.b32.xlu1 %v1165_v62, %s3124_s2 }
 0xf5e   :  { %v1168_v0 = vpop.permute.xlu1 %1167 }
 0xf5f   :  { %v3516_v1 = vadd.f32 %v1168_v0, %v1160_v26 }
 0xf61   :  { %2881 = vtanh.f32 %v3516_v1 }
 0xf66   :  { %v1075_v29 = vpop.f32.mrf.mxu2 }
 0xf67   :  { %v2882_v33 = vpop.eup %2881  ;;  %v1078_v3 = vadd.f32 %v1075_v29, %v158_v24 }
 0xf68   :  { %1173 = vrot.lane.b32.xlu2 %v2882_v33, %s3123_s1 }
 0xf69   :  { %2883 = vtanh.f32 %v1078_v3  ;;  %v2717_v6 = vmul.f32 -1.442695, %v1078_v3 }
 0xf6b   :  { %2885 = vpow2.f32 %v2717_v6 }
 0xf6f   :  { %v2884_v34 = vpop.eup %2883 }
 0xf70   :  { %1125 = vrot.lane.b32.xlu0 %v2884_v34, %s3123_s1 }
 0xf71   :  { %v2886_v10 = vpop.eup %2885 }
 0xf72   :  { %v1106_v11 = vadd.f32 1.0, %v2886_v10 }
 0xf74   :  { %2887 = vrcp.f32 %v1106_v11  ;;  %v1118_v21 = vand.u32 2147483648, %v1106_v11  ;;  %vm1112_vm10 = vweird.f32 %v1106_v11  ;;  %v1116_v23 = vand.u32 2147483647, %v1106_v11 }
 0xf76   :  { %v1119_v12 = vor.u32 1.1754944e-38, %v1118_v21  ;;  %vm1117_vm12 = vcmp.eq.f32.partialorder %v1116_v23, 8.507059e+37  ;;  %v1409_v23 = vld [vmem:[#allocation6 + $0x70] sm:$0xff] }
 0xf77   :  { %1450 = vmatpush.msrb.mxu0 %v1409_v23 }
 0xf7a   :  { %v2888_v61 = vpop.eup %2887 }
 0xf7b   :  { %v1108_v16 = vmul.f32 %v2888_v61, %v1106_v11  ;;  %vm1113_vm8 = vweird.f32 %v2888_v61 }
 0xf7c   :  { %vm1114_vm11 = vmor %vm1112_vm10, %vm1113_vm8 }
 0xf7d   :  { %v1109_v17 = vsub.f32 1.0, %v1108_v16 }
 0xf7f   :  { %v1110_v2 = vmul.f32 %v2888_v61, %v1109_v17 }
 0xf81   :  { %v1111_v19 = vadd.f32 %v2888_v61, %v1110_v2  ;;  %v1342_v2 = vld [vmem:[#allocation5 + $0x20] sm:$0xff] }
 0xf83   :  { %v1115_v25 = vsel %vm1114_vm11, %v2888_v61, %v1111_v19  ;;  %v1344_v19 = vld [vmem:[#allocation5 + $0x30] sm:$0xff] }
 0xf84   :  { %v1120_v27 = vsel %vm1117_vm12, %v1119_v12, %v1115_v25  ;;  %v1410_v25 = vld [vmem:[#allocation6 + $0x78] sm:$0xff]  ;;  %v1407_v12 = vld [vmem:[#allocation6 + $0x60] sm:$0xff] }
 0xf85   :  { %v1123_v35 = vmul.f32 %v1120_v27, %v3504_v48  ;;  %1491 = vmatpush.msrb.mxu1 %v1410_v25  ;;  %1451 = vmatpush.msrb.mxu0 %v1407_v12 }
 0xfc2   :  { %v1174_v13 = vpop.permute.xlu2 %1173 }
 0xfc3   :  { %v1176_v14 = vmul.f32 %v1174_v13, %v1157_v59  ;;  %v161_v59 = vadd.f32 %v160_v22, %v3337_v57 }
 0xfc5   :  { %1184 = vrot.lane.b32.xlu1 %v1176_v14, %s3124_s2 }
 0xfe2   :  { %v1126_v31 = vpop.permute.xlu0 %1125 }
 0xfe3   :  { %v1128_v15 = vmul.f32 %v1126_v31, %v1120_v27  ;;  %v1405_v31 = vld [vmem:[#allocation6 + $0x50] sm:$0xff] }
 0xfe4   :  { %1452 = vmatpush.msrb.mxu0 %v1405_v31 }
 0xfe5   :  { %1130 = vrot.lane.b32.xlu2 %v1128_v15, %s3124_s2  ;;  %v1406_v15 = vld [vmem:[#allocation6 + $0x58] sm:$0xff] }
0x1037   :  { %v1185_v32 = vpop.permute.xlu1 %1184 }
0x1038   :  { %1188 = vst.msk [vmem:[#allocation5 + $0x8] sm:$0xff] %vm232_vm9, %v1185_v32  ;;  %2720 = vmatmul.msk.f32.vlgmr.msrb.gmra.mxu3 %vm232_vm9, %v1185_v32  ;;  %v3551_v32 = vld [vmem:[#allocation8 + $0x18] sm:$0xff] }
0x1039   :  { %1561 = vmatpush.msra.mxu2 %v3551_v32 }
0x103f   :  { %v1131_v37 = vpop.permute.xlu2 %1130  ;;  %v1339_v17 = vld [vmem:[#allocation5 + $0x8] sm:$0xff] }
0x1040   :  { %v3527_v38 = vadd.f32 %v1131_v37, %v1123_v35  ;;  %v3553_v35 = vld [vmem:[#allocation8 + $0x10] sm:$0xff]  ;;  %v1403_v37 = vld [vmem:[#allocation6 + $0x40] sm:$0xff] }
0x1041   :  { %1562 = vmatpush.msra.mxu2 %v3553_v35  ;;  %1453 = vmatpush.msrb.mxu0 %v1403_v37 }
0x1042   :  { %2889 = vtanh.f32 %v3527_v38 }
0x1048   :  { %v2890_v40 = vpop.eup %2889 }
0x1049   :  { %1136 = vrot.lane.b32.xlu0 %v2890_v40, %s3123_s1  ;;  %v1404_v40 = vld [vmem:[#allocation6 + $0x48] sm:$0xff] }
0x10bb   :  { %v1233_v41 = vpop.f32.mrf.mxu3  ;;  %v1137_v42 = vpop.permute.xlu0 %1136 }
0x10bc   :  { %v1236_v43 = vadd.f32 %v1233_v41, %v3270_v18  ;;  %v1139_v44 = vmul.f32 %v1137_v42, %v1120_v27  ;;  %v1408_v27 = vld [vmem:[#allocation6 + $0x68] sm:$0xff] }
0x10bd   :  { %1492 = vmatpush.msrb.mxu1 %v1408_v27 }
0x10be   :  { %2891 = vtanh.f32 %v1236_v43  ;;  %1178 = vrot.lane.b32.xlu1 %v1139_v44, %s3124_s2  ;;  %v2722_v47 = vmul.f32 -1.442695, %v1236_v43 }
0x10bf   :  { %1493 = vmatpush.msrb.mxu1 %v1406_v15 }
0x10c0   :  { %2893 = vpow2.f32 %v2722_v47  ;;  %v1340_v47 = vld [vmem:[#allocation5 + $0x10] sm:$0xff] }
0x10c1   :  { %1494 = vmatpush.msrb.mxu1 %v1404_v40 }
0x10c4   :  { %v2892_v46 = vpop.eup %2891 }
0x10c5   :  { %1296 = vrot.lane.b32.xlu2 %v2892_v46, %s3123_s1 }
0x10c6   :  { %v2894_v48 = vpop.eup %2893 }
0x10c7   :  { %v1277_v49 = vadd.f32 1.0, %v2894_v48 }
0x10c9   :  { %2895 = vrcp.f32 %v1277_v49  ;;  %v1289_v45 = vand.u32 2147483648, %v1277_v49  ;;  %vm1283_vm14 = vweird.f32 %v1277_v49  ;;  %v1287_v18 = vand.u32 2147483647, %v1277_v49 }
0x10cb   :  { %v1290_v55 = vor.u32 1.1754944e-38, %v1289_v45  ;;  %vm1288_vm0 = vcmp.eq.f32.partialorder %v1287_v18, 8.507059e+37  ;;  %v3568_v45 = vld [vmem:[#allocation8 + $0x8] sm:$0xff]  ;;  %v1399_v18 = vld [vmem:[#allocation6 + $0x20] sm:$0xff] }
0x10cc   :  { %1563 = vmatpush.msra.mxu2 %v3568_v45 }
0x10cf   :  { %v2896_v51 = vpop.eup %2895 }
0x10d0   :  { %v1279_v39 = vmul.f32 %v2896_v51, %v1277_v49  ;;  %vm1284_vm13 = vweird.f32 %v2896_v51  ;;  %v1343_v49 = vld [vmem:[#allocation5 + $0x28] sm:$0xff] }
0x10d1   :  { %vm1285_vm15 = vmor %vm1283_vm14, %vm1284_vm13 }
0x10d2   :  { %v1280_v52 = vsub.f32 1.0, %v1279_v39 }
0x10d4   :  { %v1281_v54 = vmul.f32 %v2896_v51, %v1280_v52  ;;  %v1345_v52 = vld [vmem:[#allocation5 + $0x38] sm:$0xff] }
0x10d6   :  { %v1282_v30 = vadd.f32 %v2896_v51, %v1281_v54  ;;  %v1401_v54 = vld [vmem:[#allocation6 + $0x30] sm:$0xff] }
0x10d7   :  { %1454 = vmatpush.msrb.mxu0 %v1401_v54 }
0x10d8   :  { %v1286_v36 = vsel %vm1285_vm15, %v2896_v51, %v1282_v30  ;;  %v1341_v51 = vld [vmem:[#allocation5 + $0x18] sm:$0xff] }
0x10d9   :  { %v1291_v56 = vsel %vm1288_vm0, %v1290_v55, %v1286_v36  ;;  %v1402_v30 = vld [vmem:[#allocation6 + $0x38] sm:$0xff]  ;;  %v1400_v36 = vld [vmem:[#allocation6 + $0x28] sm:$0xff]  ;;  %v3570_v55 = vld [vmem:[#allocation8] sm:$0xff]  ;;  %1455 = vmatpush.msrb.mxu0 %v1399_v18 }
0x10da   :  { %v1294_v8 = vmul.f32 %v1291_v56, %v3516_v1  ;;  %1495 = vmatpush.msrb.mxu1 %v1402_v30  ;;  %1564 = vmatpush.msra.mxu2 %v3570_v55 }
0x10dc   :  { %1496 = vmatpush.msrb.mxu1 %v1400_v36 }
0x111f   :  { %v1297_v4 = vpop.permute.xlu2 %1296 }
0x1120   :  { %v1299_v5 = vmul.f32 %v1297_v4, %v1291_v56  ;;  %v1398_v4 = vld [vmem:[#allocation6 + $0x18] sm:$0xff] }
0x1121   :  { %1497 = vmatpush.msrb.mxu1 %v1398_v4 }
0x1122   :  { %1301 = vrot.lane.b32.xlu0 %v1299_v5, %s3124_s2  ;;  %v1395_v5 = vld [vmem:[#allocation6] sm:$0xff] }
0x1130   :  { %v1179_v7 = vpop.permute.xlu1 %1178 }
0x1131   :  { %1182 = vst.msk [vmem:[#allocation4 + $0x30] sm:$0xff] %vm232_vm9, %v1179_v7  ;;  %2719 = vmatmul.msk.f32.vlgmr.msrb.gmra.mxu2 %vm232_vm9, %v1179_v7  ;;  %v1396_v7 = vld [vmem:[#allocation6 + $0x8] sm:$0xff] }
0x1132   :  { %1691 = vmatpush.msrb.mxu2 %v3551_v32  ;;  %1498 = vmatpush.msrb.mxu1 %v1396_v7 }
0x1134   :  { %1692 = vmatpush.msrb.mxu2 %v3553_v35 }
0x1136   :  { %1693 = vmatpush.msrb.mxu2 %v3568_v45 }
0x1138   :  { %v1328_v53 = vld [vmem:[#allocation4 + $0x30] sm:$0xff]  ;;  %1694 = vmatpush.msrb.mxu2 %v3570_v55 }
0x1139   :  { %1336 = vst.msk [vmem:[#allocation3 + $0x30] sm:$0xff] %vm232_vm9, %v1328_v53  ;;  %1565 = vmatmul.f32.vlgmr.msra.gmra.mxu2 %v3122_v9 }
0x113a   :  { %1823 = vmatpush.msra.mxu2 %v3551_v32 }
0x113c   :  { %1824 = vmatpush.msra.mxu2 %v3553_v35 }
0x113e   :  { %1825 = vmatpush.msra.mxu2 %v3568_v45 }
0x1140   :  { %1826 = vmatpush.msra.mxu2 %v3570_v55 }
0x1194   :  { %v1302_v20 = vpop.permute.xlu0 %1301 }
0x1195   :  { %v1304_v50 = vadd.f32 %v1302_v20, %v1294_v8 }
0x1197   :  { %2897 = vtanh.f32 %v1304_v50 }
0x119d   :  { %v2898_v58 = vpop.eup %2897 }
0x119e   :  { %1307 = vrot.lane.b32.xlu1 %v2898_v58, %s3123_s1 }
0x11b4   :  { %v1209_v60 = vpop.f32.mrf.mxu2 }
0x11b5   :  { %v1212_v62 = vadd.f32 %v1209_v60, %v161_v59 }
0x11b7   :  { %2899 = vtanh.f32 %v1212_v62  ;;  %v2721_v26 = vmul.f32 -1.442695, %v1212_v62 }
0x11b9   :  { %2901 = vpow2.f32 %v2721_v26 }
0x11bd   :  { %v2900_v63 = vpop.eup %2899 }
0x11be   :  { %1259 = vrot.lane.b32.xlu2 %v2900_v63, %s3123_s1 }
0x11bf   :  { %v2902_v0 = vpop.eup %2901 }
0x11c0   :  { %v1240_v28 = vadd.f32 1.0, %v2902_v0 }
0x11c2   :  { %2903 = vrcp.f32 %v1240_v28  ;;  %v1252_v57 = vand.u32 2147483648, %v1240_v28  ;;  %vm1246_vm2 = vweird.f32 %v1240_v28  ;;  %v1250_v10 = vand.u32 2147483647, %v1240_v28 }
0x11c4   :  { %v1253_v13 = vor.u32 1.1754944e-38, %v1252_v57  ;;  %vm1251_vm4 = vcmp.eq.f32.partialorder %v1250_v10, 8.507059e+37  ;;  %v1566_v57 = vpop.f32.mrf.mxu2 }
0x11c8   :  { %v2904_v1 = vpop.eup %2903 }
0x11c9   :  { %v1242_v24 = vmul.f32 %v2904_v1, %v1240_v28  ;;  %vm1247_vm1 = vweird.f32 %v2904_v1 }
0x11ca   :  { %vm1248_vm3 = vmor %vm1246_vm2, %vm1247_vm1 }
0x11cb   :  { %v1243_v29 = vsub.f32 1.0, %v1242_v24  ;;  %v3606_v24 = vld [vmem:[#allocation10 + $0x10] sm:$0xff] }
0x11cd   :  { %v1244_v33 = vmul.f32 %v2904_v1, %v1243_v29  ;;  %v1411_v29 = vld [vmem:[%s3939_s8] sm:$0x3] }
0x11cf   :  { %v1245_v6 = vadd.f32 %v2904_v1, %v1244_v33  ;;  %v3612_v33 = vld [vmem:[#allocation10 + $0x8] sm:$0xff] }
0x11d1   :  { %v1249_v11 = vsel %vm1248_vm3, %v2904_v1, %v1245_v6  ;;  %v3603_v1 = vld [vmem:[#allocation10 + $0x18] sm:$0xff] }
0x11d2   :  { %v3543_v14 = vsel %vm1251_vm4, %v1253_v13, %v1249_v11  ;;  %1583 = vmatpush.msra.mxu3 %v3603_v1 }
0x11d3   :  { %v1257_v41 = vmul.f32 %v3543_v14, %v3527_v38 }
0x11d4   :  { %1584 = vmatpush.msra.mxu3 %v3606_v24 }
0x11d6   :  { %1585 = vmatpush.msra.mxu3 %v3612_v33 }
0x1210   :  { %v1308_v3 = vpop.permute.xlu1 %1307 }
0x1211   :  { %v1310_v34 = vmul.f32 %v1308_v3, %v1291_v56  ;;  %v1397_v56 = vld [vmem:[#allocation6 + $0x10] sm:$0xff]  ;;  %v3614_v3 = vld [vmem:[#allocation10] sm:$0xff] }
0x1212   :  { %1456 = vmatpush.msrb.mxu0 %v1397_v56  ;;  %1586 = vmatpush.msra.mxu3 %v3614_v3 }
0x1213   :  { %1318 = vrot.lane.b32.xlu0 %v1310_v34, %s3124_s2  ;;  %v3617_v34 = vperm.slane %v1411_v29, 0  ;;  %1587 = vmatmul.f32.vlgmr.msra.gmra.mxu3 %v3122_v9 }
0x1214   :  { %1457 = vmatpush.msrb.mxu0 %v1395_v5  ;;  %1715 = vmatpush.msrb.mxu3 %v3603_v1 }
0x1216   :  { %1716 = vmatpush.msrb.mxu3 %v3606_v24 }
0x1218   :  { %v1260_v61 = vpop.permute.xlu2 %1259  ;;  %1717 = vmatpush.msrb.mxu3 %v3612_v33 }
0x1219   :  { %v1262_v16 = vmul.f32 %v1260_v61, %v3543_v14 }
0x121a   :  { %1718 = vmatpush.msrb.mxu3 %v3614_v3 }
0x121b   :  { %1264 = vrot.lane.b32.xlu1 %v1262_v16, %s3124_s2 }
0x121c   :  { %1847 = vmatpush.msra.mxu3 %v3603_v1 }
0x121e   :  { %1848 = vmatpush.msra.mxu3 %v3606_v24 }
0x1220   :  { %1849 = vmatpush.msra.mxu3 %v3612_v33 }
0x1222   :  { %1850 = vmatpush.msra.mxu3 %v3614_v3 }
0x1223   :  { %1356 = vrot.lane.b32.xlu1 %v1339_v17, %s3124_s2 }
0x122b   :  { %1362 = vrot.lane.b32.xlu1 %v1342_v2, %s3124_s2 }
0x1233   :  { %1366 = vrot.lane.b32.xlu1 %v1344_v19, %s3124_s2 }
0x1285   :  { %v1319_v21 = vpop.permute.xlu0 %1318 }
0x1286   :  { %1321 = vst.msk [vmem:[#allocation5] sm:$0xff] %vm232_vm9, %v1319_v21 }
0x128d   :  { %v1265_v42 = vpop.permute.xlu1 %1264  ;;  %v1338_v43 = vld [vmem:[#allocation5] sm:$0xff] }
0x128e   :  { %v1267_v44 = vadd.f32 %v1265_v42, %v1257_v41  ;;  %1354 = vrot.lane.b32.xlu2 %v1338_v43, %s3124_s2  ;;  %v3650_v41 = vperm.slane %v1411_v29, 1 }
0x1290   :  { %2905 = vtanh.f32 %v1267_v44 }
0x1295   :  { %v1357_v46 = vpop.permute.xlu1 %1356 }
0x1296   :  { %v2906_v48 = vpop.eup %2905  ;;  %1380 = vst.msk [vmem:[#allocation3 + $0x8] sm:$0xff] %vm1378_vm5, %v1357_v46  ;;  %1358 = vrot.lane.b32.xlu2 %v1340_v47, %s3124_s2  ;;  %v1588_v43 = vpop.f32.mrf.mxu3 }
0x1297   :  { %1270 = vrot.lane.b32.xlu0 %v2906_v48, %s3123_s1 }
0x129d   :  { %v1363_v38 = vpop.permute.xlu1 %1362  ;;  %v1388_v58 = vld [vmem:[#allocation3 + $0x8] sm:$0xff] }
0x129e   :  { %1383 = vst.msk [vmem:[#allocation3 + $0x20] sm:$0xff] %vm1378_vm5, %v1363_v38  ;;  %1364 = vrot.lane.b32.xlu2 %v1343_v49, %s3124_s2 }
0x129f   :  { %1360 = vrot.lane.b32.xlu0 %v1341_v51, %s3124_s2 }
0x12a5   :  { %v1367_v39 = vpop.permute.xlu1 %1366  ;;  %v1391_v26 = vld [vmem:[#allocation3 + $0x20] sm:$0xff] }
0x12a6   :  { %1385 = vst.msk [vmem:[#allocation3 + $0x30] sm:$0xff] %vm1378_vm5, %v1367_v39  ;;  %1368 = vrot.lane.b32.xlu2 %v1345_v52, %s3124_s2 }
0x12ad   :  { %v1393_v28 = vld [vmem:[#allocation3 + $0x30] sm:$0xff] }
0x12e8   :  { %v1355_v53 = vpop.permute.xlu2 %1354 }
0x12e9   :  { %1379 = vst.msk [vmem:[#allocation3] sm:$0xff] %vm1378_vm5, %v1355_v53 }
0x12f0   :  { %v1359_v8 = vpop.permute.xlu2 %1358  ;;  %v1387_v20 = vld [vmem:[#allocation3] sm:$0xff] }
0x12f1   :  { %1381 = vst.msk [vmem:[#allocation3 + $0x10] sm:$0xff] %vm1378_vm5, %v1359_v8  ;;  %2723 = vmatmul.msk.f32.vlgmr.msrb.gmra.mxu0 %vm1417_vm6, %v1387_v20  ;;  %2731 = vmatmul.msk.f32.vlgmr.msrb.gmra.mxu1 %vm1417_vm6, %v1387_v20 }
0x12f8   :  { %v1365_v50 = vpop.permute.xlu2 %1364  ;;  %v1389_v22 = vld [vmem:[#allocation3 + $0x10] sm:$0xff] }
0x12f9   :  { %1384 = vst.msk [vmem:[#allocation3 + $0x28] sm:$0xff] %vm1378_vm5, %v1365_v50  ;;  %2724 = vmatmul.msk.f32.gmra.mxu0 %vm1417_vm6, %v1388_v58  ;;  %2732 = vmatmul.msk.f32.gmra.mxu1 %vm1417_vm6, %v1388_v58 }
0x1300   :  { %v1392_v0 = vld [vmem:[#allocation3 + $0x28] sm:$0xff]  ;;  %v1369_v61 = vpop.permute.xlu2 %1368 }
0x1301   :  { %2725 = vmatmul.msk.f32.gmra.mxu0 %vm1417_vm6, %v1389_v22  ;;  %2733 = vmatmul.msk.f32.gmra.mxu1 %vm1417_vm6, %v1389_v22 }
0x1309   :  { %v1271_v59 = vpop.permute.xlu0 %1270 }
0x130a   :  { %v1273_v60 = vmul.f32 %v1271_v59, %v3543_v14 }
0x130c   :  { %1312 = vrot.lane.b32.xlu0 %v1273_v60, %s3124_s2 }
0x1311   :  { %v1361_v62 = vpop.permute.xlu0 %1360 }
0x1312   :  { %1382 = vst.msk [vmem:[#allocation3 + $0x18] sm:$0xff] %vm1378_vm5, %v1361_v62 }
0x1319   :  { %v1390_v63 = vld [vmem:[#allocation3 + $0x18] sm:$0xff] }
0x131a   :  { %2726 = vmatmul.msk.f32.gmra.mxu0 %vm1417_vm6, %v1390_v63  ;;  %2734 = vmatmul.msk.f32.gmra.mxu1 %vm1417_vm6, %v1390_v63 }
0x1322   :  { %2727 = vmatmul.msk.f32.gmra.mxu0 %vm1417_vm6, %v1391_v26  ;;  %2735 = vmatmul.msk.f32.gmra.mxu1 %vm1417_vm6, %v1391_v26 }
0x132a   :  { %2728 = vmatmul.msk.f32.gmra.mxu0 %vm1417_vm6, %v1392_v0  ;;  %2736 = vmatmul.msk.f32.gmra.mxu1 %vm1417_vm6, %v1392_v0 }
0x1332   :  { %2729 = vmatmul.msk.f32.gmra.mxu0 %vm1417_vm6, %v1393_v28  ;;  %2737 = vmatmul.msk.f32.gmra.mxu1 %vm1417_vm6, %v1393_v28 }
0x136e   :  { %v1459_v6 = vpop.f32.mrf.mxu0  ;;  %v3636_v17 = vpop.f32.mrf.mxu1 }
0x136f   :  { %v1460_v10 = vadd.f32 %v1459_v6, %v3617_v34 }
0x1371   :  { %v1569_v11 = vadd.f32 %v1566_v57, %v1460_v10 }
0x1373   :  { %2907 = vtanh.f32 %v1569_v11  ;;  %v2739_v23 = vmul.f32 -1.442695, %v1569_v11 }
0x1375   :  { %2909 = vpow2.f32 %v2739_v23 }
0x1376   :  { %v3638_v2 = vpop.f32.mrf.mxu1 }
0x1379   :  { %v2908_v13 = vpop.eup %2907 }
0x137a   :  { %1614 = vrot.lane.b32.xlu1 %v2908_v13, %s3123_s1 }
0x137b   :  { %v2910_v12 = vpop.eup %2909 }
0x137c   :  { %v1595_v31 = vadd.f32 1.0, %v2910_v12 }
0x137e   :  { %v1313_v9 = vpop.permute.xlu0 %1312  ;;  %v3640_v19 = vpop.f32.mrf.mxu1  ;;  %2911 = vrcp.f32 %v1595_v31  ;;  %v1607_v51 = vand.u32 2147483648, %v1595_v31  ;;  %vm1601_vm8 = vweird.f32 %v1595_v31  ;;  %v1605_v39 = vand.u32 2147483647, %v1595_v31 }
0x137f   :  { %1316 = vst.msk [vmem:[#allocation4 + $0x38] sm:$0xff] %vm232_vm9, %v1313_v9 }
0x1380   :  { %v1608_v30 = vor.u32 1.1754944e-38, %v1607_v51  ;;  %vm1606_vm11 = vcmp.eq.f32.partialorder %v1605_v39, 8.507059e+37 }
0x1384   :  { %v2912_v37 = vpop.eup %2911 }
0x1385   :  { %v1597_v40 = vmul.f32 %v2912_v37, %v1595_v31  ;;  %vm1602_vm7 = vweird.f32 %v2912_v37 }
0x1386   :  { %v1329_v14 = vld [vmem:[#allocation4 + $0x38] sm:$0xff]  ;;  %vm1603_vm10 = vmor %vm1601_vm8, %vm1602_vm7 }
0x1387   :  { %1337 = vst.msk [vmem:[#allocation3 + $0x38] sm:$0xff] %vm232_vm9, %v1329_v14  ;;  %v1598_v46 = vsub.f32 1.0, %v1597_v40 }
0x1388   :  { %1386 = vst.msk [vmem:[#allocation3 + $0x38] sm:$0xff] %vm1378_vm5, %v1369_v61 }
0x1389   :  { %v1599_v48 = vmul.f32 %v2912_v37, %v1598_v46 }
0x138b   :  { %v1600_v38 = vadd.f32 %v2912_v37, %v1599_v48 }
0x138d   :  { %v1604_v52 = vsel %vm1603_vm10, %v2912_v37, %v1600_v38  ;;  %v1462_v37 = vpop.f32.mrf.mxu0 }
0x138e   :  { %v1609_v18 = vsel %vm1606_vm11, %v1608_v30, %v1604_v52  ;;  %v1463_v40 = vadd.f32 %v1462_v37, %v3617_v34 }
0x138f   :  { %v1394_v16 = vld [vmem:[#allocation3 + $0x38] sm:$0xff]  ;;  %v1612_v0 = vmul.f32 0.0, %v1609_v18 }
0x1390   :  { %2730 = vmatmul.msk.f32.gmra.mxu0 %vm1417_vm6, %v1394_v16  ;;  %2738 = vmatmul.msk.f32.gmra.mxu1 %vm1417_vm6, %v1394_v16 }
0x1397   :  { %v3642_v21 = vpop.f32.mrf.mxu1 }
0x139f   :  { %v3644_v25 = vpop.f32.mrf.mxu1 }
0x13a7   :  { %v3646_v27 = vpop.f32.mrf.mxu1 }
0x13af   :  { %v3648_v15 = vpop.f32.mrf.mxu1 }
0x13b0   :  { %v1519_v51 = vadd.f32 %v3648_v15, %v3650_v41 }
0x13ec   :  { %v1615_v54 = vpop.permute.xlu1 %1614 }
0x13ed   :  { %v1617_v36 = vmul.f32 %v1615_v54, %v1609_v18 }
0x140d   :  { %v1521_v42 = vpop.f32.mrf.mxu1 }
0x140e   :  { %v1522_v44 = vadd.f32 %v1521_v42, %v3650_v41 }
0x1410   :  { %v1591_v47 = vadd.f32 %v1588_v43, %v1522_v44 }
0x1412   :  { %2913 = vtanh.f32 %v1591_v47  ;;  %v2740_v56 = vmul.f32 -1.442695, %v1591_v47 }
0x1414   :  { %2915 = vpow2.f32 %v2740_v56 }
0x1418   :  { %v2914_v49 = vpop.eup %2913 }
0x1419   :  { %1651 = vrot.lane.b32.xlu0 %v2914_v49, %s3123_s1 }
0x141a   :  { %v2916_v4 = vpop.eup %2915 }
0x141b   :  { %v1632_v5 = vadd.f32 1.0, %v2916_v4 }
0x141d   :  { %2917 = vrcp.f32 %v1632_v5  ;;  %v1644_v58 = vand.u32 2147483648, %v1632_v5  ;;  %vm1638_vm13 = vweird.f32 %v1632_v5  ;;  %v1642_v22 = vand.u32 2147483647, %v1632_v5 }
0x141f   :  { %v1645_v60 = vor.u32 1.1754944e-38, %v1644_v58  ;;  %vm1643_vm15 = vcmp.eq.f32.partialorder %v1642_v22, 8.507059e+37 }
0x1421   :  { %1619 = vrot.lane.b32.xlu0 %v1617_v36, %s3124_s2 }
0x1423   :  { %v2918_v7 = vpop.eup %2917 }
0x1424   :  { %v1634_v53 = vmul.f32 %v2918_v7, %v1632_v5  ;;  %vm1639_vm12 = vweird.f32 %v2918_v7 }
0x1425   :  { %vm1640_vm14 = vmor %vm1638_vm13, %vm1639_vm12 }
0x1426   :  { %v1635_v8 = vsub.f32 1.0, %v1634_v53 }
0x1428   :  { %v1636_v20 = vmul.f32 %v2918_v7, %v1635_v8 }
0x142a   :  { %v1637_v50 = vadd.f32 %v2918_v7, %v1636_v20 }
0x142c   :  { %v1641_v59 = vsel %vm1640_vm14, %v2918_v7, %v1637_v50 }
0x142d   :  { %v1646_v63 = vsel %vm1643_vm15, %v1645_v60, %v1641_v59 }
0x142e   :  { %v1649_v57 = vmul.f32 0.0, %v1646_v63 }
0x148b   :  { %v1652_v62 = vpop.permute.xlu0 %1651 }
0x148c   :  { %v1654_v26 = vmul.f32 %v1652_v62, %v1646_v63 }
0x148e   :  { %1656 = vrot.lane.b32.xlu2 %v1654_v26, %s3124_s2 }
0x1493   :  { %v1620_v28 = vpop.permute.xlu0 %1619 }
0x1494   :  { %v3656_v29 = vadd.f32 %v1620_v28, %v1612_v0 }
0x1496   :  { %2919 = vtanh.f32 %v3656_v29 }
0x149c   :  { %v2920_v6 = vpop.eup %2919 }
0x149d   :  { %1625 = vrot.lane.b32.xlu2 %v2920_v6, %s3123_s1 }
0x14e8   :  { %v1657_v10 = vpop.permute.xlu2 %1656 }
0x14e9   :  { %v3660_v11 = vadd.f32 %v1657_v10, %v1649_v57 }
0x14eb   :  { %2921 = vtanh.f32 %v3660_v11 }
0x14f1   :  { %v2922_v13 = vpop.eup %2921 }
0x14f2   :  { %1662 = vrot.lane.b32.xlu1 %v2922_v13, %s3123_s1 }
0x14f7   :  { %v1626_v9 = vpop.permute.xlu2 %1625 }
0x14f8   :  { %v1628_v14 = vmul.f32 %v1626_v9, %v1609_v18 }
0x14fa   :  { %1667 = vrot.lane.b32.xlu1 %v1628_v14, %s3124_s2 }
0x1564   :  { %v1663_v61 = vpop.permute.xlu1 %1662 }
0x1565   :  { %v1665_v16 = vmul.f32 %v1663_v61, %v1646_v63 }
0x1567   :  { %1672 = vrot.lane.b32.xlu0 %v1665_v16, %s3124_s2 }
0x156c   :  { %v1668_v23 = vpop.permute.xlu1 %1667 }
0x156d   :  { %1670 = vst.msk [vmem:[#allocation4] sm:$0xff] %vm232_vm9, %v1668_v23  ;;  %2741 = vmatmul.msk.f32.vlgmr.msrb.gmra.mxu2 %vm232_vm9, %v1668_v23 }
0x156e   :  { %1955 = vmatpush.msrb.mxu2 %v3551_v32 }
0x1570   :  { %1956 = vmatpush.msrb.mxu2 %v3553_v35 }
0x1572   :  { %1957 = vmatpush.msrb.mxu2 %v3568_v45 }
0x1574   :  { %1958 = vmatpush.msrb.mxu2 %v3570_v55  ;;  %v2600_v12 = vld [vmem:[#allocation4] sm:$0xff] }
0x1575   :  { %2608 = vst.msk [vmem:[%s3940_s9] sm:$0xff] %vm232_vm9, %v2600_v12 }
0x15d9   :  { %v1673_v31 = vpop.permute.xlu0 %1672 }
0x15da   :  { %1675 = vst.msk [vmem:[#allocation5 + $0x38] sm:$0xff] %vm232_vm9, %v1673_v31  ;;  %2742 = vmatmul.msk.f32.vlgmr.msrb.gmra.mxu3 %vm232_vm9, %v1673_v31 }
0x15db   :  { %1979 = vmatpush.msrb.mxu3 %v3603_v1 }
0x15dd   :  { %1980 = vmatpush.msrb.mxu3 %v3606_v24 }
0x15df   :  { %1981 = vmatpush.msrb.mxu3 %v3612_v33 }
0x15e1   :  { %1982 = vmatpush.msrb.mxu3 %v3614_v3 }
0x15f0   :  { %v1696_v42 = vpop.f32.mrf.mxu2 }
0x15f1   :  { %v1699_v43 = vadd.f32 %v1696_v42, %v1463_v40 }
0x15f3   :  { %2923 = vtanh.f32 %v1699_v43  ;;  %v2743_v46 = vmul.f32 -1.442695, %v1699_v43 }
0x15f5   :  { %2925 = vpow2.f32 %v2743_v46 }
0x15f9   :  { %v2924_v44 = vpop.eup %2923 }
0x15fa   :  { %1746 = vrot.lane.b32.xlu0 %v2924_v44, %s3123_s1 }
0x15fb   :  { %v2926_v47 = vpop.eup %2925 }
0x15fc   :  { %v1727_v48 = vadd.f32 1.0, %v2926_v47  ;;  %v1465_v47 = vpop.f32.mrf.mxu0 }
0x15fe   :  { %2927 = vrcp.f32 %v1727_v48  ;;  %v1739_v56 = vand.u32 2147483648, %v1727_v48  ;;  %vm1733_vm1 = vweird.f32 %v1727_v48  ;;  %v1737_v4 = vand.u32 2147483647, %v1727_v48 }
0x1600   :  { %v1740_v7 = vor.u32 1.1754944e-38, %v1739_v56  ;;  %vm1738_vm3 = vcmp.eq.f32.partialorder %v1737_v4, 8.507059e+37 }
0x1604   :  { %v2928_v38 = vpop.eup %2927 }
0x1605   :  { %v1729_v49 = vmul.f32 %v2928_v38, %v1727_v48  ;;  %vm1734_vm0 = vweird.f32 %v2928_v38  ;;  %v1466_v48 = vadd.f32 %v1465_v47, %v3617_v34 }
0x1606   :  { %vm1735_vm2 = vmor %vm1733_vm1, %vm1734_vm0 }
0x1607   :  { %v1730_v52 = vsub.f32 1.0, %v1729_v49 }
0x1609   :  { %v1731_v30 = vmul.f32 %v2928_v38, %v1730_v52 }
0x160b   :  { %v1732_v18 = vadd.f32 %v2928_v38, %v1731_v30 }
0x160d   :  { %v1736_v5 = vsel %vm1735_vm2, %v2928_v38, %v1732_v18 }
0x160e   :  { %v1741_v8 = vsel %vm1738_vm3, %v1740_v7, %v1736_v5 }
0x160f   :  { %v1744_v9 = vmul.f32 %v1741_v8, %v3656_v29 }
0x165d   :  { %v1720_v39 = vpop.f32.mrf.mxu3 }
0x165e   :  { %v1723_v54 = vadd.f32 %v1720_v39, %v1519_v51 }
0x1660   :  { %2929 = vtanh.f32 %v1723_v54  ;;  %v2744_v20 = vmul.f32 -1.442695, %v1723_v54 }
0x1662   :  { %2931 = vpow2.f32 %v2744_v20 }
0x1666   :  { %v2930_v36 = vpop.eup %2929 }
0x1667   :  { %1783 = vrot.lane.b32.xlu2 %v2930_v36, %s3123_s1  ;;  %v1516_v36 = vadd.f32 %v3646_v27, %v3650_v41 }
0x1668   :  { %v2932_v50 = vpop.eup %2931 }
0x1669   :  { %v1764_v58 = vadd.f32 1.0, %v2932_v50 }
0x166b   :  { %2933 = vrcp.f32 %v1764_v58  ;;  %v1776_v26 = vand.u32 2147483648, %v1764_v58  ;;  %vm1770_vm6 = vweird.f32 %v1764_v58  ;;  %v1774_v0 = vand.u32 2147483647, %v1764_v58 }
0x166c   :  { %v1747_v53 = vpop.permute.xlu0 %1746 }
0x166d   :  { %v1749_v15 = vmul.f32 %v1747_v53, %v1741_v8  ;;  %v1777_v6 = vor.u32 1.1754944e-38, %v1776_v26  ;;  %vm1775_vm8 = vcmp.eq.f32.partialorder %v1774_v0, 8.507059e+37 }
0x166f   :  { %1751 = vrot.lane.b32.xlu2 %v1749_v15, %s3124_s2 }
0x1671   :  { %v2934_v22 = vpop.eup %2933 }
0x1672   :  { %v1766_v59 = vmul.f32 %v2934_v22, %v1764_v58  ;;  %vm1771_vm4 = vweird.f32 %v2934_v22 }
0x1673   :  { %vm1772_vm7 = vmor %vm1770_vm6, %vm1771_vm4 }
0x1674   :  { %v1767_v60 = vsub.f32 1.0, %v1766_v59 }
0x1676   :  { %v1768_v62 = vmul.f32 %v2934_v22, %v1767_v60 }
0x1678   :  { %v1769_v63 = vadd.f32 %v2934_v22, %v1768_v62 }
0x167a   :  { %v1773_v28 = vsel %vm1772_vm7, %v2934_v22, %v1769_v63 }
0x167b   :  { %v1778_v10 = vsel %vm1775_vm8, %v1777_v6, %v1773_v28 }
0x167c   :  { %v1781_v23 = vmul.f32 %v1778_v10, %v3660_v11 }
0x16c1   :  { %v1784_v57 = vpop.permute.xlu2 %1783 }
0x16c2   :  { %v1786_v13 = vmul.f32 %v1784_v57, %v1778_v10 }
0x16c4   :  { %1788 = vrot.lane.b32.xlu1 %v1786_v13, %s3124_s2 }
0x16c9   :  { %v1752_v14 = vpop.permute.xlu2 %1751 }
0x16ca   :  { %v3690_v61 = vadd.f32 %v1752_v14, %v1744_v9 }
0x16cc   :  { %2935 = vtanh.f32 %v3690_v61 }
0x16d2   :  { %v2936_v16 = vpop.eup %2935 }
0x16d3   :  { %1757 = vrot.lane.b32.xlu1 %v2936_v16, %s3123_s1 }
0x1736   :  { %v1789_v12 = vpop.permute.xlu1 %1788 }
0x1737   :  { %v3695_v31 = vadd.f32 %v1789_v12, %v1781_v23 }
0x1739   :  { %2937 = vtanh.f32 %v3695_v31 }
0x173f   :  { %v2938_v37 = vpop.eup %2937 }
0x1740   :  { %1794 = vrot.lane.b32.xlu0 %v2938_v37, %s3123_s1 }
0x1745   :  { %v1758_v40 = vpop.permute.xlu1 %1757 }
0x1746   :  { %v1760_v29 = vmul.f32 %v1758_v40, %v1741_v8 }
0x1748   :  { %1799 = vrot.lane.b32.xlu0 %v1760_v29, %s3124_s2 }
0x17b2   :  { %v1795_v42 = vpop.permute.xlu0 %1794 }
0x17b3   :  { %v1797_v43 = vmul.f32 %v1795_v42, %v1778_v10 }
0x17b5   :  { %1804 = vrot.lane.b32.xlu2 %v1797_v43, %s3124_s2 }
0x17ba   :  { %v1800_v44 = vpop.permute.xlu0 %1799 }
0x17bb   :  { %1802 = vst.msk [vmem:[#allocation4 + $0x8] sm:$0xff] %vm232_vm9, %v1800_v44  ;;  %2745 = vmatmul.msk.f32.vlgmr.msra.gmra.mxu2 %vm232_vm9, %v1800_v44 }
0x17bc   :  { %2087 = vmatpush.msra.mxu2 %v3551_v32 }
0x17be   :  { %2088 = vmatpush.msra.mxu2 %v3553_v35 }
0x17c0   :  { %2089 = vmatpush.msra.mxu2 %v3568_v45 }
0x17c2   :  { %2090 = vmatpush.msra.mxu2 %v3570_v55  ;;  %v2601_v11 = vld [vmem:[#allocation4 + $0x8] sm:$0xff] }
0x17c3   :  { %2609 = vst.msk [vmem:[%s3940_s9 + $0x8] sm:$0xff] %vm232_vm9, %v2601_v11 }
0x180f   :  { %v1805_v46 = vpop.permute.xlu2 %1804 }
0x1810   :  { %1807 = vst.msk [vmem:[#allocation5 + $0x30] sm:$0xff] %vm232_vm9, %v1805_v46  ;;  %2746 = vmatmul.msk.f32.vlgmr.msra.gmra.mxu3 %vm232_vm9, %v1805_v46 }
0x1811   :  { %2111 = vmatpush.msra.mxu3 %v3603_v1 }
0x1813   :  { %2112 = vmatpush.msra.mxu3 %v3606_v24 }
0x1815   :  { %2113 = vmatpush.msra.mxu3 %v3612_v33 }
0x1817   :  { %2114 = vmatpush.msra.mxu3 %v3614_v3 }
0x183e   :  { %v1828_v38 = vpop.f32.mrf.mxu2 }
0x183f   :  { %v1831_v49 = vadd.f32 %v1828_v38, %v1466_v48 }
0x1841   :  { %2939 = vtanh.f32 %v1831_v49  ;;  %v2747_v39 = vmul.f32 -1.442695, %v1831_v49 }
0x1843   :  { %2941 = vpow2.f32 %v2747_v39  ;;  %v1468_v39 = vpop.f32.mrf.mxu0 }
0x1847   :  { %v2940_v51 = vpop.eup %2939 }
0x1848   :  { %1878 = vrot.lane.b32.xlu2 %v2940_v51, %s3123_s1 }
0x1849   :  { %v2942_v52 = vpop.eup %2941 }
0x184a   :  { %v1859_v54 = vadd.f32 1.0, %v2942_v52  ;;  %v1469_v52 = vadd.f32 %v1468_v39, %v3617_v34 }
0x184c   :  { %2943 = vrcp.f32 %v1859_v54  ;;  %v1871_v15 = vand.u32 2147483648, %v1859_v54  ;;  %vm1865_vm11 = vweird.f32 %v1859_v54  ;;  %v1869_v20 = vand.u32 2147483647, %v1859_v54 }
0x184e   :  { %v1872_v58 = vor.u32 1.1754944e-38, %v1871_v15  ;;  %vm1870_vm13 = vcmp.eq.f32.partialorder %v1869_v20, 8.507059e+37 }
0x1852   :  { %v2944_v30 = vpop.eup %2943 }
0x1853   :  { %v1861_v18 = vmul.f32 %v2944_v30, %v1859_v54  ;;  %vm1866_vm10 = vweird.f32 %v2944_v30 }
0x1854   :  { %vm1867_vm12 = vmor %vm1865_vm11, %vm1866_vm10 }
0x1855   :  { %v1862_v4 = vsub.f32 1.0, %v1861_v18 }
0x1857   :  { %v1863_v7 = vmul.f32 %v2944_v30, %v1862_v4 }
0x1859   :  { %v1864_v53 = vadd.f32 %v2944_v30, %v1863_v7 }
0x185b   :  { %v1868_v50 = vsel %vm1867_vm12, %v2944_v30, %v1864_v53  ;;  %v1513_v53 = vadd.f32 %v3644_v25, %v3650_v41 }
0x185c   :  { %v1873_v59 = vsel %vm1870_vm13, %v1872_v58, %v1868_v50 }
0x185d   :  { %v1876_v37 = vmul.f32 %v1873_v59, %v3690_v61 }
0x1893   :  { %v1852_v56 = vpop.f32.mrf.mxu3 }
0x1894   :  { %v1855_v5 = vadd.f32 %v1852_v56, %v1516_v36 }
0x1896   :  { %2945 = vtanh.f32 %v1855_v5  ;;  %v2748_v60 = vmul.f32 -1.442695, %v1855_v5 }
0x1898   :  { %2947 = vpow2.f32 %v2748_v60 }
0x189c   :  { %v2946_v8 = vpop.eup %2945 }
0x189d   :  { %1915 = vrot.lane.b32.xlu1 %v2946_v8, %s3123_s1 }
0x189e   :  { %v2948_v62 = vpop.eup %2947 }
0x189f   :  { %v1896_v63 = vadd.f32 1.0, %v2948_v62 }
0x18a1   :  { %2949 = vrcp.f32 %v1896_v63  ;;  %v1908_v10 = vand.u32 2147483648, %v1896_v63  ;;  %vm1902_vm15 = vweird.f32 %v1896_v63  ;;  %v1906_v13 = vand.u32 2147483647, %v1896_v63 }
0x18a2   :  { %v1879_v22 = vpop.permute.xlu2 %1878 }
0x18a3   :  { %v1881_v27 = vmul.f32 %v1879_v22, %v1873_v59  ;;  %v1909_v14 = vor.u32 1.1754944e-38, %v1908_v10  ;;  %vm1907_vm1 = vcmp.eq.f32.partialorder %v1906_v13, 8.507059e+37 }
0x18a5   :  { %1883 = vrot.lane.b32.xlu1 %v1881_v27, %s3124_s2 }
0x18a7   :  { %v2950_v26 = vpop.eup %2949 }
0x18a8   :  { %v1898_v0 = vmul.f32 %v2950_v26, %v1896_v63  ;;  %vm1903_vm14 = vweird.f32 %v2950_v26 }
0x18a9   :  { %vm1904_vm0 = vmor %vm1902_vm15, %vm1903_vm14 }
0x18aa   :  { %v1899_v28 = vsub.f32 1.0, %v1898_v0 }
0x18ac   :  { %v1900_v6 = vmul.f32 %v2950_v26, %v1899_v28 }
0x18ae   :  { %v1901_v57 = vadd.f32 %v2950_v26, %v1900_v6 }
0x18b0   :  { %v1905_v9 = vsel %vm1904_vm0, %v2950_v26, %v1901_v57 }
0x18b1   :  { %v1910_v16 = vsel %vm1907_vm1, %v1909_v14, %v1905_v9 }
0x18b2   :  { %v1913_v43 = vmul.f32 %v1910_v16, %v3695_v31 }
0x190f   :  { %v1916_v23 = vpop.permute.xlu1 %1915 }
0x1910   :  { %v1918_v12 = vmul.f32 %v1916_v23, %v1910_v16 }
0x1912   :  { %1920 = vrot.lane.b32.xlu0 %v1918_v12, %s3124_s2 }
0x1917   :  { %v1884_v40 = vpop.permute.xlu1 %1883 }
0x1918   :  { %v3725_v29 = vadd.f32 %v1884_v40, %v1876_v37 }
0x191a   :  { %2951 = vtanh.f32 %v3725_v29 }
0x1920   :  { %v2952_v42 = vpop.eup %2951 }
0x1921   :  { %1889 = vrot.lane.b32.xlu0 %v2952_v42, %s3123_s1 }
0x1984   :  { %v1921_v44 = vpop.permute.xlu0 %1920 }
0x1985   :  { %v3730_v11 = vadd.f32 %v1921_v44, %v1913_v43 }
0x1987   :  { %2953 = vtanh.f32 %v3730_v11 }
0x198d   :  { %v2954_v46 = vpop.eup %2953 }
0x198e   :  { %1926 = vrot.lane.b32.xlu2 %v2954_v46, %s3123_s1 }
0x1993   :  { %v1890_v47 = vpop.permute.xlu0 %1889 }
0x1994   :  { %v1892_v61 = vmul.f32 %v1890_v47, %v1873_v59 }
0x1996   :  { %1931 = vrot.lane.b32.xlu2 %v1892_v61, %s3124_s2 }
0x19e8   :  { %v1927_v48 = vpop.permute.xlu2 %1926 }
0x19e9   :  { %v1929_v38 = vmul.f32 %v1927_v48, %v1910_v16 }
0x19eb   :  { %1936 = vrot.lane.b32.xlu1 %v1929_v38, %s3124_s2 }
0x19f0   :  { %v1932_v49 = vpop.permute.xlu2 %1931 }
0x19f1   :  { %1934 = vst.msk [vmem:[#allocation4 + $0x10] sm:$0xff] %vm232_vm9, %v1932_v49  ;;  %2749 = vmatmul.msk.f32.vlgmr.msrb.gmra.mxu2 %vm232_vm9, %v1932_v49 }
0x19f2   :  { %2219 = vmatpush.msrb.mxu2 %v3551_v32 }
0x19f4   :  { %2220 = vmatpush.msrb.mxu2 %v3553_v35 }
0x19f6   :  { %2221 = vmatpush.msrb.mxu2 %v3568_v45 }
0x19f8   :  { %2222 = vmatpush.msrb.mxu2 %v3570_v55  ;;  %v2602_v31 = vld [vmem:[#allocation4 + $0x10] sm:$0xff] }
0x19f9   :  { %2610 = vst.msk [vmem:[%s3940_s9 + $0x10] sm:$0xff] %vm232_vm9, %v2602_v31 }
0x1a5d   :  { %v1937_v51 = vpop.permute.xlu1 %1936 }
0x1a5e   :  { %1939 = vst.msk [vmem:[#allocation5 + $0x28] sm:$0xff] %vm232_vm9, %v1937_v51  ;;  %2750 = vmatmul.msk.f32.vlgmr.msrb.gmra.mxu3 %vm232_vm9, %v1937_v51 }
0x1a5f   :  { %2243 = vmatpush.msrb.mxu3 %v3603_v1 }
0x1a61   :  { %2244 = vmatpush.msrb.mxu3 %v3606_v24 }
0x1a63   :  { %2245 = vmatpush.msrb.mxu3 %v3612_v33 }
0x1a65   :  { %2246 = vmatpush.msrb.mxu3 %v3614_v3 }
0x1a74   :  { %v1960_v54 = vpop.f32.mrf.mxu2 }
0x1a75   :  { %v1963_v30 = vadd.f32 %v1960_v54, %v1469_v52 }
0x1a77   :  { %2955 = vtanh.f32 %v1963_v30  ;;  %v2751_v36 = vmul.f32 -1.442695, %v1963_v30 }
0x1a79   :  { %2957 = vpow2.f32 %v2751_v36 }
0x1a7d   :  { %v2956_v18 = vpop.eup %2955 }
0x1a7e   :  { %2010 = vrot.lane.b32.xlu1 %v2956_v18, %s3123_s1 }
0x1a7f   :  { %v2958_v56 = vpop.eup %2957 }
0x1a80   :  { %v1991_v4 = vadd.f32 1.0, %v2958_v56 }
0x1a82   :  { %2959 = vrcp.f32 %v1991_v4  ;;  %v2003_v59 = vand.u32 2147483648, %v1991_v4  ;;  %vm1997_vm3 = vweird.f32 %v1991_v4  ;;  %v2001_v27 = vand.u32 2147483647, %v1991_v4 }
0x1a84   :  { %v2004_v62 = vor.u32 1.1754944e-38, %v2003_v59  ;;  %vm2002_vm6 = vcmp.eq.f32.partialorder %v2001_v27, 8.507059e+37 }
0x1a88   :  { %v2960_v5 = vpop.eup %2959 }
0x1a89   :  { %v1993_v7 = vmul.f32 %v2960_v5, %v1991_v4  ;;  %vm1998_vm2 = vweird.f32 %v2960_v5 }
0x1a8a   :  { %vm1999_vm4 = vmor %vm1997_vm3, %vm1998_vm2 }
0x1a8b   :  { %v1994_v15 = vsub.f32 1.0, %v1993_v7 }
0x1a8d   :  { %v1995_v50 = vmul.f32 %v2960_v5, %v1994_v15 }
0x1a8f   :  { %v1996_v58 = vadd.f32 %v2960_v5, %v1995_v50 }
0x1a91   :  { %v2000_v60 = vsel %vm1999_vm4, %v2960_v5, %v1996_v58 }
0x1a92   :  { %v2005_v63 = vsel %vm2002_vm6, %v2004_v62, %v2000_v60 }
0x1a93   :  { %v2008_v44 = vmul.f32 %v2005_v63, %v3725_v29 }
0x1ae1   :  { %v1984_v8 = vpop.f32.mrf.mxu3 }
0x1ae2   :  { %v1987_v20 = vadd.f32 %v1984_v8, %v1513_v53  ;;  %v1510_v53 = vadd.f32 %v3642_v21, %v3650_v41 }
0x1ae4   :  { %2961 = vtanh.f32 %v1987_v20  ;;  %v2752_v0 = vmul.f32 -1.442695, %v1987_v20 }
0x1ae6   :  { %2963 = vpow2.f32 %v2752_v0 }
0x1aea   :  { %v2962_v22 = vpop.eup %2961 }
0x1aeb   :  { %2047 = vrot.lane.b32.xlu0 %v2962_v22, %s3123_s1 }
0x1aec   :  { %v2964_v28 = vpop.eup %2963 }
0x1aed   :  { %v2028_v6 = vadd.f32 1.0, %v2964_v28 }
0x1aef   :  { %2965 = vrcp.f32 %v2028_v6  ;;  %v2040_v16 = vand.u32 2147483648, %v2028_v6  ;;  %vm2034_vm8 = vweird.f32 %v2028_v6  ;;  %v2038_v23 = vand.u32 2147483647, %v2028_v6 }
0x1af0   :  { %v2011_v26 = vpop.permute.xlu1 %2010 }
0x1af1   :  { %v2013_v25 = vmul.f32 %v2011_v26, %v2005_v63  ;;  %v2041_v37 = vor.u32 1.1754944e-38, %v2040_v16  ;;  %vm2039_vm11 = vcmp.eq.f32.partialorder %v2038_v23, 8.507059e+37 }
0x1af3   :  { %2015 = vrot.lane.b32.xlu0 %v2013_v25, %s3124_s2 }
0x1af5   :  { %v2966_v57 = vpop.eup %2965 }
0x1af6   :  { %v2030_v10 = vmul.f32 %v2966_v57, %v2028_v6  ;;  %vm2035_vm7 = vweird.f32 %v2966_v57 }
0x1af7   :  { %vm2036_vm10 = vmor %vm2034_vm8, %vm2035_vm7 }
0x1af8   :  { %v2031_v13 = vsub.f32 1.0, %v2030_v10 }
0x1afa   :  { %v2032_v9 = vmul.f32 %v2966_v57, %v2031_v13 }
0x1afc   :  { %v2033_v14 = vadd.f32 %v2966_v57, %v2032_v9 }
0x1afe   :  { %v2037_v12 = vsel %vm2036_vm10, %v2966_v57, %v2033_v14 }
0x1aff   :  { %v2042_v42 = vsel %vm2039_vm11, %v2041_v37, %v2037_v12 }
0x1b00   :  { %v2045_v48 = vmul.f32 %v2042_v42, %v3730_v11 }
0x1b5d   :  { %v2048_v40 = vpop.permute.xlu0 %2047 }
0x1b5e   :  { %v2050_v43 = vmul.f32 %v2048_v40, %v2042_v42 }
0x1b60   :  { %2052 = vrot.lane.b32.xlu2 %v2050_v43, %s3124_s2 }
0x1b65   :  { %v2016_v46 = vpop.permute.xlu0 %2015 }
0x1b66   :  { %v3760_v47 = vadd.f32 %v2016_v46, %v2008_v44 }
0x1b68   :  { %2967 = vtanh.f32 %v3760_v47 }
0x1b6e   :  { %v2968_v61 = vpop.eup %2967 }
0x1b6f   :  { %2021 = vrot.lane.b32.xlu2 %v2968_v61, %s3123_s1 }
0x1bba   :  { %v2053_v38 = vpop.permute.xlu2 %2052 }
0x1bbb   :  { %v3765_v49 = vadd.f32 %v2053_v38, %v2045_v48 }
0x1bbd   :  { %2969 = vtanh.f32 %v3765_v49 }
0x1bc3   :  { %v2970_v31 = vpop.eup %2969 }
0x1bc4   :  { %2058 = vrot.lane.b32.xlu1 %v2970_v31, %s3123_s1 }
0x1bc9   :  { %v2022_v51 = vpop.permute.xlu2 %2021 }
0x1bca   :  { %v2024_v29 = vmul.f32 %v2022_v51, %v2005_v63 }
0x1bcc   :  { %2063 = vrot.lane.b32.xlu1 %v2024_v29, %s3124_s2 }
0x1c36   :  { %v2059_v39 = vpop.permute.xlu1 %2058 }
0x1c37   :  { %v2061_v52 = vmul.f32 %v2059_v39, %v2042_v42 }
0x1c39   :  { %2068 = vrot.lane.b32.xlu0 %v2061_v52, %s3124_s2 }
0x1c3e   :  { %v2064_v54 = vpop.permute.xlu1 %2063 }
0x1c3f   :  { %2066 = vst.msk [vmem:[#allocation4 + $0x18] sm:$0xff] %vm232_vm9, %v2064_v54  ;;  %2753 = vmatmul.msk.f32.vlgmr.msra.gmra.mxu2 %vm232_vm9, %v2064_v54 }
0x1c40   :  { %2351 = vmatpush.msra.mxu2 %v3551_v32  ;;  %v1471_v32 = vpop.f32.mrf.mxu0 }
0x1c42   :  { %2352 = vmatpush.msra.mxu2 %v3553_v35  ;;  %v1472_v35 = vadd.f32 %v1471_v32, %v3617_v34  ;;  %v3038_v32 = vld [vmem:[#allocation8] sm:$0xff] }
0x1c44   :  { %2353 = vmatpush.msra.mxu2 %v3568_v45 }
0x1c46   :  { %2354 = vmatpush.msra.mxu2 %v3570_v55  ;;  %v2603_v11 = vld [vmem:[#allocation4 + $0x18] sm:$0xff] }
0x1c47   :  { %2611 = vst.msk [vmem:[%s3940_s9 + $0x18] sm:$0xff] %vm232_vm9, %v2603_v11  ;;  %v3036_v11 = vld [vmem:[#allocation8 + $0x10] sm:$0xff] }
0x1cab   :  { %v2069_v30 = vpop.permute.xlu0 %2068 }
0x1cac   :  { %2071 = vst.msk [vmem:[#allocation5 + $0x20] sm:$0xff] %vm232_vm9, %v2069_v30  ;;  %2754 = vmatmul.msk.f32.vlgmr.msra.gmra.mxu3 %vm232_vm9, %v2069_v30  ;;  %v3037_v30 = vld [vmem:[#allocation8 + $0x8] sm:$0xff] }
0x1cad   :  { %2375 = vmatpush.msra.mxu3 %v3603_v1 }
0x1caf   :  { %2376 = vmatpush.msra.mxu3 %v3606_v24 }
0x1cb1   :  { %2377 = vmatpush.msra.mxu3 %v3612_v33 }
0x1cb3   :  { %2378 = vmatpush.msra.mxu3 %v3614_v3 }
0x1cc2   :  { %v2092_v45 = vpop.f32.mrf.mxu2 }
0x1cc3   :  { %v2095_v55 = vadd.f32 %v2092_v45, %v1472_v35 }
0x1cc5   :  { %2971 = vtanh.f32 %v2095_v55  ;;  %v2755_v36 = vmul.f32 -1.442695, %v2095_v55  ;;  %v1474_v55 = vpop.f32.mrf.mxu0 }
0x1cc7   :  { %2973 = vpow2.f32 %v2755_v36 }
0x1ccb   :  { %v2972_v18 = vpop.eup %2971 }
0x1ccc   :  { %2142 = vrot.lane.b32.xlu0 %v2972_v18, %s3123_s1  ;;  %v1475_v18 = vadd.f32 %v1474_v55, %v3617_v34 }
0x1ccd   :  { %v2974_v56 = vpop.eup %2973 }
0x1cce   :  { %v2123_v4 = vadd.f32 1.0, %v2974_v56 }
0x1cd0   :  { %2975 = vrcp.f32 %v2123_v4  ;;  %v2135_v59 = vand.u32 2147483648, %v2123_v4  ;;  %vm2129_vm13 = vweird.f32 %v2123_v4  ;;  %v2133_v27 = vand.u32 2147483647, %v2123_v4 }
0x1cd2   :  { %v2136_v62 = vor.u32 1.1754944e-38, %v2135_v59  ;;  %vm2134_vm15 = vcmp.eq.f32.partialorder %v2133_v27, 8.507059e+37 }
0x1cd6   :  { %v2976_v5 = vpop.eup %2975 }
0x1cd7   :  { %v2125_v7 = vmul.f32 %v2976_v5, %v2123_v4  ;;  %vm2130_vm12 = vweird.f32 %v2976_v5 }
0x1cd8   :  { %vm2131_vm14 = vmor %vm2129_vm13, %vm2130_vm12 }
0x1cd9   :  { %v2126_v15 = vsub.f32 1.0, %v2125_v7 }
0x1cdb   :  { %v2127_v50 = vmul.f32 %v2976_v5, %v2126_v15 }
0x1cdd   :  { %v2128_v58 = vadd.f32 %v2976_v5, %v2127_v50 }
0x1cdf   :  { %v2132_v60 = vsel %vm2131_vm14, %v2976_v5, %v2128_v58 }
0x1ce0   :  { %v2137_v26 = vsel %vm2134_vm15, %v2136_v62, %v2132_v60 }
0x1ce1   :  { %v2140_v43 = vmul.f32 %v2137_v26, %v3760_v47 }
0x1d2f   :  { %v2116_v8 = vpop.f32.mrf.mxu3 }
0x1d30   :  { %v2119_v20 = vadd.f32 %v2116_v8, %v1510_v53 }
0x1d32   :  { %2977 = vtanh.f32 %v2119_v20  ;;  %v2756_v25 = vmul.f32 -1.442695, %v2119_v20 }
0x1d34   :  { %2979 = vpow2.f32 %v2756_v25 }
0x1d38   :  { %v2978_v22 = vpop.eup %2977 }
0x1d39   :  { %2179 = vrot.lane.b32.xlu2 %v2978_v22, %s3123_s1 }
0x1d3a   :  { %v2980_v0 = vpop.eup %2979 }
0x1d3b   :  { %v2160_v28 = vadd.f32 1.0, %v2980_v0 }
0x1d3d   :  { %2981 = vrcp.f32 %v2160_v28  ;;  %v2172_v14 = vand.u32 2147483648, %v2160_v28  ;;  %vm2166_vm1 = vweird.f32 %v2160_v28  ;;  %v2170_v16 = vand.u32 2147483647, %v2160_v28 }
0x1d3e   :  { %v2143_v63 = vpop.permute.xlu0 %2142 }
0x1d3f   :  { %v2145_v21 = vmul.f32 %v2143_v63, %v2137_v26  ;;  %v2173_v12 = vor.u32 1.1754944e-38, %v2172_v14  ;;  %vm2171_vm3 = vcmp.eq.f32.partialorder %v2170_v16, 8.507059e+37 }
0x1d41   :  { %2147 = vrot.lane.b32.xlu2 %v2145_v21, %s3124_s2 }
0x1d43   :  { %v2982_v6 = vpop.eup %2981 }
0x1d44   :  { %v2162_v57 = vmul.f32 %v2982_v6, %v2160_v28  ;;  %vm2167_vm0 = vweird.f32 %v2982_v6 }
0x1d45   :  { %vm2168_vm2 = vmor %vm2166_vm1, %vm2167_vm0 }
0x1d46   :  { %v2163_v10 = vsub.f32 1.0, %v2162_v57 }
0x1d48   :  { %v2164_v13 = vmul.f32 %v2982_v6, %v2163_v10 }
0x1d4a   :  { %v2165_v9 = vadd.f32 %v2982_v6, %v2164_v13 }
0x1d4c   :  { %v2169_v23 = vsel %vm2168_vm2, %v2982_v6, %v2165_v9 }
0x1d4d   :  { %v2174_v40 = vsel %vm2171_vm3, %v2173_v12, %v2169_v23 }
0x1d4e   :  { %v2177_v48 = vmul.f32 %v2174_v40, %v3765_v49  ;;  %v3035_v49 = vld [vmem:[#allocation8 + $0x18] sm:$0xff] }
0x1d93   :  { %v2180_v37 = vpop.permute.xlu2 %2179 }
0x1d94   :  { %v2182_v42 = vmul.f32 %v2180_v37, %v2174_v40 }
0x1d96   :  { %2184 = vrot.lane.b32.xlu1 %v2182_v42, %s3124_s2 }
0x1d9b   :  { %v2148_v44 = vpop.permute.xlu2 %2147 }
0x1d9c   :  { %v3795_v46 = vadd.f32 %v2148_v44, %v2140_v43 }
0x1d9e   :  { %2983 = vtanh.f32 %v3795_v46 }
0x1da4   :  { %v2984_v61 = vpop.eup %2983 }
0x1da5   :  { %2153 = vrot.lane.b32.xlu1 %v2984_v61, %s3123_s1 }
0x1e08   :  { %v2185_v38 = vpop.permute.xlu1 %2184 }
0x1e09   :  { %v3800_v31 = vadd.f32 %v2185_v38, %v2177_v48 }
0x1e0b   :  { %2985 = vtanh.f32 %v3800_v31 }
0x1e11   :  { %v2986_v51 = vpop.eup %2985 }
0x1e12   :  { %2190 = vrot.lane.b32.xlu0 %v2986_v51, %s3123_s1 }
0x1e17   :  { %v2154_v29 = vpop.permute.xlu1 %2153 }
0x1e18   :  { %v2156_v47 = vmul.f32 %v2154_v29, %v2137_v26 }
0x1e1a   :  { %2195 = vrot.lane.b32.xlu0 %v2156_v47, %s3124_s2 }
0x1e84   :  { %v2191_v39 = vpop.permute.xlu0 %2190 }
0x1e85   :  { %v2193_v52 = vmul.f32 %v2191_v39, %v2174_v40 }
0x1e87   :  { %2200 = vrot.lane.b32.xlu2 %v2193_v52, %s3124_s2 }
0x1e8c   :  { %v2196_v54 = vpop.permute.xlu0 %2195 }
0x1e8d   :  { %2198 = vst.msk [vmem:[#allocation4 + $0x20] sm:$0xff] %vm232_vm9, %v2196_v54  ;;  %2757 = vmatmul.msk.f32.vlgmr.msrb.gmra.mxu2 %vm232_vm9, %v2196_v54 }
0x1e8e   :  { %2483 = vmatpush.msrb.mxu2 %v3035_v49  ;;  %v1477_v49 = vpop.f32.mrf.mxu0 }
0x1e90   :  { %2484 = vmatpush.msrb.mxu2 %v3036_v11  ;;  %v1478_v11 = vadd.f32 %v1477_v49, %v3617_v34 }
0x1e92   :  { %2485 = vmatpush.msrb.mxu2 %v3037_v30 }
0x1e94   :  { %2486 = vmatpush.msrb.mxu2 %v3038_v32  ;;  %v2604_v35 = vld [vmem:[#allocation4 + $0x20] sm:$0xff] }
0x1e95   :  { %2612 = vst.msk [vmem:[%s3940_s9 + $0x20] sm:$0xff] %vm232_vm9, %v2604_v35 }
0x1ee1   :  { %v2201_v45 = vpop.permute.xlu2 %2200 }
0x1ee2   :  { %2203 = vst.msk [vmem:[#allocation5 + $0x18] sm:$0xff] %vm232_vm9, %v2201_v45  ;;  %2758 = vmatmul.msk.f32.vlgmr.msrb.gmra.mxu3 %vm232_vm9, %v2201_v45 }
0x1ee3   :  { %2507 = vmatpush.msrb.mxu3 %v3603_v1 }
0x1ee5   :  { %2508 = vmatpush.msrb.mxu3 %v3606_v24 }
0x1ee7   :  { %2509 = vmatpush.msrb.mxu3 %v3612_v33  ;;  %v1507_v33 = vadd.f32 %v3640_v19, %v3650_v41 }
0x1ee9   :  { %2510 = vmatpush.msrb.mxu3 %v3614_v3 }
0x1f10   :  { %v2224_v36 = vpop.f32.mrf.mxu2 }
0x1f11   :  { %v2227_v56 = vadd.f32 %v2224_v36, %v1475_v18 }
0x1f13   :  { %2987 = vtanh.f32 %v2227_v56  ;;  %v2759_v5 = vmul.f32 -1.442695, %v2227_v56 }
0x1f15   :  { %2989 = vpow2.f32 %v2759_v5 }
0x1f19   :  { %v2988_v4 = vpop.eup %2987 }
0x1f1a   :  { %2274 = vrot.lane.b32.xlu2 %v2988_v4, %s3123_s1  ;;  %v1504_v4 = vadd.f32 %v3638_v2, %v3650_v41 }
0x1f1b   :  { %v2990_v7 = vpop.eup %2989 }
0x1f1c   :  { %v2255_v53 = vadd.f32 1.0, %v2990_v7 }
0x1f1e   :  { %2991 = vrcp.f32 %v2255_v53  ;;  %v2267_v22 = vand.u32 2147483648, %v2255_v53  ;;  %vm2261_vm6 = vweird.f32 %v2255_v53  ;;  %v2265_v59 = vand.u32 2147483647, %v2255_v53 }
0x1f20   :  { %v2268_v60 = vor.u32 1.1754944e-38, %v2267_v22  ;;  %vm2266_vm8 = vcmp.eq.f32.partialorder %v2265_v59, 8.507059e+37 }
0x1f24   :  { %v2992_v1 = vpop.eup %2991 }
0x1f25   :  { %v2257_v24 = vmul.f32 %v2992_v1, %v2255_v53  ;;  %vm2262_vm4 = vweird.f32 %v2992_v1 }
0x1f26   :  { %vm2263_vm7 = vmor %vm2261_vm6, %vm2262_vm4 }
0x1f27   :  { %v2258_v8 = vsub.f32 1.0, %v2257_v24 }
0x1f29   :  { %v2259_v20 = vmul.f32 %v2992_v1, %v2258_v8 }
0x1f2b   :  { %v2260_v50 = vadd.f32 %v2992_v1, %v2259_v20 }
0x1f2d   :  { %v2264_v27 = vsel %vm2263_vm7, %v2992_v1, %v2260_v50 }
0x1f2e   :  { %v2269_v63 = vsel %vm2266_vm8, %v2268_v60, %v2264_v27 }
0x1f2f   :  { %v2272_v40 = vmul.f32 %v2269_v63, %v3795_v46 }
0x1f65   :  { %v2248_v3 = vpop.f32.mrf.mxu3 }
0x1f66   :  { %v2251_v15 = vadd.f32 %v2248_v3, %v1507_v33 }
0x1f68   :  { %2993 = vtanh.f32 %v2251_v15  ;;  %v2760_v26 = vmul.f32 -1.442695, %v2251_v15 }
0x1f6a   :  { %2995 = vpow2.f32 %v2760_v26 }
0x1f6e   :  { %v2994_v58 = vpop.eup %2993 }
0x1f6f   :  { %2311 = vrot.lane.b32.xlu1 %v2994_v58, %s3123_s1 }
0x1f70   :  { %v2996_v21 = vpop.eup %2995 }
0x1f71   :  { %v2292_v25 = vadd.f32 1.0, %v2996_v21 }
0x1f73   :  { %2997 = vrcp.f32 %v2292_v25  ;;  %v2304_v13 = vand.u32 2147483648, %v2292_v25  ;;  %vm2298_vm11 = vweird.f32 %v2292_v25  ;;  %v2302_v9 = vand.u32 2147483647, %v2292_v25 }
0x1f74   :  { %v2275_v62 = vpop.permute.xlu2 %2274 }
0x1f75   :  { %v2277_v19 = vmul.f32 %v2275_v62, %v2269_v63  ;;  %v2305_v16 = vor.u32 1.1754944e-38, %v2304_v13  ;;  %vm2303_vm13 = vcmp.eq.f32.partialorder %v2302_v9, 8.507059e+37 }
0x1f77   :  { %2279 = vrot.lane.b32.xlu1 %v2277_v19, %s3124_s2 }
0x1f79   :  { %v2998_v0 = vpop.eup %2997 }
0x1f7a   :  { %v2294_v28 = vmul.f32 %v2998_v0, %v2292_v25  ;;  %vm2299_vm10 = vweird.f32 %v2998_v0 }
0x1f7b   :  { %vm2300_vm12 = vmor %vm2298_vm11, %vm2299_vm10 }
0x1f7c   :  { %v2295_v6 = vsub.f32 1.0, %v2294_v28 }
0x1f7e   :  { %v2296_v57 = vmul.f32 %v2998_v0, %v2295_v6 }
0x1f80   :  { %v2297_v10 = vadd.f32 %v2998_v0, %v2296_v57 }
0x1f82   :  { %v2301_v14 = vsel %vm2300_vm12, %v2998_v0, %v2297_v10 }
0x1f83   :  { %v2306_v23 = vsel %vm2303_vm13, %v2305_v16, %v2301_v14 }
0x1f84   :  { %v2309_v61 = vmul.f32 %v2306_v23, %v3800_v31 }
0x1fe1   :  { %v2312_v12 = vpop.permute.xlu1 %2311 }
0x1fe2   :  { %v2314_v37 = vmul.f32 %v2312_v12, %v2306_v23 }
0x1fe4   :  { %2316 = vrot.lane.b32.xlu0 %v2314_v37, %s3124_s2 }
0x1fe9   :  { %v2280_v42 = vpop.permute.xlu1 %2279 }
0x1fea   :  { %v3826_v43 = vadd.f32 %v2280_v42, %v2272_v40 }
0x1fec   :  { %2999 = vtanh.f32 %v3826_v43 }
0x1ff2   :  { %v3000_v44 = vpop.eup %2999 }
0x1ff3   :  { %2285 = vrot.lane.b32.xlu0 %v3000_v44, %s3123_s1 }
0x2056   :  { %v2317_v48 = vpop.permute.xlu0 %2316 }
0x2057   :  { %v3831_v38 = vadd.f32 %v2317_v48, %v2309_v61 }
0x2059   :  { %3001 = vtanh.f32 %v3831_v38 }
0x205f   :  { %v3002_v51 = vpop.eup %3001 }
0x2060   :  { %2322 = vrot.lane.b32.xlu2 %v3002_v51, %s3123_s1 }
0x2065   :  { %v2286_v29 = vpop.permute.xlu0 %2285 }
0x2066   :  { %v2288_v46 = vmul.f32 %v2286_v29, %v2269_v63  ;;  %v1480_v29 = vpop.f32.mrf.mxu0 }
0x2068   :  { %2327 = vrot.lane.b32.xlu2 %v2288_v46, %s3124_s2  ;;  %v1481_v46 = vadd.f32 %v1480_v29, %v3617_v34 }
0x20ba   :  { %v2323_v47 = vpop.permute.xlu2 %2322 }
0x20bb   :  { %v2325_v39 = vmul.f32 %v2323_v47, %v2306_v23 }
0x20bd   :  { %2332 = vrot.lane.b32.xlu1 %v2325_v39, %s3124_s2 }
0x20c2   :  { %v2328_v52 = vpop.permute.xlu2 %2327 }
0x20c3   :  { %2330 = vst.msk [vmem:[#allocation4 + $0x28] sm:$0xff] %vm232_vm9, %v2328_v52  ;;  %2761 = vmatmul.msk.f32.vlgmr.msra.gmra.mxu2 %vm232_vm9, %v2328_v52 }
0x20ca   :  { %v2605_v31 = vld [vmem:[#allocation4 + $0x28] sm:$0xff] }
0x20cb   :  { %2613 = vst.msk [vmem:[%s3940_s9 + $0x28] sm:$0xff] %vm232_vm9, %v2605_v31 }
0x212f   :  { %v2333_v54 = vpop.permute.xlu1 %2332 }
0x2130   :  { %2335 = vst.msk [vmem:[#allocation5 + $0x10] sm:$0xff] %vm232_vm9, %v2333_v54  ;;  %2762 = vmatmul.msk.f32.vlgmr.msra.gmra.mxu3 %vm232_vm9, %v2333_v54 }
0x2146   :  { %v2356_v30 = vpop.f32.mrf.mxu2 }
0x2147   :  { %v2359_v32 = vadd.f32 %v2356_v30, %v1478_v11 }
0x2149   :  { %3003 = vtanh.f32 %v2359_v32  ;;  %v2763_v45 = vmul.f32 -1.442695, %v2359_v32  ;;  %v1501_v32 = vadd.f32 %v3636_v17, %v3650_v41 }
0x214b   :  { %3005 = vpow2.f32 %v2763_v45 }
0x214f   :  { %v3004_v35 = vpop.eup %3003 }
0x2150   :  { %2406 = vrot.lane.b32.xlu1 %v3004_v35, %s3123_s1 }
0x2151   :  { %v3006_v55 = vpop.eup %3005 }
0x2152   :  { %v2387_v18 = vadd.f32 1.0, %v3006_v55 }
0x2154   :  { %3007 = vrcp.f32 %v2387_v18  ;;  %v2399_v3 = vand.u32 2147483648, %v2387_v18  ;;  %vm2393_vm15 = vweird.f32 %v2387_v18  ;;  %v2397_v8 = vand.u32 2147483647, %v2387_v18 }
0x2156   :  { %v2400_v20 = vor.u32 1.1754944e-38, %v2399_v3  ;;  %vm2398_vm1 = vcmp.eq.f32.partialorder %v2397_v8, 8.507059e+37 }
0x215a   :  { %v3008_v36 = vpop.eup %3007 }
0x215b   :  { %v2389_v56 = vmul.f32 %v3008_v36, %v2387_v18  ;;  %vm2394_vm14 = vweird.f32 %v3008_v36 }
0x215c   :  { %vm2395_vm0 = vmor %vm2393_vm15, %vm2394_vm14 }
0x215d   :  { %v2390_v7 = vsub.f32 1.0, %v2389_v56 }
0x215f   :  { %v2391_v1 = vmul.f32 %v3008_v36, %v2390_v7 }
0x2161   :  { %v2392_v24 = vadd.f32 %v3008_v36, %v2391_v1 }
0x2163   :  { %v2396_v15 = vsel %vm2395_vm0, %v3008_v36, %v2392_v24 }
0x2164   :  { %v2401_v50 = vsel %vm2398_vm1, %v2400_v20, %v2396_v15 }
0x2165   :  { %v2404_v13 = vmul.f32 %v2401_v50, %v3826_v43 }
0x21b3   :  { %v2380_v5 = vpop.f32.mrf.mxu3 }
0x21b4   :  { %v2383_v53 = vadd.f32 %v2380_v5, %v1504_v4 }
0x21b6   :  { %3009 = vtanh.f32 %v2383_v53  ;;  %v2764_v22 = vmul.f32 -1.442695, %v2383_v53 }
0x21b8   :  { %3011 = vpow2.f32 %v2764_v22 }
0x21bc   :  { %v3010_v33 = vpop.eup %3009 }
0x21bd   :  { %2443 = vrot.lane.b32.xlu0 %v3010_v33, %s3123_s1 }
0x21be   :  { %v3012_v59 = vpop.eup %3011 }
0x21bf   :  { %v2424_v27 = vadd.f32 1.0, %v3012_v59 }
0x21c1   :  { %3013 = vrcp.f32 %v2424_v27  ;;  %v2436_v21 = vand.u32 2147483648, %v2424_v27  ;;  %vm2430_vm3 = vweird.f32 %v2424_v27  ;;  %v2434_v25 = vand.u32 2147483647, %v2424_v27 }
0x21c2   :  { %v2407_v58 = vpop.permute.xlu1 %2406 }
0x21c3   :  { %v2409_v2 = vmul.f32 %v2407_v58, %v2401_v50  ;;  %v2437_v28 = vor.u32 1.1754944e-38, %v2436_v21  ;;  %vm2435_vm6 = vcmp.eq.f32.partialorder %v2434_v25, 8.507059e+37  ;;  %v2619_v25 = vld [vmem:[#allocation5 + $0x18] sm:$0xff] }
0x21c5   :  { %2411 = vrot.lane.b32.xlu0 %v2409_v2, %s3124_s2 }
0x21c7   :  { %v3014_v60 = vpop.eup %3013 }
0x21c8   :  { %v2426_v62 = vmul.f32 %v3014_v60, %v2424_v27  ;;  %vm2431_vm2 = vweird.f32 %v3014_v60 }
0x21c9   :  { %vm2432_vm4 = vmor %vm2430_vm3, %vm2431_vm2 }
0x21ca   :  { %v2427_v63 = vsub.f32 1.0, %v2426_v62 }
0x21cc   :  { %v2428_v19 = vmul.f32 %v3014_v60, %v2427_v63 }
0x21ce   :  { %v2429_v26 = vadd.f32 %v3014_v60, %v2428_v19 }
0x21d0   :  { %v2433_v0 = vsel %vm2432_vm4, %v3014_v60, %v2429_v26 }
0x21d1   :  { %v2438_v57 = vsel %vm2435_vm6, %v2437_v28, %v2433_v0 }
0x21d2   :  { %v2441_v23 = vmul.f32 %v2438_v57, %v3831_v38 }
0x222f   :  { %v2444_v6 = vpop.permute.xlu0 %2443 }
0x2230   :  { %v2446_v10 = vmul.f32 %v2444_v6, %v2438_v57 }
0x2232   :  { %2448 = vrot.lane.b32.xlu2 %v2446_v10, %s3124_s2 }
0x2237   :  { %v2412_v9 = vpop.permute.xlu0 %2411 }
0x2238   :  { %v3853_v14 = vadd.f32 %v2412_v9, %v2404_v13 }
0x223a   :  { %3015 = vtanh.f32 %v3853_v14 }
0x2240   :  { %v3016_v16 = vpop.eup %3015 }
0x2241   :  { %2417 = vrot.lane.b32.xlu2 %v3016_v16, %s3123_s1  ;;  %v2621_v16 = vld [vmem:[#allocation5 + $0x28] sm:$0xff] }
0x228c   :  { %v2449_v12 = vpop.permute.xlu2 %2448 }
0x228d   :  { %v3858_v37 = vadd.f32 %v2449_v12, %v2441_v23 }
0x228f   :  { %3017 = vtanh.f32 %v3858_v37 }
0x2295   :  { %v3018_v40 = vpop.eup %3017 }
0x2296   :  { %2454 = vrot.lane.b32.xlu1 %v3018_v40, %s3123_s1 }
0x229b   :  { %v2418_v42 = vpop.permute.xlu2 %2417 }
0x229c   :  { %v2420_v43 = vmul.f32 %v2418_v42, %v2401_v50 }
0x229e   :  { %2459 = vrot.lane.b32.xlu1 %v2420_v43, %s3124_s2 }
0x2308   :  { %v2455_v44 = vpop.permute.xlu1 %2454 }
0x2309   :  { %v2457_v61 = vmul.f32 %v2455_v44, %v2438_v57  ;;  %v2620_v44 = vld [vmem:[#allocation5 + $0x20] sm:$0xff] }
0x230b   :  { %2464 = vrot.lane.b32.xlu0 %v2457_v61, %s3124_s2 }
0x2310   :  { %v2460_v48 = vpop.permute.xlu1 %2459 }
0x2311   :  { %2462 = vst.msk [vmem:[#allocation4 + $0x30] sm:$0xff] %vm232_vm9, %v2460_v48  ;;  %2765 = vmatmul.msk.f32.vlgmr.msrb.gmra.mxu2 %vm232_vm9, %v2460_v48  ;;  %v2623_v48 = vld [vmem:[#allocation5 + $0x38] sm:$0xff] }
0x2318   :  { %v2606_v38 = vld [vmem:[#allocation4 + $0x30] sm:$0xff] }
0x2319   :  { %2614 = vst.msk [vmem:[%s3940_s9 + $0x30] sm:$0xff] %vm232_vm9, %v2606_v38 }
0x237d   :  { %v2465_v51 = vpop.permute.xlu0 %2464 }
0x237e   :  { %2467 = vst.msk [vmem:[#allocation5 + $0x8] sm:$0xff] %vm232_vm9, %v2465_v51  ;;  %2766 = vmatmul.msk.f32.vlgmr.msrb.gmra.mxu3 %vm232_vm9, %v2465_v51 }
0x2385   :  { %v2617_v40 = vld [vmem:[#allocation5 + $0x8] sm:$0xff] }
0x2394   :  { %v2488_v47 = vpop.f32.mrf.mxu2 }
0x2395   :  { %v2491_v39 = vadd.f32 %v2488_v47, %v1481_v46  ;;  %v2622_v47 = vld [vmem:[#allocation5 + $0x30] sm:$0xff] }
0x2397   :  { %3019 = vtanh.f32 %v2491_v39  ;;  %v2767_v31 = vmul.f32 -1.442695, %v2491_v39 }
0x2399   :  { %3021 = vpow2.f32 %v2767_v31 }
0x239d   :  { %v3020_v52 = vpop.eup %3019 }
0x239e   :  { %2538 = vrot.lane.b32.xlu0 %v3020_v52, %s3123_s1 }
0x239f   :  { %v3022_v54 = vpop.eup %3021 }
0x23a0   :  { %v2519_v49 = vadd.f32 1.0, %v3022_v54 }
0x23a2   :  { %3023 = vrcp.f32 %v2519_v49  ;;  %v2531_v56 = vand.u32 2147483648, %v2519_v49  ;;  %vm2525_vm8 = vweird.f32 %v2519_v49  ;;  %v2529_v4 = vand.u32 2147483647, %v2519_v49 }
0x23a4   :  { %v2532_v7 = vor.u32 1.1754944e-38, %v2531_v56  ;;  %vm2530_vm11 = vcmp.eq.f32.partialorder %v2529_v4, 8.507059e+37 }
0x23a8   :  { %v3024_v11 = vpop.eup %3023 }
0x23a9   :  { %v2521_v30 = vmul.f32 %v3024_v11, %v2519_v49  ;;  %vm2526_vm7 = vweird.f32 %v3024_v11 }
0x23aa   :  { %vm2527_vm10 = vmor %vm2525_vm8, %vm2526_vm7 }
0x23ab   :  { %v2522_v45 = vsub.f32 1.0, %v2521_v30 }
0x23ad   :  { %v2523_v34 = vmul.f32 %v3024_v11, %v2522_v45 }
0x23af   :  { %v2524_v18 = vadd.f32 %v3024_v11, %v2523_v34 }
0x23b1   :  { %v2528_v5 = vsel %vm2527_vm10, %v3024_v11, %v2524_v18 }
0x23b2   :  { %v2533_v1 = vsel %vm2530_vm11, %v2532_v7, %v2528_v5 }
0x23b3   :  { %v2536_v63 = vmul.f32 %v2533_v1, %v3853_v14  ;;  %v2618_v14 = vld [vmem:[#allocation5 + $0x10] sm:$0xff] }
0x2401   :  { %v2512_v35 = vpop.f32.mrf.mxu3 }
0x2402   :  { %v2515_v55 = vadd.f32 %v2512_v35, %v1501_v32 }
0x2404   :  { %3025 = vtanh.f32 %v2515_v55  ;;  %v2768_v41 = vmul.f32 -1.442695, %v2515_v55 }
0x2406   :  { %3027 = vpow2.f32 %v2768_v41 }
0x240a   :  { %v3026_v36 = vpop.eup %3025 }
0x240b   :  { %2575 = vrot.lane.b32.xlu2 %v3026_v36, %s3123_s1 }
0x240c   :  { %v3028_v24 = vpop.eup %3027 }
0x240d   :  { %v2556_v33 = vadd.f32 1.0, %v3028_v24 }
0x240f   :  { %3029 = vrcp.f32 %v2556_v33  ;;  %v2568_v58 = vand.u32 2147483648, %v2556_v33  ;;  %vm2562_vm13 = vweird.f32 %v2556_v33  ;;  %v2566_v2 = vand.u32 2147483647, %v2556_v33 }
0x2410   :  { %v2539_v53 = vpop.permute.xlu0 %2538 }
0x2411   :  { %v2541_v17 = vmul.f32 %v2539_v53, %v2533_v1  ;;  %v2569_v59 = vor.u32 1.1754944e-38, %v2568_v58  ;;  %vm2567_vm15 = vcmp.eq.f32.partialorder %v2566_v2, 8.507059e+37 }
0x2413   :  { %2543 = vrot.lane.b32.xlu2 %v2541_v17, %s3124_s2 }
0x2415   :  { %v3030_v3 = vpop.eup %3029 }
0x2416   :  { %v2558_v8 = vmul.f32 %v3030_v3, %v2556_v33  ;;  %vm2563_vm12 = vweird.f32 %v3030_v3 }
0x2417   :  { %vm2564_vm14 = vmor %vm2562_vm13, %vm2563_vm12 }
0x2418   :  { %v2559_v15 = vsub.f32 1.0, %v2558_v8 }
0x241a   :  { %v2560_v20 = vmul.f32 %v3030_v3, %v2559_v15 }
0x241c   :  { %v2561_v50 = vadd.f32 %v3030_v3, %v2560_v20 }
0x241e   :  { %v2565_v22 = vsel %vm2564_vm14, %v3030_v3, %v2561_v50 }
0x241f   :  { %v2570_v60 = vsel %vm2567_vm15, %v2569_v59, %v2565_v22 }
0x2420   :  { %v2573_v0 = vmul.f32 %v2570_v60, %v3858_v37 }
0x2465   :  { %v2576_v27 = vpop.permute.xlu2 %2575 }
0x2466   :  { %v2578_v62 = vmul.f32 %v2576_v27, %v2570_v60 }
0x2468   :  { %2580 = vrot.lane.b32.xlu1 %v2578_v62, %s3124_s2 }
0x246d   :  { %v2544_v19 = vpop.permute.xlu2 %2543 }
0x246e   :  { %v2546_v26 = vadd.f32 %v2544_v19, %v2536_v63 }
0x2470   :  { %3031 = vtanh.f32 %v2546_v26 }
0x2476   :  { %v3032_v21 = vpop.eup %3031 }
0x2477   :  { %2549 = vrot.lane.b32.xlu1 %v3032_v21, %s3123_s1 }
0x247f   :  { %2638 = vrot.lane.b32.xlu1 %v2619_v25, %s3124_s2 }
0x24da   :  { %v2581_v28 = vpop.permute.xlu1 %2580 }
0x24db   :  { %v2583_v6 = vadd.f32 %v2581_v28, %v2573_v0 }
0x24dd   :  { %3033 = vtanh.f32 %v2583_v6 }
0x24e3   :  { %v3034_v57 = vpop.eup %3033 }
0x24e4   :  { %2586 = vrot.lane.b32.xlu0 %v3034_v57, %s3123_s1 }
0x24e9   :  { %v2550_v10 = vpop.permute.xlu1 %2549 }
0x24ea   :  { %v2552_v13 = vmul.f32 %v2550_v10, %v2533_v1 }
0x24ec   :  { %2591 = vrot.lane.b32.xlu0 %v2552_v13, %s3124_s2 }
0x24f1   :  { %v2639_v9 = vpop.permute.xlu1 %2638 }
0x24f2   :  { %2659 = vst.msk [vmem:[%s3940_s9 + $0x18] sm:$0xff] %vm1378_vm5, %v2639_v9 }
0x24f4   :  { %2636 = vrot.lane.b32.xlu0 %v2618_v14, %s3124_s2 }
0x24fc   :  { %2642 = vrot.lane.b32.xlu0 %v2621_v16, %s3124_s2 }
0x2556   :  { %v2587_v23 = vpop.permute.xlu0 %2586 }
0x2557   :  { %v2589_v12 = vmul.f32 %v2587_v23, %v2570_v60 }
0x2559   :  { %2596 = vrot.lane.b32.xlu2 %v2589_v12, %s3124_s2 }
0x255e   :  { %v2592_v37 = vpop.permute.xlu0 %2591 }
0x255f   :  { %2594 = vst.msk [vmem:[#allocation4 + $0x38] sm:$0xff] %vm232_vm9, %v2592_v37 }
0x2561   :  { %2634 = vrot.lane.b32.xlu2 %v2617_v40, %s3124_s2 }
0x2566   :  { %v2637_v42 = vpop.permute.xlu0 %2636  ;;  %v2607_v43 = vld [vmem:[#allocation4 + $0x38] sm:$0xff] }
0x2567   :  { %2658 = vst.msk [vmem:[%s3940_s9 + $0x10] sm:$0xff] %vm1378_vm5, %v2637_v42 }
0x2568   :  { %2615 = vst.msk [vmem:[%s3940_s9 + $0x38] sm:$0xff] %vm232_vm9, %v2607_v43 }
0x2569   :  { %2640 = vrot.lane.b32.xlu2 %v2620_v44, %s3124_s2 }
0x256e   :  { %v2643_v61 = vpop.permute.xlu0 %2642 }
0x256f   :  { %2661 = vst.msk [vmem:[%s3940_s9 + $0x28] sm:$0xff] %vm1378_vm5, %v2643_v61 }
0x2571   :  { %2646 = vrot.lane.b32.xlu2 %v2623_v48, %s3124_s2 }
0x25b3   :  { %v2597_v38 = vpop.permute.xlu2 %2596 }
0x25b4   :  { %2599 = vst.msk [vmem:[#allocation5] sm:$0xff] %vm232_vm9, %v2597_v38 }
0x25bb   :  { %v2635_v51 = vpop.permute.xlu2 %2634  ;;  %v2616_v29 = vld [vmem:[#allocation5] sm:$0xff] }
0x25bc   :  { %2657 = vst.msk [vmem:[%s3940_s9 + $0x8] sm:$0xff] %vm1378_vm5, %v2635_v51  ;;  %2632 = vrot.lane.b32.xlu1 %v2616_v29, %s3124_s2 }
0x25c3   :  { %v2641_v46 = vpop.permute.xlu2 %2640 }
0x25c4   :  { %2660 = vst.msk [vmem:[%s3940_s9 + $0x20] sm:$0xff] %vm1378_vm5, %v2641_v46  ;;  %2644 = vrot.lane.b32.xlu1 %v2622_v47, %s3124_s2 }
0x25cb   :  { %v2647_v39 = vpop.permute.xlu2 %2646 }
0x25cc   :  { %2663 = vst.msk [vmem:[%s3940_s9 + $0x38] sm:$0xff] %vm1378_vm5, %v2647_v39 }
0x262e   :  { %v2633_v52 = vpop.permute.xlu1 %2632 }
0x262f   :  { %2656 = vst.msk [vmem:[%s3940_s9] sm:$0xff] %vm1378_vm5, %v2633_v52 }
0x2636   :  { %v2645_v31 = vpop.permute.xlu1 %2644 }
0x2637   :  { %2662 = vst.msk [vmem:[%s3940_s9 + $0x30] sm:$0xff] %vm1378_vm5, %v2645_v31 }
0x2638   :  { %2668 = vsyncpa [#allocation7], 1 }
0x2639   :  { %2669 = vsyncpa [#allocation9], 1 }

</bundles_post_ra>
